<compile_context>
chip_gen: v7x
topology: tpu7x:2x2x1
jax: 0.10.0
libtpu: 0.0.40
codegen_flags: <defaults>
</compile_context>

<pallas_src>
import functools
import math

import jax
import jax.numpy as jnp
from jax.experimental import pallas as pl
from jax.experimental.pallas import tpu as pltpu

LOG_STD_MIN = -20.0
LOG_STD_MAX = 2.0


def _actor_kernel(obs_ref, eps_ref,
                  w1_ref, b1_ref, w2_ref, b2_ref,
                  wih0_ref, bih0_ref, whh0_ref, bhh0_ref,
                  wih1_ref, bih1_ref, whh1_ref, bhh1_ref,
                  whead_ref, bhead_ref,
                  pi_ref, logp_ref,
                  *, act_dim, hidden, act_limit):
    f32 = jnp.float32
    A, H = act_dim, hidden
    H3 = 3 * H

    def mm(a, w):
        # MXU matmul: bf16 (or f32) inputs, f32 accumulation.
        return jnp.dot(a.astype(w.dtype), w, preferred_element_type=f32)

    obs = obs_ref[...].astype(f32)
    B = obs.shape[0]

    # ---- decoupled per-action MLP stacks, packed lane-dense (2 matmuls total) ----
    h = jnp.maximum(mm(obs, w1_ref[...]) + b1_ref[...], 0.0)       # (B, A*h0)
    x = jnp.maximum(mm(h, w2_ref[...]) + b2_ref[...], 0.0)         # (B, A*H)

    # ---- GRU layer 0: fused (2 dirs x 3 gates) input-side preactivations ----
    wih0 = wih0_ref[...]
    bih0 = bih0_ref[...]
    pre0 = [mm(x[:, t * H:(t + 1) * H], wih0) + bih0 for t in range(A)]  # A x (B, 6H)

    def run_dir(pre, whh, bhh, d, reverse):
        # pre[t]: (B, 6H) fused input preactivation (incl. b_ih), both directions.
        # whh: (H, 3H) packed [r|z|n]; bhh: (1, 3H).
        outs = [None] * A
        hs = jnp.zeros((B, H), f32)
        lo = d * H3
        order = range(A - 1, -1, -1) if reverse else range(A)
        for t in order:
            g = pre[t][:, lo:lo + H3]                     # (B, 3H)
            hh = mm(hs, whh) + bhh                        # (B, 3H), one fused matmul
            r = jax.nn.sigmoid(g[:, :H] + hh[:, :H])
            z = jax.nn.sigmoid(g[:, H:2 * H] + hh[:, H:2 * H])
            n = jnp.tanh(g[:, 2 * H:] + r * hh[:, 2 * H:])
            hs = (1.0 - z) * n + z * hs
            outs[t] = hs
        return outs

    h0f = run_dir(pre0, whh0_ref[0], bhh0_ref[0], 0, reverse=False)
    h0r = run_dir(pre0, whh0_ref[1], bhh0_ref[1], 1, reverse=True)

    # ---- GRU layer 1: K-concatenated W_ih -> concat(fwd, rev) is ONE matmul ----
    wih1 = wih1_ref[...]
    bih1 = bih1_ref[...]
    pre1 = [mm(jnp.concatenate([h0f[t], h0r[t]], axis=1), wih1) + bih1
            for t in range(A)]                                            # A x (B, 6H)

    h1f = run_dir(pre1, whh1_ref[0], bhh1_ref[0], 0, reverse=False)
    h1r = run_dir(pre1, whh1_ref[1], bhh1_ref[1], 1, reverse=True)

    # ---- mu / log_std heads: one block-diagonal matmul (no onehot / lane sums) ----
    hcat = jnp.concatenate([hv for t in range(A) for hv in (h1f[t], h1r[t])],
                           axis=1)                                        # (B, A*2H)
    heads = mm(hcat, whead_ref[...]) + bhead_ref[...]                     # (B, 2A)
    mu = heads[:, :A]
    log_std = jnp.clip(heads[:, A:], LOG_STD_MIN, LOG_STD_MAX)
    std = jnp.exp(log_std)

    eps = eps_ref[...].astype(f32)
    pa = mu + std * eps            # rsample (pass eps = 0 for the deterministic mean)

    # squashed-Gaussian log-prob; (pa - mu)/std == eps, constants folded once.
    z2 = -2.0 * pa
    softplus = jnp.maximum(z2, 0.0) + jnp.log(1.0 + jnp.exp(-jnp.abs(z2)))
    per_dim = -0.5 * eps * eps - log_std - 2.0 * (math.log(2.0) - pa - softplus)
    logp_pi = (jnp.sum(per_dim, axis=-1, keepdims=True)
               - 0.5 * math.log(2.0 * math.pi) * A)

    pi_ref[...] = (act_limit * jnp.tanh(pa)).astype(pi_ref.dtype)
    logp_ref[...] = logp_pi.astype(logp_ref.dtype)


_PARAM_ORDER = ('w1', 'b1', 'w2', 'b2',
                'wih0', 'bih0', 'whh0', 'bhh0',
                'wih1', 'bih1', 'whh1', 'bhh1',
                'whead', 'bhead')


def actor_forward(obs, eps, params, *, act_limit):
    B, obs_dim = obs.shape
    A = eps.shape[1]
    H = params['whh0'].shape[1]            # whh0: (2, H, 3H)

    TB = B if B <= 128 else 128
    assert B % TB == 0, "pad the batch outside the kernel so it tiles evenly"
    grid = (B // TB,)

    kernel = functools.partial(_actor_kernel, act_dim=A, hidden=H,
                               act_limit=float(act_limit))

    def _wspec(x):
        # Whole array, same block every grid step (no re-DMA across batch tiles).
        return pl.BlockSpec(x.shape, lambda i, n=x.ndim: (0,) * n)

    args = (obs, eps) + tuple(params[k] for k in _PARAM_ORDER)
    in_specs = ([pl.BlockSpec((TB, obs_dim), lambda i: (i, 0)),
                 pl.BlockSpec((TB, A), lambda i: (i, 0))]
                + [_wspec(params[k]) for k in _PARAM_ORDER])
    out_specs = (pl.BlockSpec((TB, A), lambda i: (i, 0)),
                 pl.BlockSpec((TB, 1), lambda i: (i, 0)))
    out_shape = (jax.ShapeDtypeStruct((B, A), jnp.float32),
                 jax.ShapeDtypeStruct((B, 1), jnp.float32))

    pi, logp = pl.pallas_call(
        kernel,
        grid=grid,
        in_specs=in_specs,
        out_specs=out_specs,
        out_shape=out_shape,
        compiler_params=pltpu.CompilerParams(
            dimension_semantics=("parallel",)),
    )(*args)
    return pi, logp[:, 0]                  # logp_pi has shape (B,), as in torch


def _block_diag(blocks):
    A, r, c = blocks.shape
    out = jnp.zeros((A * r, A * c), blocks.dtype)
    for i in range(A):
        out = out.at[i * r:(i + 1) * r, i * c:(i + 1) * c].set(blocks[i])
    return out


def init_params(key, obs_dim, act_dim, h0, h1, *, matmul_dtype=jnp.bfloat16):
    """Random init matching the torch module, packed into the kernel layout."""
    A = act_dim
    ks = iter(jax.random.split(key, 32))

    def u(shape, bound):
        return jax.random.uniform(next(ks), shape, jnp.float32, -bound, bound)

    # Raw params (PyTorch conventions): Linear default init range; GRU params
    # re-initialized uniform(-0.1, 0.1).  Weights are generated pre-transposed
    # so x @ W gives the preactivation; GRU gate order (r, z, n); direction
    # order (forward, reverse); layer-1 input is concat(fwd, rev).
    w1 = u((A, obs_dim, h0), 1.0 / math.sqrt(obs_dim))
    b1 = u((A, h0), 1.0 / math.sqrt(obs_dim))
    w2 = u((A, h0, h1), 1.0 / math.sqrt(h0))
    b2 = u((A, h1), 1.0 / math.sqrt(h0))

    wih0 = u((2, 3, h1, h1), 0.1)          # [dir, gate, in, out]
    whh0 = u((2, 3, h1, h1), 0.1)
    bih0 = u((2, 3, h1), 0.1)
    bhh0 = u((2, 3, h1), 0.1)
    wih1 = u((2, 3, 2 * h1, h1), 0.1)
    whh1 = u((2, 3, h1, h1), 0.1)
    bih1 = u((2, 3, h1), 0.1)
    bhh1 = u((2, 3, h1), 0.1)

    hb = 1.0 / math.sqrt(2 * h1)
    wmu = u((A, 2 * h1), hb)
    bmu = u((A,), hb)
    wls = u((A, 2 * h1), hb)
    bls = u((A,), hb)

    # ---- pack lane-dense for the kernel (matmul weights cast to bf16) ----
    md = matmul_dtype
    p = {}
    p['w1'] = w1.transpose(1, 0, 2).reshape(obs_dim, A * h0).astype(md)
    p['b1'] = b1.reshape(1, A * h0)
    p['w2'] = _block_diag(w2).astype(md)                     # (A*h0, A*h1)
    p['b2'] = b2.reshape(1, A * h1)

    def pack_wih(w):                       # (2,3,in,out) -> (in, 6*h1)
        return w.transpose(2, 0, 1, 3).reshape(w.shape[2], 6 * h1).astype(md)

    def pack_whh(w):                       # (2,3,h1,h1) -> (2, h1, 3*h1)
        return w.transpose(0, 2, 1, 3).reshape(2, h1, 3 * h1).astype(md)

    p['wih0'] = pack_wih(wih0)
    p['bih0'] = bih0.reshape(1, 6 * h1)
    p['whh0'] = pack_whh(whh0)
    p['bhh0'] = bhh0.reshape(2, 1, 3 * h1)
    p['wih1'] = pack_wih(wih1)
    p['bih1'] = bih1.reshape(1, 6 * h1)
    p['whh1'] = pack_whh(whh1)
    p['bhh1'] = bhh1.reshape(2, 1, 3 * h1)

    # Heads: block-diagonal (A*2*h1, 2A); columns [0:A] = mu, [A:2A] = log_std.
    whead = jnp.zeros((A * 2 * h1, 2 * A), jnp.float32)
    for j in range(A):
        whead = whead.at[j * 2 * h1:(j + 1) * 2 * h1, j].set(wmu[j])
        whead = whead.at[j * 2 * h1:(j + 1) * 2 * h1, A + j].set(wls[j])
    p['whead'] = whead.astype(md)
    p['bhead'] = jnp.concatenate([bmu, bls]).reshape(1, 2 * A)
    return p


if __name__ == "__main__":
    obs_dim, act_dim = 8, 4
    hidden_sizes = (32, 32)
    act_limit = 1.0
    B = 2

    key = jax.random.PRNGKey(0)
    k_obs, k_eps, k_par = jax.random.split(key, 3)
    obs = jax.random.normal(k_obs, (B, obs_dim), jnp.float32)
    eps = jax.random.normal(k_eps, (B, act_dim), jnp.float32)   # Normal rsample noise
    params = init_params(k_par, obs_dim, act_dim, hidden_sizes[0], hidden_sizes[1])

    pi_action, logp_pi = actor_forward(obs, eps, params, act_limit=act_limit)
    jax.block_until_ready((pi_action, logp_pi))
    assert pi_action.shape == (B, act_dim) and logp_pi.shape == (B,)
    assert bool(jnp.all(jnp.isfinite(pi_action))) and bool(jnp.all(jnp.isfinite(logp_pi)))
    print("KERNEL_OK")
</pallas_src>

<mosaic_0001>
module attributes {stable_mosaic.version = 11 : i64} {
  func.func @_actor_kernel(%arg0: i32, %arg1: memref<2x8xf32, #tpu.memory_space<vmem>>, %arg2: memref<2x4xf32, #tpu.memory_space<vmem>>, %arg3: memref<8x128xbf16, #tpu.memory_space<vmem>>, %arg4: memref<1x128xf32, #tpu.memory_space<vmem>>, %arg5: memref<128x128xbf16, #tpu.memory_space<vmem>>, %arg6: memref<1x128xf32, #tpu.memory_space<vmem>>, %arg7: memref<32x192xbf16, #tpu.memory_space<vmem>>, %arg8: memref<1x192xf32, #tpu.memory_space<vmem>>, %arg9: memref<2x32x96xbf16, #tpu.memory_space<vmem>>, %arg10: memref<2x1x96xf32, #tpu.memory_space<vmem>>, %arg11: memref<64x192xbf16, #tpu.memory_space<vmem>>, %arg12: memref<1x192xf32, #tpu.memory_space<vmem>>, %arg13: memref<2x32x96xbf16, #tpu.memory_space<vmem>>, %arg14: memref<2x1x96xf32, #tpu.memory_space<vmem>>, %arg15: memref<256x8xbf16, #tpu.memory_space<vmem>>, %arg16: memref<1x8xf32, #tpu.memory_space<vmem>>, %arg17: memref<2x4xf32, #tpu.memory_space<vmem>>, %arg18: memref<2x1xf32, #tpu.memory_space<vmem>>) attributes {dimension_semantics = [#tpu.dimension_semantics<parallel>], iteration_bounds = array<i64: 1>, scalar_prefetch = 0 : i64, scratch_operands = 0 : i64, tpu.core_type = #tpu.core_type<tc>, window_params = [{transform_indices = @transform_0, window_bounds = array<i64: 2, 8>}, {transform_indices = @transform_1, window_bounds = array<i64: 2, 4>}, {pipeline_mode = #tpu.pipeline_mode<synchronous>, transform_indices = @transform_2, window_bounds = array<i64: 8, 128>}, {pipeline_mode = #tpu.pipeline_mode<synchronous>, transform_indices = @transform_3, window_bounds = array<i64: 1, 128>}, {pipeline_mode = #tpu.pipeline_mode<synchronous>, transform_indices = @transform_4, window_bounds = array<i64: 128, 128>}, {pipeline_mode = #tpu.pipeline_mode<synchronous>, transform_indices = @transform_5, window_bounds = array<i64: 1, 128>}, {pipeline_mode = #tpu.pipeline_mode<synchronous>, transform_indices = @transform_6, window_bounds = array<i64: 32, 192>}, {pipeline_mode = #tpu.pipeline_mode<synchronous>, transform_indices = @transform_7, window_bounds = array<i64: 1, 192>}, {pipeline_mode = #tpu.pipeline_mode<synchronous>, transform_indices = @transform_8, window_bounds = array<i64: 2, 32, 96>}, {pipeline_mode = #tpu.pipeline_mode<synchronous>, transform_indices = @transform_9, window_bounds = array<i64: 2, 1, 96>}, {pipeline_mode = #tpu.pipeline_mode<synchronous>, transform_indices = @transform_10, window_bounds = array<i64: 64, 192>}, {pipeline_mode = #tpu.pipeline_mode<synchronous>, transform_indices = @transform_11, window_bounds = array<i64: 1, 192>}, {pipeline_mode = #tpu.pipeline_mode<synchronous>, transform_indices = @transform_12, window_bounds = array<i64: 2, 32, 96>}, {pipeline_mode = #tpu.pipeline_mode<synchronous>, transform_indices = @transform_13, window_bounds = array<i64: 2, 1, 96>}, {pipeline_mode = #tpu.pipeline_mode<synchronous>, transform_indices = @transform_14, window_bounds = array<i64: 256, 8>}, {pipeline_mode = #tpu.pipeline_mode<synchronous>, transform_indices = @transform_15, window_bounds = array<i64: 1, 8>}, {transform_indices = @transform_16, window_bounds = array<i64: 2, 4>}, {transform_indices = @transform_17, window_bounds = array<i64: 2, 1>}]} {
    %c0 = arith.constant 0 : index
    %c0_0 = arith.constant 0 : index
    %0 = vector.load %arg1[%c0, %c0_0] : memref<2x8xf32, #tpu.memory_space<vmem>>, vector<2x8xf32>
    %c0_1 = arith.constant 0 : index
    %c0_2 = arith.constant 0 : index
    %1 = vector.load %arg3[%c0_1, %c0_2] : memref<8x128xbf16, #tpu.memory_space<vmem>>, vector<8x128xbf16>
    %2 = arith.truncf %0 : vector<2x8xf32> to vector<2x8xbf16>
    %cst = arith.constant dense<0.000000e+00> : vector<2x128xf32>
    %3 = tpu.matmul %2, %1, %cst {dimension_numbers = #tpu.dot_dimension_numbers<[1], [0], [0], [1], [0, 0, 1, 1], [], []>} : vector<2x8xbf16>, vector<8x128xbf16>, vector<2x128xf32> -> vector<2x128xf32>
    %c0_3 = arith.constant 0 : index
    %c0_4 = arith.constant 0 : index
    %4 = vector.load %arg4[%c0_3, %c0_4] : memref<1x128xf32, #tpu.memory_space<vmem>>, vector<1x128xf32>
    %5 = vector.broadcast %4 : vector<1x128xf32> to vector<2x128xf32>
    %6 = arith.addf %3, %5 : vector<2x128xf32>
    %cst_5 = arith.constant 0.000000e+00 : f32
    %7 = vector.broadcast %cst_5 : f32 to vector<2x128xf32>
    %8 = arith.maximumf %6, %7 : vector<2x128xf32>
    %c0_6 = arith.constant 0 : index
    %c0_7 = arith.constant 0 : index
    %9 = vector.load %arg5[%c0_6, %c0_7] : memref<128x128xbf16, #tpu.memory_space<vmem>>, vector<128x128xbf16>
    %10 = arith.truncf %8 : vector<2x128xf32> to vector<2x128xbf16>
    %cst_8 = arith.constant dense<0.000000e+00> : vector<2x128xf32>
    %11 = tpu.matmul %10, %9, %cst_8 {dimension_numbers = #tpu.dot_dimension_numbers<[1], [0], [0], [1], [0, 0, 1, 1], [], []>} : vector<2x128xbf16>, vector<128x128xbf16>, vector<2x128xf32> -> vector<2x128xf32>
    %c0_9 = arith.constant 0 : index
    %c0_10 = arith.constant 0 : index
    %12 = vector.load %arg6[%c0_9, %c0_10] : memref<1x128xf32, #tpu.memory_space<vmem>>, vector<1x128xf32>
    %13 = vector.broadcast %12 : vector<1x128xf32> to vector<2x128xf32>
    %14 = arith.addf %11, %13 : vector<2x128xf32>
    %cst_11 = arith.constant 0.000000e+00 : f32
    %15 = vector.broadcast %cst_11 : f32 to vector<2x128xf32>
    %16 = arith.maximumf %14, %15 : vector<2x128xf32>
    %c0_12 = arith.constant 0 : index
    %c0_13 = arith.constant 0 : index
    %17 = vector.load %arg7[%c0_12, %c0_13] : memref<32x192xbf16, #tpu.memory_space<vmem>>, vector<32x192xbf16>
    %c0_14 = arith.constant 0 : index
    %c0_15 = arith.constant 0 : index
    %18 = vector.load %arg8[%c0_14, %c0_15] : memref<1x192xf32, #tpu.memory_space<vmem>>, vector<1x192xf32>
    %19 = vector.extract_strided_slice %16 {offsets = [0, 0], sizes = [2, 32], strides = [1, 1]} : vector<2x128xf32> to vector<2x32xf32>
    %20 = arith.truncf %19 : vector<2x32xf32> to vector<2x32xbf16>
    %cst_16 = arith.constant dense<0.000000e+00> : vector<2x192xf32>
    %21 = tpu.matmul %20, %17, %cst_16 {dimension_numbers = #tpu.dot_dimension_numbers<[1], [0], [0], [1], [0, 0, 1, 1], [], []>} : vector<2x32xbf16>, vector<32x192xbf16>, vector<2x192xf32> -> vector<2x192xf32>
    %22 = vector.broadcast %18 : vector<1x192xf32> to vector<2x192xf32>
    %23 = arith.addf %21, %22 : vector<2x192xf32>
    %24 = vector.extract_strided_slice %16 {offsets = [0, 32], sizes = [2, 32], strides = [1, 1]} : vector<2x128xf32> to vector<2x32xf32>
    %25 = arith.truncf %24 : vector<2x32xf32> to vector<2x32xbf16>
    %cst_17 = arith.constant dense<0.000000e+00> : vector<2x192xf32>
    %26 = tpu.matmul %25, %17, %cst_17 {dimension_numbers = #tpu.dot_dimension_numbers<[1], [0], [0], [1], [0, 0, 1, 1], [], []>} : vector<2x32xbf16>, vector<32x192xbf16>, vector<2x192xf32> -> vector<2x192xf32>
    %27 = vector.broadcast %18 : vector<1x192xf32> to vector<2x192xf32>
    %28 = arith.addf %26, %27 : vector<2x192xf32>
    %29 = vector.extract_strided_slice %16 {offsets = [0, 64], sizes = [2, 32], strides = [1, 1]} : vector<2x128xf32> to vector<2x32xf32>
    %30 = arith.truncf %29 : vector<2x32xf32> to vector<2x32xbf16>
    %cst_18 = arith.constant dense<0.000000e+00> : vector<2x192xf32>
    %31 = tpu.matmul %30, %17, %cst_18 {dimension_numbers = #tpu.dot_dimension_numbers<[1], [0], [0], [1], [0, 0, 1, 1], [], []>} : vector<2x32xbf16>, vector<32x192xbf16>, vector<2x192xf32> -> vector<2x192xf32>
    %32 = vector.broadcast %18 : vector<1x192xf32> to vector<2x192xf32>
    %33 = arith.addf %31, %32 : vector<2x192xf32>
    %34 = vector.extract_strided_slice %16 {offsets = [0, 96], sizes = [2, 32], strides = [1, 1]} : vector<2x128xf32> to vector<2x32xf32>
    %35 = arith.truncf %34 : vector<2x32xf32> to vector<2x32xbf16>
    %cst_19 = arith.constant dense<0.000000e+00> : vector<2x192xf32>
    %36 = tpu.matmul %35, %17, %cst_19 {dimension_numbers = #tpu.dot_dimension_numbers<[1], [0], [0], [1], [0, 0, 1, 1], [], []>} : vector<2x32xbf16>, vector<32x192xbf16>, vector<2x192xf32> -> vector<2x192xf32>
    %37 = vector.broadcast %18 : vector<1x192xf32> to vector<2x192xf32>
    %38 = arith.addf %36, %37 : vector<2x192xf32>
    %c0_20 = arith.constant 0 : index
    %c0_21 = arith.constant 0 : index
    %c0_22 = arith.constant 0 : index
    %39 = vector.load %arg9[%c0_20, %c0_21, %c0_22] : memref<2x32x96xbf16, #tpu.memory_space<vmem>>, vector<1x32x96xbf16>
    %40 = vector.shape_cast %39 : vector<1x32x96xbf16> to vector<32x96xbf16>
    %c0_23 = arith.constant 0 : index
    %c0_24 = arith.constant 0 : index
    %c0_25 = arith.constant 0 : index
    %41 = vector.load %arg10[%c0_23, %c0_24, %c0_25] : memref<2x1x96xf32, #tpu.memory_space<vmem>>, vector<1x1x96xf32>
    %42 = vector.shape_cast %41 : vector<1x1x96xf32> to vector<1x96xf32>
    %cst_26 = arith.constant 0.000000e+00 : f32
    %43 = vector.broadcast %cst_26 : f32 to vector<2x32xf32>
    %44 = vector.extract_strided_slice %23 {offsets = [0, 0], sizes = [2, 96], strides = [1, 1]} : vector<2x192xf32> to vector<2x96xf32>
    %45 = arith.truncf %43 : vector<2x32xf32> to vector<2x32xbf16>
    %cst_27 = arith.constant dense<0.000000e+00> : vector<2x96xf32>
    %46 = tpu.matmul %45, %40, %cst_27 {dimension_numbers = #tpu.dot_dimension_numbers<[1], [0], [0], [1], [0, 0, 1, 1], [], []>} : vector<2x32xbf16>, vector<32x96xbf16>, vector<2x96xf32> -> vector<2x96xf32>
    %47 = vector.broadcast %42 : vector<1x96xf32> to vector<2x96xf32>
    %48 = arith.addf %46, %47 : vector<2x96xf32>
    %49 = vector.extract_strided_slice %44 {offsets = [0, 0], sizes = [2, 32], strides = [1, 1]} : vector<2x96xf32> to vector<2x32xf32>
    %50 = vector.extract_strided_slice %48 {offsets = [0, 0], sizes = [2, 32], strides = [1, 1]} : vector<2x96xf32> to vector<2x32xf32>
    %51 = arith.addf %49, %50 : vector<2x32xf32>
    %52 = arith.negf %51 : vector<2x32xf32>
    %53 = math.exp %52 : vector<2x32xf32>
    %cst_28 = arith.constant 1.000000e+00 : f32
    %54 = vector.broadcast %cst_28 : f32 to vector<2x32xf32>
    %55 = arith.addf %54, %53 : vector<2x32xf32>
    %56 = arith.divf %54, %55 : vector<2x32xf32>
    %57 = vector.extract_strided_slice %44 {offsets = [0, 32], sizes = [2, 32], strides = [1, 1]} : vector<2x96xf32> to vector<2x32xf32>
    %58 = vector.extract_strided_slice %48 {offsets = [0, 32], sizes = [2, 32], strides = [1, 1]} : vector<2x96xf32> to vector<2x32xf32>
    %59 = arith.addf %57, %58 : vector<2x32xf32>
    %60 = arith.negf %59 : vector<2x32xf32>
    %61 = math.exp %60 : vector<2x32xf32>
    %cst_29 = arith.constant 1.000000e+00 : f32
    %62 = vector.broadcast %cst_29 : f32 to vector<2x32xf32>
    %63 = arith.addf %62, %61 : vector<2x32xf32>
    %64 = arith.divf %62, %63 : vector<2x32xf32>
    %65 = vector.extract_strided_slice %44 {offsets = [0, 64], sizes = [2, 32], strides = [1, 1]} : vector<2x96xf32> to vector<2x32xf32>
    %66 = vector.extract_strided_slice %48 {offsets = [0, 64], sizes = [2, 32], strides = [1, 1]} : vector<2x96xf32> to vector<2x32xf32>
    %67 = arith.mulf %56, %66 : vector<2x32xf32>
    %68 = arith.addf %65, %67 : vector<2x32xf32>
    %69 = math.tanh %68 : vector<2x32xf32>
    %cst_30 = arith.constant 1.000000e+00 : f32
    %70 = vector.broadcast %cst_30 : f32 to vector<2x32xf32>
    %71 = arith.subf %70, %64 : vector<2x32xf32>
    %72 = arith.mulf %71, %69 : vector<2x32xf32>
    %73 = arith.mulf %64, %43 : vector<2x32xf32>
    %74 = arith.addf %72, %73 : vector<2x32xf32>
    %75 = vector.extract_strided_slice %28 {offsets = [0, 0], sizes = [2, 96], strides = [1, 1]} : vector<2x192xf32> to vector<2x96xf32>
    %76 = arith.truncf %74 : vector<2x32xf32> to vector<2x32xbf16>
    %cst_31 = arith.constant dense<0.000000e+00> : vector<2x96xf32>
    %77 = tpu.matmul %76, %40, %cst_31 {dimension_numbers = #tpu.dot_dimension_numbers<[1], [0], [0], [1], [0, 0, 1, 1], [], []>} : vector<2x32xbf16>, vector<32x96xbf16>, vector<2x96xf32> -> vector<2x96xf32>
    %78 = vector.broadcast %42 : vector<1x96xf32> to vector<2x96xf32>
    %79 = arith.addf %77, %78 : vector<2x96xf32>
    %80 = vector.extract_strided_slice %75 {offsets = [0, 0], sizes = [2, 32], strides = [1, 1]} : vector<2x96xf32> to vector<2x32xf32>
    %81 = vector.extract_strided_slice %79 {offsets = [0, 0], sizes = [2, 32], strides = [1, 1]} : vector<2x96xf32> to vector<2x32xf32>
    %82 = arith.addf %80, %81 : vector<2x32xf32>
    %83 = arith.negf %82 : vector<2x32xf32>
    %84 = math.exp %83 : vector<2x32xf32>
    %cst_32 = arith.constant 1.000000e+00 : f32
    %85 = vector.broadcast %cst_32 : f32 to vector<2x32xf32>
    %86 = arith.addf %85, %84 : vector<2x32xf32>
    %87 = arith.divf %85, %86 : vector<2x32xf32>
    %88 = vector.extract_strided_slice %75 {offsets = [0, 32], sizes = [2, 32], strides = [1, 1]} : vector<2x96xf32> to vector<2x32xf32>
    %89 = vector.extract_strided_slice %79 {offsets = [0, 32], sizes = [2, 32], strides = [1, 1]} : vector<2x96xf32> to vector<2x32xf32>
    %90 = arith.addf %88, %89 : vector<2x32xf32>
    %91 = arith.negf %90 : vector<2x32xf32>
    %92 = math.exp %91 : vector<2x32xf32>
    %cst_33 = arith.constant 1.000000e+00 : f32
    %93 = vector.broadcast %cst_33 : f32 to vector<2x32xf32>
    %94 = arith.addf %93, %92 : vector<2x32xf32>
    %95 = arith.divf %93, %94 : vector<2x32xf32>
    %96 = vector.extract_strided_slice %75 {offsets = [0, 64], sizes = [2, 32], strides = [1, 1]} : vector<2x96xf32> to vector<2x32xf32>
    %97 = vector.extract_strided_slice %79 {offsets = [0, 64], sizes = [2, 32], strides = [1, 1]} : vector<2x96xf32> to vector<2x32xf32>
    %98 = arith.mulf %87, %97 : vector<2x32xf32>
    %99 = arith.addf %96, %98 : vector<2x32xf32>
    %100 = math.tanh %99 : vector<2x32xf32>
    %cst_34 = arith.constant 1.000000e+00 : f32
    %101 = vector.broadcast %cst_34 : f32 to vector<2x32xf32>
    %102 = arith.subf %101, %95 : vector<2x32xf32>
    %103 = arith.mulf %102, %100 : vector<2x32xf32>
    %104 = arith.mulf %95, %74 : vector<2x32xf32>
    %105 = arith.addf %103, %104 : vector<2x32xf32>
    %106 = vector.extract_strided_slice %33 {offsets = [0, 0], sizes = [2, 96], strides = [1, 1]} : vector<2x192xf32> to vector<2x96xf32>
    %107 = arith.truncf %105 : vector<2x32xf32> to vector<2x32xbf16>
    %cst_35 = arith.constant dense<0.000000e+00> : vector<2x96xf32>
    %108 = tpu.matmul %107, %40, %cst_35 {dimension_numbers = #tpu.dot_dimension_numbers<[1], [0], [0], [1], [0, 0, 1, 1], [], []>} : vector<2x32xbf16>, vector<32x96xbf16>, vector<2x96xf32> -> vector<2x96xf32>
    %109 = vector.broadcast %42 : vector<1x96xf32> to vector<2x96xf32>
    %110 = arith.addf %108, %109 : vector<2x96xf32>
    %111 = vector.extract_strided_slice %106 {offsets = [0, 0], sizes = [2, 32], strides = [1, 1]} : vector<2x96xf32> to vector<2x32xf32>
    %112 = vector.extract_strided_slice %110 {offsets = [0, 0], sizes = [2, 32], strides = [1, 1]} : vector<2x96xf32> to vector<2x32xf32>
    %113 = arith.addf %111, %112 : vector<2x32xf32>
    %114 = arith.negf %113 : vector<2x32xf32>
    %115 = math.exp %114 : vector<2x32xf32>
    %cst_36 = arith.constant 1.000000e+00 : f32
    %116 = vector.broadcast %cst_36 : f32 to vector<2x32xf32>
    %117 = arith.addf %116, %115 : vector<2x32xf32>
    %118 = arith.divf %116, %117 : vector<2x32xf32>
    %119 = vector.extract_strided_slice %106 {offsets = [0, 32], sizes = [2, 32], strides = [1, 1]} : vector<2x96xf32> to vector<2x32xf32>
    %120 = vector.extract_strided_slice %110 {offsets = [0, 32], sizes = [2, 32], strides = [1, 1]} : vector<2x96xf32> to vector<2x32xf32>
    %121 = arith.addf %119, %120 : vector<2x32xf32>
    %122 = arith.negf %121 : vector<2x32xf32>
    %123 = math.exp %122 : vector<2x32xf32>
    %cst_37 = arith.constant 1.000000e+00 : f32
    %124 = vector.broadcast %cst_37 : f32 to vector<2x32xf32>
    %125 = arith.addf %124, %123 : vector<2x32xf32>
    %126 = arith.divf %124, %125 : vector<2x32xf32>
    %127 = vector.extract_strided_slice %106 {offsets = [0, 64], sizes = [2, 32], strides = [1, 1]} : vector<2x96xf32> to vector<2x32xf32>
    %128 = vector.extract_strided_slice %110 {offsets = [0, 64], sizes = [2, 32], strides = [1, 1]} : vector<2x96xf32> to vector<2x32xf32>
    %129 = arith.mulf %118, %128 : vector<2x32xf32>
    %130 = arith.addf %127, %129 : vector<2x32xf32>
    %131 = math.tanh %130 : vector<2x32xf32>
    %cst_38 = arith.constant 1.000000e+00 : f32
    %132 = vector.broadcast %cst_38 : f32 to vector<2x32xf32>
    %133 = arith.subf %132, %126 : vector<2x32xf32>
    %134 = arith.mulf %133, %131 : vector<2x32xf32>
    %135 = arith.mulf %126, %105 : vector<2x32xf32>
    %136 = arith.addf %134, %135 : vector<2x32xf32>
    %137 = vector.extract_strided_slice %38 {offsets = [0, 0], sizes = [2, 96], strides = [1, 1]} : vector<2x192xf32> to vector<2x96xf32>
    %138 = arith.truncf %136 : vector<2x32xf32> to vector<2x32xbf16>
    %cst_39 = arith.constant dense<0.000000e+00> : vector<2x96xf32>
    %139 = tpu.matmul %138, %40, %cst_39 {dimension_numbers = #tpu.dot_dimension_numbers<[1], [0], [0], [1], [0, 0, 1, 1], [], []>} : vector<2x32xbf16>, vector<32x96xbf16>, vector<2x96xf32> -> vector<2x96xf32>
    %140 = vector.broadcast %42 : vector<1x96xf32> to vector<2x96xf32>
    %141 = arith.addf %139, %140 : vector<2x96xf32>
    %142 = vector.extract_strided_slice %137 {offsets = [0, 0], sizes = [2, 32], strides = [1, 1]} : vector<2x96xf32> to vector<2x32xf32>
    %143 = vector.extract_strided_slice %141 {offsets = [0, 0], sizes = [2, 32], strides = [1, 1]} : vector<2x96xf32> to vector<2x32xf32>
    %144 = arith.addf %142, %143 : vector<2x32xf32>
    %145 = arith.negf %144 : vector<2x32xf32>
    %146 = math.exp %145 : vector<2x32xf32>
    %cst_40 = arith.constant 1.000000e+00 : f32
    %147 = vector.broadcast %cst_40 : f32 to vector<2x32xf32>
    %148 = arith.addf %147, %146 : vector<2x32xf32>
    %149 = arith.divf %147, %148 : vector<2x32xf32>
    %150 = vector.extract_strided_slice %137 {offsets = [0, 32], sizes = [2, 32], strides = [1, 1]} : vector<2x96xf32> to vector<2x32xf32>
    %151 = vector.extract_strided_slice %141 {offsets = [0, 32], sizes = [2, 32], strides = [1, 1]} : vector<2x96xf32> to vector<2x32xf32>
    %152 = arith.addf %150, %151 : vector<2x32xf32>
    %153 = arith.negf %152 : vector<2x32xf32>
    %154 = math.exp %153 : vector<2x32xf32>
    %cst_41 = arith.constant 1.000000e+00 : f32
    %155 = vector.broadcast %cst_41 : f32 to vector<2x32xf32>
    %156 = arith.addf %155, %154 : vector<2x32xf32>
    %157 = arith.divf %155, %156 : vector<2x32xf32>
    %158 = vector.extract_strided_slice %137 {offsets = [0, 64], sizes = [2, 32], strides = [1, 1]} : vector<2x96xf32> to vector<2x32xf32>
    %159 = vector.extract_strided_slice %141 {offsets = [0, 64], sizes = [2, 32], strides = [1, 1]} : vector<2x96xf32> to vector<2x32xf32>
    %160 = arith.mulf %149, %159 : vector<2x32xf32>
    %161 = arith.addf %158, %160 : vector<2x32xf32>
    %162 = math.tanh %161 : vector<2x32xf32>
    %cst_42 = arith.constant 1.000000e+00 : f32
    %163 = vector.broadcast %cst_42 : f32 to vector<2x32xf32>
    %164 = arith.subf %163, %157 : vector<2x32xf32>
    %165 = arith.mulf %164, %162 : vector<2x32xf32>
    %166 = arith.mulf %157, %136 : vector<2x32xf32>
    %167 = arith.addf %165, %166 : vector<2x32xf32>
    %c1 = arith.constant 1 : index
    %c0_43 = arith.constant 0 : index
    %c0_44 = arith.constant 0 : index
    %168 = vector.load %arg9[%c1, %c0_43, %c0_44] : memref<2x32x96xbf16, #tpu.memory_space<vmem>>, vector<1x32x96xbf16>
    %169 = vector.shape_cast %168 : vector<1x32x96xbf16> to vector<32x96xbf16>
    %c1_45 = arith.constant 1 : index
    %c0_46 = arith.constant 0 : index
    %c0_47 = arith.constant 0 : index
    %170 = vector.load %arg10[%c1_45, %c0_46, %c0_47] : memref<2x1x96xf32, #tpu.memory_space<vmem>>, vector<1x1x96xf32>
    %171 = vector.shape_cast %170 : vector<1x1x96xf32> to vector<1x96xf32>
    %cst_48 = arith.constant 0.000000e+00 : f32
    %172 = vector.broadcast %cst_48 : f32 to vector<2x32xf32>
    %173 = vector.extract_strided_slice %38 {offsets = [0, 96], sizes = [2, 96], strides = [1, 1]} : vector<2x192xf32> to vector<2x96xf32>
    %174 = arith.truncf %172 : vector<2x32xf32> to vector<2x32xbf16>
    %cst_49 = arith.constant dense<0.000000e+00> : vector<2x96xf32>
    %175 = tpu.matmul %174, %169, %cst_49 {dimension_numbers = #tpu.dot_dimension_numbers<[1], [0], [0], [1], [0, 0, 1, 1], [], []>} : vector<2x32xbf16>, vector<32x96xbf16>, vector<2x96xf32> -> vector<2x96xf32>
    %176 = vector.broadcast %171 : vector<1x96xf32> to vector<2x96xf32>
    %177 = arith.addf %175, %176 : vector<2x96xf32>
    %178 = vector.extract_strided_slice %173 {offsets = [0, 0], sizes = [2, 32], strides = [1, 1]} : vector<2x96xf32> to vector<2x32xf32>
    %179 = vector.extract_strided_slice %177 {offsets = [0, 0], sizes = [2, 32], strides = [1, 1]} : vector<2x96xf32> to vector<2x32xf32>
    %180 = arith.addf %178, %179 : vector<2x32xf32>
    %181 = arith.negf %180 : vector<2x32xf32>
    %182 = math.exp %181 : vector<2x32xf32>
    %cst_50 = arith.constant 1.000000e+00 : f32
    %183 = vector.broadcast %cst_50 : f32 to vector<2x32xf32>
    %184 = arith.addf %183, %182 : vector<2x32xf32>
    %185 = arith.divf %183, %184 : vector<2x32xf32>
    %186 = vector.extract_strided_slice %173 {offsets = [0, 32], sizes = [2, 32], strides = [1, 1]} : vector<2x96xf32> to vector<2x32xf32>
    %187 = vector.extract_strided_slice %177 {offsets = [0, 32], sizes = [2, 32], strides = [1, 1]} : vector<2x96xf32> to vector<2x32xf32>
    %188 = arith.addf %186, %187 : vector<2x32xf32>
    %189 = arith.negf %188 : vector<2x32xf32>
    %190 = math.exp %189 : vector<2x32xf32>
    %cst_51 = arith.constant 1.000000e+00 : f32
    %191 = vector.broadcast %cst_51 : f32 to vector<2x32xf32>
    %192 = arith.addf %191, %190 : vector<2x32xf32>
    %193 = arith.divf %191, %192 : vector<2x32xf32>
    %194 = vector.extract_strided_slice %173 {offsets = [0, 64], sizes = [2, 32], strides = [1, 1]} : vector<2x96xf32> to vector<2x32xf32>
    %195 = vector.extract_strided_slice %177 {offsets = [0, 64], sizes = [2, 32], strides = [1, 1]} : vector<2x96xf32> to vector<2x32xf32>
    %196 = arith.mulf %185, %195 : vector<2x32xf32>
    %197 = arith.addf %194, %196 : vector<2x32xf32>
    %198 = math.tanh %197 : vector<2x32xf32>
    %cst_52 = arith.constant 1.000000e+00 : f32
    %199 = vector.broadcast %cst_52 : f32 to vector<2x32xf32>
    %200 = arith.subf %199, %193 : vector<2x32xf32>
    %201 = arith.mulf %200, %198 : vector<2x32xf32>
    %202 = arith.mulf %193, %172 : vector<2x32xf32>
    %203 = arith.addf %201, %202 : vector<2x32xf32>
    %204 = vector.extract_strided_slice %33 {offsets = [0, 96], sizes = [2, 96], strides = [1, 1]} : vector<2x192xf32> to vector<2x96xf32>
    %205 = arith.truncf %203 : vector<2x32xf32> to vector<2x32xbf16>
    %cst_53 = arith.constant dense<0.000000e+00> : vector<2x96xf32>
    %206 = tpu.matmul %205, %169, %cst_53 {dimension_numbers = #tpu.dot_dimension_numbers<[1], [0], [0], [1], [0, 0, 1, 1], [], []>} : vector<2x32xbf16>, vector<32x96xbf16>, vector<2x96xf32> -> vector<2x96xf32>
    %207 = vector.broadcast %171 : vector<1x96xf32> to vector<2x96xf32>
    %208 = arith.addf %206, %207 : vector<2x96xf32>
    %209 = vector.extract_strided_slice %204 {offsets = [0, 0], sizes = [2, 32], strides = [1, 1]} : vector<2x96xf32> to vector<2x32xf32>
    %210 = vector.extract_strided_slice %208 {offsets = [0, 0], sizes = [2, 32], strides = [1, 1]} : vector<2x96xf32> to vector<2x32xf32>
    %211 = arith.addf %209, %210 : vector<2x32xf32>
    %212 = arith.negf %211 : vector<2x32xf32>
    %213 = math.exp %212 : vector<2x32xf32>
    %cst_54 = arith.constant 1.000000e+00 : f32
    %214 = vector.broadcast %cst_54 : f32 to vector<2x32xf32>
    %215 = arith.addf %214, %213 : vector<2x32xf32>
    %216 = arith.divf %214, %215 : vector<2x32xf32>
    %217 = vector.extract_strided_slice %204 {offsets = [0, 32], sizes = [2, 32], strides = [1, 1]} : vector<2x96xf32> to vector<2x32xf32>
    %218 = vector.extract_strided_slice %208 {offsets = [0, 32], sizes = [2, 32], strides = [1, 1]} : vector<2x96xf32> to vector<2x32xf32>
    %219 = arith.addf %217, %218 : vector<2x32xf32>
    %220 = arith.negf %219 : vector<2x32xf32>
    %221 = math.exp %220 : vector<2x32xf32>
    %cst_55 = arith.constant 1.000000e+00 : f32
    %222 = vector.broadcast %cst_55 : f32 to vector<2x32xf32>
    %223 = arith.addf %222, %221 : vector<2x32xf32>
    %224 = arith.divf %222, %223 : vector<2x32xf32>
    %225 = vector.extract_strided_slice %204 {offsets = [0, 64], sizes = [2, 32], strides = [1, 1]} : vector<2x96xf32> to vector<2x32xf32>
    %226 = vector.extract_strided_slice %208 {offsets = [0, 64], sizes = [2, 32], strides = [1, 1]} : vector<2x96xf32> to vector<2x32xf32>
    %227 = arith.mulf %216, %226 : vector<2x32xf32>
    %228 = arith.addf %225, %227 : vector<2x32xf32>
    %229 = math.tanh %228 : vector<2x32xf32>
    %cst_56 = arith.constant 1.000000e+00 : f32
    %230 = vector.broadcast %cst_56 : f32 to vector<2x32xf32>
    %231 = arith.subf %230, %224 : vector<2x32xf32>
    %232 = arith.mulf %231, %229 : vector<2x32xf32>
    %233 = arith.mulf %224, %203 : vector<2x32xf32>
    %234 = arith.addf %232, %233 : vector<2x32xf32>
    %235 = vector.extract_strided_slice %28 {offsets = [0, 96], sizes = [2, 96], strides = [1, 1]} : vector<2x192xf32> to vector<2x96xf32>
    %236 = arith.truncf %234 : vector<2x32xf32> to vector<2x32xbf16>
    %cst_57 = arith.constant dense<0.000000e+00> : vector<2x96xf32>
    %237 = tpu.matmul %236, %169, %cst_57 {dimension_numbers = #tpu.dot_dimension_numbers<[1], [0], [0], [1], [0, 0, 1, 1], [], []>} : vector<2x32xbf16>, vector<32x96xbf16>, vector<2x96xf32> -> vector<2x96xf32>
    %238 = vector.broadcast %171 : vector<1x96xf32> to vector<2x96xf32>
    %239 = arith.addf %237, %238 : vector<2x96xf32>
    %240 = vector.extract_strided_slice %235 {offsets = [0, 0], sizes = [2, 32], strides = [1, 1]} : vector<2x96xf32> to vector<2x32xf32>
    %241 = vector.extract_strided_slice %239 {offsets = [0, 0], sizes = [2, 32], strides = [1, 1]} : vector<2x96xf32> to vector<2x32xf32>
    %242 = arith.addf %240, %241 : vector<2x32xf32>
    %243 = arith.negf %242 : vector<2x32xf32>
    %244 = math.exp %243 : vector<2x32xf32>
    %cst_58 = arith.constant 1.000000e+00 : f32
    %245 = vector.broadcast %cst_58 : f32 to vector<2x32xf32>
    %246 = arith.addf %245, %244 : vector<2x32xf32>
    %247 = arith.divf %245, %246 : vector<2x32xf32>
    %248 = vector.extract_strided_slice %235 {offsets = [0, 32], sizes = [2, 32], strides = [1, 1]} : vector<2x96xf32> to vector<2x32xf32>
    %249 = vector.extract_strided_slice %239 {offsets = [0, 32], sizes = [2, 32], strides = [1, 1]} : vector<2x96xf32> to vector<2x32xf32>
    %250 = arith.addf %248, %249 : vector<2x32xf32>
    %251 = arith.negf %250 : vector<2x32xf32>
    %252 = math.exp %251 : vector<2x32xf32>
    %cst_59 = arith.constant 1.000000e+00 : f32
    %253 = vector.broadcast %cst_59 : f32 to vector<2x32xf32>
    %254 = arith.addf %253, %252 : vector<2x32xf32>
    %255 = arith.divf %253, %254 : vector<2x32xf32>
    %256 = vector.extract_strided_slice %235 {offsets = [0, 64], sizes = [2, 32], strides = [1, 1]} : vector<2x96xf32> to vector<2x32xf32>
    %257 = vector.extract_strided_slice %239 {offsets = [0, 64], sizes = [2, 32], strides = [1, 1]} : vector<2x96xf32> to vector<2x32xf32>
    %258 = arith.mulf %247, %257 : vector<2x32xf32>
    %259 = arith.addf %256, %258 : vector<2x32xf32>
    %260 = math.tanh %259 : vector<2x32xf32>
    %cst_60 = arith.constant 1.000000e+00 : f32
    %261 = vector.broadcast %cst_60 : f32 to vector<2x32xf32>
    %262 = arith.subf %261, %255 : vector<2x32xf32>
    %263 = arith.mulf %262, %260 : vector<2x32xf32>
    %264 = arith.mulf %255, %234 : vector<2x32xf32>
    %265 = arith.addf %263, %264 : vector<2x32xf32>
    %266 = vector.extract_strided_slice %23 {offsets = [0, 96], sizes = [2, 96], strides = [1, 1]} : vector<2x192xf32> to vector<2x96xf32>
    %267 = arith.truncf %265 : vector<2x32xf32> to vector<2x32xbf16>
    %cst_61 = arith.constant dense<0.000000e+00> : vector<2x96xf32>
    %268 = tpu.matmul %267, %169, %cst_61 {dimension_numbers = #tpu.dot_dimension_numbers<[1], [0], [0], [1], [0, 0, 1, 1], [], []>} : vector<2x32xbf16>, vector<32x96xbf16>, vector<2x96xf32> -> vector<2x96xf32>
    %269 = vector.broadcast %171 : vector<1x96xf32> to vector<2x96xf32>
    %270 = arith.addf %268, %269 : vector<2x96xf32>
    %271 = vector.extract_strided_slice %266 {offsets = [0, 0], sizes = [2, 32], strides = [1, 1]} : vector<2x96xf32> to vector<2x32xf32>
    %272 = vector.extract_strided_slice %270 {offsets = [0, 0], sizes = [2, 32], strides = [1, 1]} : vector<2x96xf32> to vector<2x32xf32>
    %273 = arith.addf %271, %272 : vector<2x32xf32>
    %274 = arith.negf %273 : vector<2x32xf32>
    %275 = math.exp %274 : vector<2x32xf32>
    %cst_62 = arith.constant 1.000000e+00 : f32
    %276 = vector.broadcast %cst_62 : f32 to vector<2x32xf32>
    %277 = arith.addf %276, %275 : vector<2x32xf32>
    %278 = arith.divf %276, %277 : vector<2x32xf32>
    %279 = vector.extract_strided_slice %266 {offsets = [0, 32], sizes = [2, 32], strides = [1, 1]} : vector<2x96xf32> to vector<2x32xf32>
    %280 = vector.extract_strided_slice %270 {offsets = [0, 32], sizes = [2, 32], strides = [1, 1]} : vector<2x96xf32> to vector<2x32xf32>
    %281 = arith.addf %279, %280 : vector<2x32xf32>
    %282 = arith.negf %281 : vector<2x32xf32>
    %283 = math.exp %282 : vector<2x32xf32>
    %cst_63 = arith.constant 1.000000e+00 : f32
    %284 = vector.broadcast %cst_63 : f32 to vector<2x32xf32>
    %285 = arith.addf %284, %283 : vector<2x32xf32>
    %286 = arith.divf %284, %285 : vector<2x32xf32>
    %287 = vector.extract_strided_slice %266 {offsets = [0, 64], sizes = [2, 32], strides = [1, 1]} : vector<2x96xf32> to vector<2x32xf32>
    %288 = vector.extract_strided_slice %270 {offsets = [0, 64], sizes = [2, 32], strides = [1, 1]} : vector<2x96xf32> to vector<2x32xf32>
    %289 = arith.mulf %278, %288 : vector<2x32xf32>
    %290 = arith.addf %287, %289 : vector<2x32xf32>
    %291 = math.tanh %290 : vector<2x32xf32>
    %cst_64 = arith.constant 1.000000e+00 : f32
    %292 = vector.broadcast %cst_64 : f32 to vector<2x32xf32>
    %293 = arith.subf %292, %286 : vector<2x32xf32>
    %294 = arith.mulf %293, %291 : vector<2x32xf32>
    %295 = arith.mulf %286, %265 : vector<2x32xf32>
    %296 = arith.addf %294, %295 : vector<2x32xf32>
    %c0_65 = arith.constant 0 : index
    %c0_66 = arith.constant 0 : index
    %297 = vector.load %arg11[%c0_65, %c0_66] : memref<64x192xbf16, #tpu.memory_space<vmem>>, vector<64x192xbf16>
    %c0_67 = arith.constant 0 : index
    %c0_68 = arith.constant 0 : index
    %298 = vector.load %arg12[%c0_67, %c0_68] : memref<1x192xf32, #tpu.memory_space<vmem>>, vector<1x192xf32>
    %299 = tpu.concatenate %74, %296 in 1 : vector<2x32xf32>, vector<2x32xf32> -> vector<2x64xf32>
    %300 = arith.truncf %299 : vector<2x64xf32> to vector<2x64xbf16>
    %cst_69 = arith.constant dense<0.000000e+00> : vector<2x192xf32>
    %301 = tpu.matmul %300, %297, %cst_69 {dimension_numbers = #tpu.dot_dimension_numbers<[1], [0], [0], [1], [0, 0, 1, 1], [], []>} : vector<2x64xbf16>, vector<64x192xbf16>, vector<2x192xf32> -> vector<2x192xf32>
    %302 = vector.broadcast %298 : vector<1x192xf32> to vector<2x192xf32>
    %303 = arith.addf %301, %302 : vector<2x192xf32>
    %304 = tpu.concatenate %105, %265 in 1 : vector<2x32xf32>, vector<2x32xf32> -> vector<2x64xf32>
    %305 = arith.truncf %304 : vector<2x64xf32> to vector<2x64xbf16>
    %cst_70 = arith.constant dense<0.000000e+00> : vector<2x192xf32>
    %306 = tpu.matmul %305, %297, %cst_70 {dimension_numbers = #tpu.dot_dimension_numbers<[1], [0], [0], [1], [0, 0, 1, 1], [], []>} : vector<2x64xbf16>, vector<64x192xbf16>, vector<2x192xf32> -> vector<2x192xf32>
    %307 = vector.broadcast %298 : vector<1x192xf32> to vector<2x192xf32>
    %308 = arith.addf %306, %307 : vector<2x192xf32>
    %309 = tpu.concatenate %136, %234 in 1 : vector<2x32xf32>, vector<2x32xf32> -> vector<2x64xf32>
    %310 = arith.truncf %309 : vector<2x64xf32> to vector<2x64xbf16>
    %cst_71 = arith.constant dense<0.000000e+00> : vector<2x192xf32>
    %311 = tpu.matmul %310, %297, %cst_71 {dimension_numbers = #tpu.dot_dimension_numbers<[1], [0], [0], [1], [0, 0, 1, 1], [], []>} : vector<2x64xbf16>, vector<64x192xbf16>, vector<2x192xf32> -> vector<2x192xf32>
    %312 = vector.broadcast %298 : vector<1x192xf32> to vector<2x192xf32>
    %313 = arith.addf %311, %312 : vector<2x192xf32>
    %314 = tpu.concatenate %167, %203 in 1 : vector<2x32xf32>, vector<2x32xf32> -> vector<2x64xf32>
    %315 = arith.truncf %314 : vector<2x64xf32> to vector<2x64xbf16>
    %cst_72 = arith.constant dense<0.000000e+00> : vector<2x192xf32>
    %316 = tpu.matmul %315, %297, %cst_72 {dimension_numbers = #tpu.dot_dimension_numbers<[1], [0], [0], [1], [0, 0, 1, 1], [], []>} : vector<2x64xbf16>, vector<64x192xbf16>, vector<2x192xf32> -> vector<2x192xf32>
    %317 = vector.broadcast %298 : vector<1x192xf32> to vector<2x192xf32>
    %318 = arith.addf %316, %317 : vector<2x192xf32>
    %c0_73 = arith.constant 0 : index
    %c0_74 = arith.constant 0 : index
    %c0_75 = arith.constant 0 : index
    %319 = vector.load %arg13[%c0_73, %c0_74, %c0_75] : memref<2x32x96xbf16, #tpu.memory_space<vmem>>, vector<1x32x96xbf16>
    %320 = vector.shape_cast %319 : vector<1x32x96xbf16> to vector<32x96xbf16>
    %c0_76 = arith.constant 0 : index
    %c0_77 = arith.constant 0 : index
    %c0_78 = arith.constant 0 : index
    %321 = vector.load %arg14[%c0_76, %c0_77, %c0_78] : memref<2x1x96xf32, #tpu.memory_space<vmem>>, vector<1x1x96xf32>
    %322 = vector.shape_cast %321 : vector<1x1x96xf32> to vector<1x96xf32>
    %cst_79 = arith.constant 0.000000e+00 : f32
    %323 = vector.broadcast %cst_79 : f32 to vector<2x32xf32>
    %324 = vector.extract_strided_slice %303 {offsets = [0, 0], sizes = [2, 96], strides = [1, 1]} : vector<2x192xf32> to vector<2x96xf32>
    %325 = arith.truncf %323 : vector<2x32xf32> to vector<2x32xbf16>
    %cst_80 = arith.constant dense<0.000000e+00> : vector<2x96xf32>
    %326 = tpu.matmul %325, %320, %cst_80 {dimension_numbers = #tpu.dot_dimension_numbers<[1], [0], [0], [1], [0, 0, 1, 1], [], []>} : vector<2x32xbf16>, vector<32x96xbf16>, vector<2x96xf32> -> vector<2x96xf32>
    %327 = vector.broadcast %322 : vector<1x96xf32> to vector<2x96xf32>
    %328 = arith.addf %326, %327 : vector<2x96xf32>
    %329 = vector.extract_strided_slice %324 {offsets = [0, 0], sizes = [2, 32], strides = [1, 1]} : vector<2x96xf32> to vector<2x32xf32>
    %330 = vector.extract_strided_slice %328 {offsets = [0, 0], sizes = [2, 32], strides = [1, 1]} : vector<2x96xf32> to vector<2x32xf32>
    %331 = arith.addf %329, %330 : vector<2x32xf32>
    %332 = arith.negf %331 : vector<2x32xf32>
    %333 = math.exp %332 : vector<2x32xf32>
    %cst_81 = arith.constant 1.000000e+00 : f32
    %334 = vector.broadcast %cst_81 : f32 to vector<2x32xf32>
    %335 = arith.addf %334, %333 : vector<2x32xf32>
    %336 = arith.divf %334, %335 : vector<2x32xf32>
    %337 = vector.extract_strided_slice %324 {offsets = [0, 32], sizes = [2, 32], strides = [1, 1]} : vector<2x96xf32> to vector<2x32xf32>
    %338 = vector.extract_strided_slice %328 {offsets = [0, 32], sizes = [2, 32], strides = [1, 1]} : vector<2x96xf32> to vector<2x32xf32>
    %339 = arith.addf %337, %338 : vector<2x32xf32>
    %340 = arith.negf %339 : vector<2x32xf32>
    %341 = math.exp %340 : vector<2x32xf32>
    %cst_82 = arith.constant 1.000000e+00 : f32
    %342 = vector.broadcast %cst_82 : f32 to vector<2x32xf32>
    %343 = arith.addf %342, %341 : vector<2x32xf32>
    %344 = arith.divf %342, %343 : vector<2x32xf32>
    %345 = vector.extract_strided_slice %324 {offsets = [0, 64], sizes = [2, 32], strides = [1, 1]} : vector<2x96xf32> to vector<2x32xf32>
    %346 = vector.extract_strided_slice %328 {offsets = [0, 64], sizes = [2, 32], strides = [1, 1]} : vector<2x96xf32> to vector<2x32xf32>
    %347 = arith.mulf %336, %346 : vector<2x32xf32>
    %348 = arith.addf %345, %347 : vector<2x32xf32>
    %349 = math.tanh %348 : vector<2x32xf32>
    %cst_83 = arith.constant 1.000000e+00 : f32
    %350 = vector.broadcast %cst_83 : f32 to vector<2x32xf32>
    %351 = arith.subf %350, %344 : vector<2x32xf32>
    %352 = arith.mulf %351, %349 : vector<2x32xf32>
    %353 = arith.mulf %344, %323 : vector<2x32xf32>
    %354 = arith.addf %352, %353 : vector<2x32xf32>
    %355 = vector.extract_strided_slice %308 {offsets = [0, 0], sizes = [2, 96], strides = [1, 1]} : vector<2x192xf32> to vector<2x96xf32>
    %356 = arith.truncf %354 : vector<2x32xf32> to vector<2x32xbf16>
    %cst_84 = arith.constant dense<0.000000e+00> : vector<2x96xf32>
    %357 = tpu.matmul %356, %320, %cst_84 {dimension_numbers = #tpu.dot_dimension_numbers<[1], [0], [0], [1], [0, 0, 1, 1], [], []>} : vector<2x32xbf16>, vector<32x96xbf16>, vector<2x96xf32> -> vector<2x96xf32>
    %358 = vector.broadcast %322 : vector<1x96xf32> to vector<2x96xf32>
    %359 = arith.addf %357, %358 : vector<2x96xf32>
    %360 = vector.extract_strided_slice %355 {offsets = [0, 0], sizes = [2, 32], strides = [1, 1]} : vector<2x96xf32> to vector<2x32xf32>
    %361 = vector.extract_strided_slice %359 {offsets = [0, 0], sizes = [2, 32], strides = [1, 1]} : vector<2x96xf32> to vector<2x32xf32>
    %362 = arith.addf %360, %361 : vector<2x32xf32>
    %363 = arith.negf %362 : vector<2x32xf32>
    %364 = math.exp %363 : vector<2x32xf32>
    %cst_85 = arith.constant 1.000000e+00 : f32
    %365 = vector.broadcast %cst_85 : f32 to vector<2x32xf32>
    %366 = arith.addf %365, %364 : vector<2x32xf32>
    %367 = arith.divf %365, %366 : vector<2x32xf32>
    %368 = vector.extract_strided_slice %355 {offsets = [0, 32], sizes = [2, 32], strides = [1, 1]} : vector<2x96xf32> to vector<2x32xf32>
    %369 = vector.extract_strided_slice %359 {offsets = [0, 32], sizes = [2, 32], strides = [1, 1]} : vector<2x96xf32> to vector<2x32xf32>
    %370 = arith.addf %368, %369 : vector<2x32xf32>
    %371 = arith.negf %370 : vector<2x32xf32>
    %372 = math.exp %371 : vector<2x32xf32>
    %cst_86 = arith.constant 1.000000e+00 : f32
    %373 = vector.broadcast %cst_86 : f32 to vector<2x32xf32>
    %374 = arith.addf %373, %372 : vector<2x32xf32>
    %375 = arith.divf %373, %374 : vector<2x32xf32>
    %376 = vector.extract_strided_slice %355 {offsets = [0, 64], sizes = [2, 32], strides = [1, 1]} : vector<2x96xf32> to vector<2x32xf32>
    %377 = vector.extract_strided_slice %359 {offsets = [0, 64], sizes = [2, 32], strides = [1, 1]} : vector<2x96xf32> to vector<2x32xf32>
    %378 = arith.mulf %367, %377 : vector<2x32xf32>
    %379 = arith.addf %376, %378 : vector<2x32xf32>
    %380 = math.tanh %379 : vector<2x32xf32>
    %cst_87 = arith.constant 1.000000e+00 : f32
    %381 = vector.broadcast %cst_87 : f32 to vector<2x32xf32>
    %382 = arith.subf %381, %375 : vector<2x32xf32>
    %383 = arith.mulf %382, %380 : vector<2x32xf32>
    %384 = arith.mulf %375, %354 : vector<2x32xf32>
    %385 = arith.addf %383, %384 : vector<2x32xf32>
    %386 = vector.extract_strided_slice %313 {offsets = [0, 0], sizes = [2, 96], strides = [1, 1]} : vector<2x192xf32> to vector<2x96xf32>
    %387 = arith.truncf %385 : vector<2x32xf32> to vector<2x32xbf16>
    %cst_88 = arith.constant dense<0.000000e+00> : vector<2x96xf32>
    %388 = tpu.matmul %387, %320, %cst_88 {dimension_numbers = #tpu.dot_dimension_numbers<[1], [0], [0], [1], [0, 0, 1, 1], [], []>} : vector<2x32xbf16>, vector<32x96xbf16>, vector<2x96xf32> -> vector<2x96xf32>
    %389 = vector.broadcast %322 : vector<1x96xf32> to vector<2x96xf32>
    %390 = arith.addf %388, %389 : vector<2x96xf32>
    %391 = vector.extract_strided_slice %386 {offsets = [0, 0], sizes = [2, 32], strides = [1, 1]} : vector<2x96xf32> to vector<2x32xf32>
    %392 = vector.extract_strided_slice %390 {offsets = [0, 0], sizes = [2, 32], strides = [1, 1]} : vector<2x96xf32> to vector<2x32xf32>
    %393 = arith.addf %391, %392 : vector<2x32xf32>
    %394 = arith.negf %393 : vector<2x32xf32>
    %395 = math.exp %394 : vector<2x32xf32>
    %cst_89 = arith.constant 1.000000e+00 : f32
    %396 = vector.broadcast %cst_89 : f32 to vector<2x32xf32>
    %397 = arith.addf %396, %395 : vector<2x32xf32>
    %398 = arith.divf %396, %397 : vector<2x32xf32>
    %399 = vector.extract_strided_slice %386 {offsets = [0, 32], sizes = [2, 32], strides = [1, 1]} : vector<2x96xf32> to vector<2x32xf32>
    %400 = vector.extract_strided_slice %390 {offsets = [0, 32], sizes = [2, 32], strides = [1, 1]} : vector<2x96xf32> to vector<2x32xf32>
    %401 = arith.addf %399, %400 : vector<2x32xf32>
    %402 = arith.negf %401 : vector<2x32xf32>
    %403 = math.exp %402 : vector<2x32xf32>
    %cst_90 = arith.constant 1.000000e+00 : f32
    %404 = vector.broadcast %cst_90 : f32 to vector<2x32xf32>
    %405 = arith.addf %404, %403 : vector<2x32xf32>
    %406 = arith.divf %404, %405 : vector<2x32xf32>
    %407 = vector.extract_strided_slice %386 {offsets = [0, 64], sizes = [2, 32], strides = [1, 1]} : vector<2x96xf32> to vector<2x32xf32>
    %408 = vector.extract_strided_slice %390 {offsets = [0, 64], sizes = [2, 32], strides = [1, 1]} : vector<2x96xf32> to vector<2x32xf32>
    %409 = arith.mulf %398, %408 : vector<2x32xf32>
    %410 = arith.addf %407, %409 : vector<2x32xf32>
    %411 = math.tanh %410 : vector<2x32xf32>
    %cst_91 = arith.constant 1.000000e+00 : f32
    %412 = vector.broadcast %cst_91 : f32 to vector<2x32xf32>
    %413 = arith.subf %412, %406 : vector<2x32xf32>
    %414 = arith.mulf %413, %411 : vector<2x32xf32>
    %415 = arith.mulf %406, %385 : vector<2x32xf32>
    %416 = arith.addf %414, %415 : vector<2x32xf32>
    %417 = vector.extract_strided_slice %318 {offsets = [0, 0], sizes = [2, 96], strides = [1, 1]} : vector<2x192xf32> to vector<2x96xf32>
    %418 = arith.truncf %416 : vector<2x32xf32> to vector<2x32xbf16>
    %cst_92 = arith.constant dense<0.000000e+00> : vector<2x96xf32>
    %419 = tpu.matmul %418, %320, %cst_92 {dimension_numbers = #tpu.dot_dimension_numbers<[1], [0], [0], [1], [0, 0, 1, 1], [], []>} : vector<2x32xbf16>, vector<32x96xbf16>, vector<2x96xf32> -> vector<2x96xf32>
    %420 = vector.broadcast %322 : vector<1x96xf32> to vector<2x96xf32>
    %421 = arith.addf %419, %420 : vector<2x96xf32>
    %422 = vector.extract_strided_slice %417 {offsets = [0, 0], sizes = [2, 32], strides = [1, 1]} : vector<2x96xf32> to vector<2x32xf32>
    %423 = vector.extract_strided_slice %421 {offsets = [0, 0], sizes = [2, 32], strides = [1, 1]} : vector<2x96xf32> to vector<2x32xf32>
    %424 = arith.addf %422, %423 : vector<2x32xf32>
    %425 = arith.negf %424 : vector<2x32xf32>
    %426 = math.exp %425 : vector<2x32xf32>
    %cst_93 = arith.constant 1.000000e+00 : f32
    %427 = vector.broadcast %cst_93 : f32 to vector<2x32xf32>
    %428 = arith.addf %427, %426 : vector<2x32xf32>
    %429 = arith.divf %427, %428 : vector<2x32xf32>
    %430 = vector.extract_strided_slice %417 {offsets = [0, 32], sizes = [2, 32], strides = [1, 1]} : vector<2x96xf32> to vector<2x32xf32>
    %431 = vector.extract_strided_slice %421 {offsets = [0, 32], sizes = [2, 32], strides = [1, 1]} : vector<2x96xf32> to vector<2x32xf32>
    %432 = arith.addf %430, %431 : vector<2x32xf32>
    %433 = arith.negf %432 : vector<2x32xf32>
    %434 = math.exp %433 : vector<2x32xf32>
    %cst_94 = arith.constant 1.000000e+00 : f32
    %435 = vector.broadcast %cst_94 : f32 to vector<2x32xf32>
    %436 = arith.addf %435, %434 : vector<2x32xf32>
    %437 = arith.divf %435, %436 : vector<2x32xf32>
    %438 = vector.extract_strided_slice %417 {offsets = [0, 64], sizes = [2, 32], strides = [1, 1]} : vector<2x96xf32> to vector<2x32xf32>
    %439 = vector.extract_strided_slice %421 {offsets = [0, 64], sizes = [2, 32], strides = [1, 1]} : vector<2x96xf32> to vector<2x32xf32>
    %440 = arith.mulf %429, %439 : vector<2x32xf32>
    %441 = arith.addf %438, %440 : vector<2x32xf32>
    %442 = math.tanh %441 : vector<2x32xf32>
    %cst_95 = arith.constant 1.000000e+00 : f32
    %443 = vector.broadcast %cst_95 : f32 to vector<2x32xf32>
    %444 = arith.subf %443, %437 : vector<2x32xf32>
    %445 = arith.mulf %444, %442 : vector<2x32xf32>
    %446 = arith.mulf %437, %416 : vector<2x32xf32>
    %447 = arith.addf %445, %446 : vector<2x32xf32>
    %c1_96 = arith.constant 1 : index
    %c0_97 = arith.constant 0 : index
    %c0_98 = arith.constant 0 : index
    %448 = vector.load %arg13[%c1_96, %c0_97, %c0_98] : memref<2x32x96xbf16, #tpu.memory_space<vmem>>, vector<1x32x96xbf16>
    %449 = vector.shape_cast %448 : vector<1x32x96xbf16> to vector<32x96xbf16>
    %c1_99 = arith.constant 1 : index
    %c0_100 = arith.constant 0 : index
    %c0_101 = arith.constant 0 : index
    %450 = vector.load %arg14[%c1_99, %c0_100, %c0_101] : memref<2x1x96xf32, #tpu.memory_space<vmem>>, vector<1x1x96xf32>
    %451 = vector.shape_cast %450 : vector<1x1x96xf32> to vector<1x96xf32>
    %cst_102 = arith.constant 0.000000e+00 : f32
    %452 = vector.broadcast %cst_102 : f32 to vector<2x32xf32>
    %453 = vector.extract_strided_slice %318 {offsets = [0, 96], sizes = [2, 96], strides = [1, 1]} : vector<2x192xf32> to vector<2x96xf32>
    %454 = arith.truncf %452 : vector<2x32xf32> to vector<2x32xbf16>
    %cst_103 = arith.constant dense<0.000000e+00> : vector<2x96xf32>
    %455 = tpu.matmul %454, %449, %cst_103 {dimension_numbers = #tpu.dot_dimension_numbers<[1], [0], [0], [1], [0, 0, 1, 1], [], []>} : vector<2x32xbf16>, vector<32x96xbf16>, vector<2x96xf32> -> vector<2x96xf32>
    %456 = vector.broadcast %451 : vector<1x96xf32> to vector<2x96xf32>
    %457 = arith.addf %455, %456 : vector<2x96xf32>
    %458 = vector.extract_strided_slice %453 {offsets = [0, 0], sizes = [2, 32], strides = [1, 1]} : vector<2x96xf32> to vector<2x32xf32>
    %459 = vector.extract_strided_slice %457 {offsets = [0, 0], sizes = [2, 32], strides = [1, 1]} : vector<2x96xf32> to vector<2x32xf32>
    %460 = arith.addf %458, %459 : vector<2x32xf32>
    %461 = arith.negf %460 : vector<2x32xf32>
    %462 = math.exp %461 : vector<2x32xf32>
    %cst_104 = arith.constant 1.000000e+00 : f32
    %463 = vector.broadcast %cst_104 : f32 to vector<2x32xf32>
    %464 = arith.addf %463, %462 : vector<2x32xf32>
    %465 = arith.divf %463, %464 : vector<2x32xf32>
    %466 = vector.extract_strided_slice %453 {offsets = [0, 32], sizes = [2, 32], strides = [1, 1]} : vector<2x96xf32> to vector<2x32xf32>
    %467 = vector.extract_strided_slice %457 {offsets = [0, 32], sizes = [2, 32], strides = [1, 1]} : vector<2x96xf32> to vector<2x32xf32>
    %468 = arith.addf %466, %467 : vector<2x32xf32>
    %469 = arith.negf %468 : vector<2x32xf32>
    %470 = math.exp %469 : vector<2x32xf32>
    %cst_105 = arith.constant 1.000000e+00 : f32
    %471 = vector.broadcast %cst_105 : f32 to vector<2x32xf32>
    %472 = arith.addf %471, %470 : vector<2x32xf32>
    %473 = arith.divf %471, %472 : vector<2x32xf32>
    %474 = vector.extract_strided_slice %453 {offsets = [0, 64], sizes = [2, 32], strides = [1, 1]} : vector<2x96xf32> to vector<2x32xf32>
    %475 = vector.extract_strided_slice %457 {offsets = [0, 64], sizes = [2, 32], strides = [1, 1]} : vector<2x96xf32> to vector<2x32xf32>
    %476 = arith.mulf %465, %475 : vector<2x32xf32>
    %477 = arith.addf %474, %476 : vector<2x32xf32>
    %478 = math.tanh %477 : vector<2x32xf32>
    %cst_106 = arith.constant 1.000000e+00 : f32
    %479 = vector.broadcast %cst_106 : f32 to vector<2x32xf32>
    %480 = arith.subf %479, %473 : vector<2x32xf32>
    %481 = arith.mulf %480, %478 : vector<2x32xf32>
    %482 = arith.mulf %473, %452 : vector<2x32xf32>
    %483 = arith.addf %481, %482 : vector<2x32xf32>
    %484 = vector.extract_strided_slice %313 {offsets = [0, 96], sizes = [2, 96], strides = [1, 1]} : vector<2x192xf32> to vector<2x96xf32>
    %485 = arith.truncf %483 : vector<2x32xf32> to vector<2x32xbf16>
    %cst_107 = arith.constant dense<0.000000e+00> : vector<2x96xf32>
    %486 = tpu.matmul %485, %449, %cst_107 {dimension_numbers = #tpu.dot_dimension_numbers<[1], [0], [0], [1], [0, 0, 1, 1], [], []>} : vector<2x32xbf16>, vector<32x96xbf16>, vector<2x96xf32> -> vector<2x96xf32>
    %487 = vector.broadcast %451 : vector<1x96xf32> to vector<2x96xf32>
    %488 = arith.addf %486, %487 : vector<2x96xf32>
    %489 = vector.extract_strided_slice %484 {offsets = [0, 0], sizes = [2, 32], strides = [1, 1]} : vector<2x96xf32> to vector<2x32xf32>
    %490 = vector.extract_strided_slice %488 {offsets = [0, 0], sizes = [2, 32], strides = [1, 1]} : vector<2x96xf32> to vector<2x32xf32>
    %491 = arith.addf %489, %490 : vector<2x32xf32>
    %492 = arith.negf %491 : vector<2x32xf32>
    %493 = math.exp %492 : vector<2x32xf32>
    %cst_108 = arith.constant 1.000000e+00 : f32
    %494 = vector.broadcast %cst_108 : f32 to vector<2x32xf32>
    %495 = arith.addf %494, %493 : vector<2x32xf32>
    %496 = arith.divf %494, %495 : vector<2x32xf32>
    %497 = vector.extract_strided_slice %484 {offsets = [0, 32], sizes = [2, 32], strides = [1, 1]} : vector<2x96xf32> to vector<2x32xf32>
    %498 = vector.extract_strided_slice %488 {offsets = [0, 32], sizes = [2, 32], strides = [1, 1]} : vector<2x96xf32> to vector<2x32xf32>
    %499 = arith.addf %497, %498 : vector<2x32xf32>
    %500 = arith.negf %499 : vector<2x32xf32>
    %501 = math.exp %500 : vector<2x32xf32>
    %cst_109 = arith.constant 1.000000e+00 : f32
    %502 = vector.broadcast %cst_109 : f32 to vector<2x32xf32>
    %503 = arith.addf %502, %501 : vector<2x32xf32>
    %504 = arith.divf %502, %503 : vector<2x32xf32>
    %505 = vector.extract_strided_slice %484 {offsets = [0, 64], sizes = [2, 32], strides = [1, 1]} : vector<2x96xf32> to vector<2x32xf32>
    %506 = vector.extract_strided_slice %488 {offsets = [0, 64], sizes = [2, 32], strides = [1, 1]} : vector<2x96xf32> to vector<2x32xf32>
    %507 = arith.mulf %496, %506 : vector<2x32xf32>
    %508 = arith.addf %505, %507 : vector<2x32xf32>
    %509 = math.tanh %508 : vector<2x32xf32>
    %cst_110 = arith.constant 1.000000e+00 : f32
    %510 = vector.broadcast %cst_110 : f32 to vector<2x32xf32>
    %511 = arith.subf %510, %504 : vector<2x32xf32>
    %512 = arith.mulf %511, %509 : vector<2x32xf32>
    %513 = arith.mulf %504, %483 : vector<2x32xf32>
    %514 = arith.addf %512, %513 : vector<2x32xf32>
    %515 = vector.extract_strided_slice %308 {offsets = [0, 96], sizes = [2, 96], strides = [1, 1]} : vector<2x192xf32> to vector<2x96xf32>
    %516 = arith.truncf %514 : vector<2x32xf32> to vector<2x32xbf16>
    %cst_111 = arith.constant dense<0.000000e+00> : vector<2x96xf32>
    %517 = tpu.matmul %516, %449, %cst_111 {dimension_numbers = #tpu.dot_dimension_numbers<[1], [0], [0], [1], [0, 0, 1, 1], [], []>} : vector<2x32xbf16>, vector<32x96xbf16>, vector<2x96xf32> -> vector<2x96xf32>
    %518 = vector.broadcast %451 : vector<1x96xf32> to vector<2x96xf32>
    %519 = arith.addf %517, %518 : vector<2x96xf32>
    %520 = vector.extract_strided_slice %515 {offsets = [0, 0], sizes = [2, 32], strides = [1, 1]} : vector<2x96xf32> to vector<2x32xf32>
    %521 = vector.extract_strided_slice %519 {offsets = [0, 0], sizes = [2, 32], strides = [1, 1]} : vector<2x96xf32> to vector<2x32xf32>
    %522 = arith.addf %520, %521 : vector<2x32xf32>
    %523 = arith.negf %522 : vector<2x32xf32>
    %524 = math.exp %523 : vector<2x32xf32>
    %cst_112 = arith.constant 1.000000e+00 : f32
    %525 = vector.broadcast %cst_112 : f32 to vector<2x32xf32>
    %526 = arith.addf %525, %524 : vector<2x32xf32>
    %527 = arith.divf %525, %526 : vector<2x32xf32>
    %528 = vector.extract_strided_slice %515 {offsets = [0, 32], sizes = [2, 32], strides = [1, 1]} : vector<2x96xf32> to vector<2x32xf32>
    %529 = vector.extract_strided_slice %519 {offsets = [0, 32], sizes = [2, 32], strides = [1, 1]} : vector<2x96xf32> to vector<2x32xf32>
    %530 = arith.addf %528, %529 : vector<2x32xf32>
    %531 = arith.negf %530 : vector<2x32xf32>
    %532 = math.exp %531 : vector<2x32xf32>
    %cst_113 = arith.constant 1.000000e+00 : f32
    %533 = vector.broadcast %cst_113 : f32 to vector<2x32xf32>
    %534 = arith.addf %533, %532 : vector<2x32xf32>
    %535 = arith.divf %533, %534 : vector<2x32xf32>
    %536 = vector.extract_strided_slice %515 {offsets = [0, 64], sizes = [2, 32], strides = [1, 1]} : vector<2x96xf32> to vector<2x32xf32>
    %537 = vector.extract_strided_slice %519 {offsets = [0, 64], sizes = [2, 32], strides = [1, 1]} : vector<2x96xf32> to vector<2x32xf32>
    %538 = arith.mulf %527, %537 : vector<2x32xf32>
    %539 = arith.addf %536, %538 : vector<2x32xf32>
    %540 = math.tanh %539 : vector<2x32xf32>
    %cst_114 = arith.constant 1.000000e+00 : f32
    %541 = vector.broadcast %cst_114 : f32 to vector<2x32xf32>
    %542 = arith.subf %541, %535 : vector<2x32xf32>
    %543 = arith.mulf %542, %540 : vector<2x32xf32>
    %544 = arith.mulf %535, %514 : vector<2x32xf32>
    %545 = arith.addf %543, %544 : vector<2x32xf32>
    %546 = vector.extract_strided_slice %303 {offsets = [0, 96], sizes = [2, 96], strides = [1, 1]} : vector<2x192xf32> to vector<2x96xf32>
    %547 = arith.truncf %545 : vector<2x32xf32> to vector<2x32xbf16>
    %cst_115 = arith.constant dense<0.000000e+00> : vector<2x96xf32>
    %548 = tpu.matmul %547, %449, %cst_115 {dimension_numbers = #tpu.dot_dimension_numbers<[1], [0], [0], [1], [0, 0, 1, 1], [], []>} : vector<2x32xbf16>, vector<32x96xbf16>, vector<2x96xf32> -> vector<2x96xf32>
    %549 = vector.broadcast %451 : vector<1x96xf32> to vector<2x96xf32>
    %550 = arith.addf %548, %549 : vector<2x96xf32>
    %551 = vector.extract_strided_slice %546 {offsets = [0, 0], sizes = [2, 32], strides = [1, 1]} : vector<2x96xf32> to vector<2x32xf32>
    %552 = vector.extract_strided_slice %550 {offsets = [0, 0], sizes = [2, 32], strides = [1, 1]} : vector<2x96xf32> to vector<2x32xf32>
    %553 = arith.addf %551, %552 : vector<2x32xf32>
    %554 = arith.negf %553 : vector<2x32xf32>
    %555 = math.exp %554 : vector<2x32xf32>
    %cst_116 = arith.constant 1.000000e+00 : f32
    %556 = vector.broadcast %cst_116 : f32 to vector<2x32xf32>
    %557 = arith.addf %556, %555 : vector<2x32xf32>
    %558 = arith.divf %556, %557 : vector<2x32xf32>
    %559 = vector.extract_strided_slice %546 {offsets = [0, 32], sizes = [2, 32], strides = [1, 1]} : vector<2x96xf32> to vector<2x32xf32>
    %560 = vector.extract_strided_slice %550 {offsets = [0, 32], sizes = [2, 32], strides = [1, 1]} : vector<2x96xf32> to vector<2x32xf32>
    %561 = arith.addf %559, %560 : vector<2x32xf32>
    %562 = arith.negf %561 : vector<2x32xf32>
    %563 = math.exp %562 : vector<2x32xf32>
    %cst_117 = arith.constant 1.000000e+00 : f32
    %564 = vector.broadcast %cst_117 : f32 to vector<2x32xf32>
    %565 = arith.addf %564, %563 : vector<2x32xf32>
    %566 = arith.divf %564, %565 : vector<2x32xf32>
    %567 = vector.extract_strided_slice %546 {offsets = [0, 64], sizes = [2, 32], strides = [1, 1]} : vector<2x96xf32> to vector<2x32xf32>
    %568 = vector.extract_strided_slice %550 {offsets = [0, 64], sizes = [2, 32], strides = [1, 1]} : vector<2x96xf32> to vector<2x32xf32>
    %569 = arith.mulf %558, %568 : vector<2x32xf32>
    %570 = arith.addf %567, %569 : vector<2x32xf32>
    %571 = math.tanh %570 : vector<2x32xf32>
    %cst_118 = arith.constant 1.000000e+00 : f32
    %572 = vector.broadcast %cst_118 : f32 to vector<2x32xf32>
    %573 = arith.subf %572, %566 : vector<2x32xf32>
    %574 = arith.mulf %573, %571 : vector<2x32xf32>
    %575 = arith.mulf %566, %545 : vector<2x32xf32>
    %576 = arith.addf %574, %575 : vector<2x32xf32>
    %577 = tpu.concatenate %354, %576, %385, %545, %416, %514, %447, %483 in 1 : vector<2x32xf32>, vector<2x32xf32>, vector<2x32xf32>, vector<2x32xf32>, vector<2x32xf32>, vector<2x32xf32>, vector<2x32xf32>, vector<2x32xf32> -> vector<2x256xf32>
    %c0_119 = arith.constant 0 : index
    %c0_120 = arith.constant 0 : index
    %578 = vector.load %arg15[%c0_119, %c0_120] : memref<256x8xbf16, #tpu.memory_space<vmem>>, vector<256x8xbf16>
    %579 = arith.truncf %577 : vector<2x256xf32> to vector<2x256xbf16>
    %cst_121 = arith.constant dense<0.000000e+00> : vector<2x8xf32>
    %580 = tpu.matmul %579, %578, %cst_121 {dimension_numbers = #tpu.dot_dimension_numbers<[1], [0], [0], [1], [0, 0, 1, 1], [], []>} : vector<2x256xbf16>, vector<256x8xbf16>, vector<2x8xf32> -> vector<2x8xf32>
    %c0_122 = arith.constant 0 : index
    %c0_123 = arith.constant 0 : index
    %581 = vector.load %arg16[%c0_122, %c0_123] : memref<1x8xf32, #tpu.memory_space<vmem>>, vector<1x8xf32>
    %582 = vector.broadcast %581 : vector<1x8xf32> to vector<2x8xf32>
    %583 = arith.addf %580, %582 : vector<2x8xf32>
    %584 = vector.extract_strided_slice %583 {offsets = [0, 0], sizes = [2, 4], strides = [1, 1]} : vector<2x8xf32> to vector<2x4xf32>
    %585 = vector.extract_strided_slice %583 {offsets = [0, 4], sizes = [2, 4], strides = [1, 1]} : vector<2x8xf32> to vector<2x4xf32>
    %cst_124 = arith.constant -2.000000e+01 : f32
    %cst_125 = arith.constant 2.000000e+00 : f32
    %586 = vector.broadcast %cst_124 : f32 to vector<2x4xf32>
    %587 = arith.maximumf %586, %585 : vector<2x4xf32>
    %588 = vector.broadcast %cst_125 : f32 to vector<2x4xf32>
    %589 = arith.minimumf %588, %587 : vector<2x4xf32>
    %590 = math.exp %589 : vector<2x4xf32>
    %c0_126 = arith.constant 0 : index
    %c0_127 = arith.constant 0 : index
    %591 = vector.load %arg2[%c0_126, %c0_127] : memref<2x4xf32, #tpu.memory_space<vmem>>, vector<2x4xf32>
    %592 = arith.mulf %590, %591 : vector<2x4xf32>
    %593 = arith.addf %584, %592 : vector<2x4xf32>
    %cst_128 = arith.constant -2.000000e+00 : f32
    %594 = vector.broadcast %cst_128 : f32 to vector<2x4xf32>
    %595 = arith.mulf %594, %593 : vector<2x4xf32>
    %cst_129 = arith.constant 0.000000e+00 : f32
    %596 = vector.broadcast %cst_129 : f32 to vector<2x4xf32>
    %597 = arith.maximumf %595, %596 : vector<2x4xf32>
    %598 = math.absf %595 : vector<2x4xf32>
    %cst_130 = arith.constant 0.000000e+00 : f32
    %599 = vector.broadcast %cst_130 : f32 to vector<2x4xf32>
    %600 = arith.subf %599, %598 : vector<2x4xf32>
    %601 = math.exp %600 : vector<2x4xf32>
    %cst_131 = arith.constant 1.000000e+00 : f32
    %602 = vector.broadcast %cst_131 : f32 to vector<2x4xf32>
    %603 = arith.addf %602, %601 : vector<2x4xf32>
    %604 = math.log %603 : vector<2x4xf32>
    %605 = arith.addf %597, %604 : vector<2x4xf32>
    %cst_132 = arith.constant -5.000000e-01 : f32
    %606 = vector.broadcast %cst_132 : f32 to vector<2x4xf32>
    %607 = arith.mulf %606, %591 : vector<2x4xf32>
    %608 = arith.mulf %607, %591 : vector<2x4xf32>
    %609 = arith.subf %608, %589 : vector<2x4xf32>
    %cst_133 = arith.constant 0.693147182 : f32
    %610 = vector.broadcast %cst_133 : f32 to vector<2x4xf32>
    %611 = arith.subf %610, %593 : vector<2x4xf32>
    %612 = arith.subf %611, %605 : vector<2x4xf32>
    %cst_134 = arith.constant 2.000000e+00 : f32
    %613 = vector.broadcast %cst_134 : f32 to vector<2x4xf32>
    %614 = arith.mulf %613, %612 : vector<2x4xf32>
    %615 = arith.subf %609, %614 : vector<2x4xf32>
    %cst_135 = arith.constant dense<0.000000e+00> : vector<2xf32>
    %616 = vector.multi_reduction <add>, %615, %cst_135 [1] : vector<2x4xf32> to vector<2xf32>
    %617 = vector.shape_cast %616 : vector<2xf32> to vector<2x1xf32>
    %cst_136 = arith.constant 3.67575407 : f32
    %618 = vector.broadcast %cst_136 : f32 to vector<2x1xf32>
    %619 = arith.subf %617, %618 : vector<2x1xf32>
    %620 = math.tanh %593 : vector<2x4xf32>
    %cst_137 = arith.constant 1.000000e+00 : f32
    %621 = vector.broadcast %cst_137 : f32 to vector<2x4xf32>
    %622 = arith.mulf %621, %620 : vector<2x4xf32>
    %c0_138 = arith.constant 0 : index
    %c0_139 = arith.constant 0 : index
    %623 = vector.load %arg17[%c0_138, %c0_139] : memref<2x4xf32, #tpu.memory_space<vmem>>, vector<2x4xf32>
    tpu.vector_store %arg17[%c0_138, %c0_139], %622 {strides = array<i32>} : memref<2x4xf32, #tpu.memory_space<vmem>>, vector<2x4xf32>,
    %c0_140 = arith.constant 0 : index
    %c0_141 = arith.constant 0 : index
    %624 = vector.load %arg18[%c0_140, %c0_141] : memref<2x1xf32, #tpu.memory_space<vmem>>, vector<2x1xf32>
    tpu.vector_store %arg18[%c0_140, %c0_141], %619 {strides = array<i32>} : memref<2x1xf32, #tpu.memory_space<vmem>>, vector<2x1xf32>,
    return
  }
  func.func @transform_0(%arg0: i32) -> (i32, i32) {
    %c0_i32 = arith.constant 0 : i32
    %c0_i32_0 = arith.constant 0 : i32
    return %arg0, %c0_i32 : i32, i32
  }
  func.func @transform_1(%arg0: i32) -> (i32, i32) {
    %c0_i32 = arith.constant 0 : i32
    %c0_i32_0 = arith.constant 0 : i32
    return %arg0, %c0_i32 : i32, i32
  }
  func.func @transform_2(%arg0: i32) -> (i32, i32) {
    %c0_i32 = arith.constant 0 : i32
    %c0_i32_0 = arith.constant 0 : i32
    %c0_i32_1 = arith.constant 0 : i32
    return %c0_i32, %c0_i32_0 : i32, i32
  }
  func.func @transform_3(%arg0: i32) -> (i32, i32) {
    %c0_i32 = arith.constant 0 : i32
    %c0_i32_0 = arith.constant 0 : i32
    %c0_i32_1 = arith.constant 0 : i32
    return %c0_i32, %c0_i32_0 : i32, i32
  }
  func.func @transform_4(%arg0: i32) -> (i32, i32) {
    %c0_i32 = arith.constant 0 : i32
    %c0_i32_0 = arith.constant 0 : i32
    %c0_i32_1 = arith.constant 0 : i32
    return %c0_i32, %c0_i32_0 : i32, i32
  }
  func.func @transform_5(%arg0: i32) -> (i32, i32) {
    %c0_i32 = arith.constant 0 : i32
    %c0_i32_0 = arith.constant 0 : i32
    %c0_i32_1 = arith.constant 0 : i32
    return %c0_i32, %c0_i32_0 : i32, i32
  }
  func.func @transform_6(%arg0: i32) -> (i32, i32) {
    %c0_i32 = arith.constant 0 : i32
    %c0_i32_0 = arith.constant 0 : i32
    %c0_i32_1 = arith.constant 0 : i32
    return %c0_i32, %c0_i32_0 : i32, i32
  }
  func.func @transform_7(%arg0: i32) -> (i32, i32) {
    %c0_i32 = arith.constant 0 : i32
    %c0_i32_0 = arith.constant 0 : i32
    %c0_i32_1 = arith.constant 0 : i32
    return %c0_i32, %c0_i32_0 : i32, i32
  }
  func.func @transform_8(%arg0: i32) -> (i32, i32, i32) {
    %c0_i32 = arith.constant 0 : i32
    %c0_i32_0 = arith.constant 0 : i32
    %c0_i32_1 = arith.constant 0 : i32
    %c0_i32_2 = arith.constant 0 : i32
    return %c0_i32, %c0_i32_0, %c0_i32_1 : i32, i32, i32
  }
  func.func @transform_9(%arg0: i32) -> (i32, i32, i32) {
    %c0_i32 = arith.constant 0 : i32
    %c0_i32_0 = arith.constant 0 : i32
    %c0_i32_1 = arith.constant 0 : i32
    %c0_i32_2 = arith.constant 0 : i32
    return %c0_i32, %c0_i32_0, %c0_i32_1 : i32, i32, i32
  }
  func.func @transform_10(%arg0: i32) -> (i32, i32) {
    %c0_i32 = arith.constant 0 : i32
    %c0_i32_0 = arith.constant 0 : i32
    %c0_i32_1 = arith.constant 0 : i32
    return %c0_i32, %c0_i32_0 : i32, i32
  }
  func.func @transform_11(%arg0: i32) -> (i32, i32) {
    %c0_i32 = arith.constant 0 : i32
    %c0_i32_0 = arith.constant 0 : i32
    %c0_i32_1 = arith.constant 0 : i32
    return %c0_i32, %c0_i32_0 : i32, i32
  }
  func.func @transform_12(%arg0: i32) -> (i32, i32, i32) {
    %c0_i32 = arith.constant 0 : i32
    %c0_i32_0 = arith.constant 0 : i32
    %c0_i32_1 = arith.constant 0 : i32
    %c0_i32_2 = arith.constant 0 : i32
    return %c0_i32, %c0_i32_0, %c0_i32_1 : i32, i32, i32
  }
  func.func @transform_13(%arg0: i32) -> (i32, i32, i32) {
    %c0_i32 = arith.constant 0 : i32
    %c0_i32_0 = arith.constant 0 : i32
    %c0_i32_1 = arith.constant 0 : i32
    %c0_i32_2 = arith.constant 0 : i32
    return %c0_i32, %c0_i32_0, %c0_i32_1 : i32, i32, i32
  }
  func.func @transform_14(%arg0: i32) -> (i32, i32) {
    %c0_i32 = arith.constant 0 : i32
    %c0_i32_0 = arith.constant 0 : i32
    %c0_i32_1 = arith.constant 0 : i32
    return %c0_i32, %c0_i32_0 : i32, i32
  }
  func.func @transform_15(%arg0: i32) -> (i32, i32) {
    %c0_i32 = arith.constant 0 : i32
    %c0_i32_0 = arith.constant 0 : i32
    %c0_i32_1 = arith.constant 0 : i32
    return %c0_i32, %c0_i32_0 : i32, i32
  }
  func.func @transform_16(%arg0: i32) -> (i32, i32) {
    %c0_i32 = arith.constant 0 : i32
    %c0_i32_0 = arith.constant 0 : i32
    return %arg0, %c0_i32 : i32, i32
  }
  func.func @transform_17(%arg0: i32) -> (i32, i32) {
    %c0_i32 = arith.constant 0 : i32
    %c0_i32_0 = arith.constant 0 : i32
    return %arg0, %c0_i32 : i32, i32
  }
}

</mosaic_0001>

<bundles_post_ra>
// kernel: tpu_custom_call.1
= control target key start
LH: loop header
LB: loop body
LE: loop exit
PB: predicated region body
PF: predicated region fallthrough
CT: control target
= control target key end

     0   :  { %s4084_s0 = inlined_call_operand.vmem [shape: f32[2,8], index: 0, kind: input, shape index: {}]   ;;  %s4085_s1 = inlined_call_operand.hbm [shape: f32[2,4], index: 1, kind: input, shape index: {}]   ;;  %s4086_s2 = inlined_call_operand.hbm [shape: bf16[8,128], index: 2, kind: input, shape index: {}]   ;;  %s4087_s3 = inlined_call_operand.hbm [shape: f32[1,128], index: 3, kind: input, shape index: {}]   ;;  %s4088_s4 = inlined_call_operand.vmem [shape: bf16[128,128], index: 4, kind: input, shape index: {}]   ;;  %s4089_s5 = inlined_call_operand.hbm [shape: f32[1,128], index: 5, kind: input, shape index: {}]   ;;  %s4090_s6 = inlined_call_operand.hbm [shape: bf16[32,192], index: 6, kind: input, shape index: {}]   ;;  %s4091_s7 = inlined_call_operand.hbm [shape: f32[1,192], index: 7, kind: input, shape index: {}]   ;;  %s4092_s8 = inlined_call_operand.vmem [shape: bf16[2,32,96], index: 8, kind: input, shape index: {}]   ;;  %s4093_s9 = inlined_call_operand.hbm [shape: f32[2,1,96], index: 9, kind: input, shape index: {}]   ;;  %s4094_s10 = inlined_call_operand.vmem [shape: bf16[64,192], index: 10, kind: input, shape index: {}]   ;;  %s4095_s11 = inlined_call_operand.vmem [shape: f32[1,192], index: 11, kind: input, shape index: {}]   ;;  %s4096_s12 = inlined_call_operand.hbm [shape: bf16[2,32,96], index: 12, kind: input, shape index: {}]   ;;  %s4097_s13 = inlined_call_operand.vmem [shape: f32[2,1,96], index: 13, kind: input, shape index: {}]   ;;  %s4098_s14 = inlined_call_operand.vmem [shape: bf16[256,8], index: 14, kind: input, shape index: {}]   ;;  %s4099_s15 = inlined_call_operand.vmem [shape: f32[1,8], index: 15, kind: input, shape index: {}]   ;;  %s4100_s16 = inlined_call_operand.hbm [shape: f32[2,4], index: 16, kind: output, shape index: {0}]   ;;  %s4101_s17 = inlined_call_operand.vmem [shape: f32[2,1], index: 17, kind: output, shape index: {1}]  }
   0x1   :  { %4103 = sst [smem:[#allocation23_spill]] %s4084_s0 }
   0x2   :  { %4104 = sst [smem:[#allocation24_spill]] %s4085_s1 }
   0x3   :  { %23 = vsyncpa [#allocation3], 0 }
   0x4   :  { %24 = vsyncpa [#allocation6], 0 }
   0x5   :  { %25 = vsyncpa [#allocation9], 0 }
   0x6   :  { %26 = vsyncpa [#allocation12], 0 }
   0x7   :  { %27 = vsyncpa [#allocation15], 0 }
   0x8   :  { %28 = vsyncpa [#allocation4], 0  ;;  %s3185_s24 = smov [#allocation5]   ;;  %s3186_s26 = smov [#allocation8]  }
   0x9   :  { %s47_s25 = sshll.u32 %s3185_s24, 4  ;;  %s69_s27 = sshll.u32 %s3186_s26, 4  ;;  %s48_s25 = int_to_ptr.vmem [resolvable:$true] %s47_s25  ;;  %s70_s27 = int_to_ptr.vmem [resolvable:$true] %s69_s27 }
   0xa   :  { %s2975_s0 = scalar_lea.hbm %s4086_s2, 64 }
   0xb   :  { %p2976_p0 = scmp.ne.s32.totalorder %s4086_s2, %s2975_s0  ;;  %p2979_p1 = scmp.lt.u32.totalorder %s2975_s0, %s4086_s2 }
   0xd   :  { %p2981_p2 = pnand %p2979_p1, %p2976_p0 }
   0xf   :  { %2984 = shalt.err (!%p2981_p2)
}
  0x10   :  { %s2985_s20 = scalar_lea.vmem %s48_s25, 64  ;;  %p2990_p4 = scmp.lt.s32.totalorder %s48_s25, %s48_s25 }
  0x11   :  { %p2986_p3 = scmp.ne.s32.totalorder %s48_s25, %s2985_s20  ;;  %p2991_p5 = scmp.lt.s32.totalorder %s2985_s20, %s2985_s20 }
  0x13   :  { %p2992_p6 = por %p2991_p5, %p2990_p4 }
  0x15   :  { %p2993_p7 = pnand %p2992_p6, %p2986_p3 }
  0x17   :  { %2996 = shalt.err (!%p2993_p7)
}
  0x18   :  { %50 = dma.hbm_to_vmem [thread:$0]  %s4086_s2, 64, %s48_s25, [#allocation6]  }
  0x19   :  { %s2997_s26 = scalar_lea.hbm %s4089_s5, 16 }
  0x1a   :  { %p2998_p8 = scmp.ne.s32.totalorder %s4089_s5, %s2997_s26  ;;  %p3001_p9 = scmp.lt.u32.totalorder %s2997_s26, %s4089_s5 }
  0x1c   :  { %p3003_p10 = pnand %p3001_p9, %p2998_p8 }
  0x1e   :  { %3006 = shalt.err (!%p3003_p10)
}
  0x1f   :  { %s3007_s18 = scalar_lea.vmem %s70_s27, 16  ;;  %s3011_s19 = scalar_lea.vmem %s70_s27, 32 }
  0x20   :  { %p3008_p11 = scmp.ne.s32.totalorder %s70_s27, %s3007_s18  ;;  %p3012_p12 = scmp.lt.s32.totalorder %s70_s27, %s70_s27 }
  0x21   :  { %p3013_p13 = scmp.lt.s32.totalorder %s3011_s19, %s3007_s18 }
  0x23   :  { %p3014_p0 = por %p3013_p13, %p3012_p12 }
  0x25   :  { %p3015_p1 = pnand %p3014_p0, %p3008_p11 }
  0x27   :  { %3018 = shalt.err (!%p3015_p1)
}
  0x28   :  { %72 = dma.hbm_to_vmem [thread:$0]  %s4089_s5, 16, %s70_s27, [#allocation9]  }
  0x29   :  { %s3187_s1 = smov [#allocation11]   ;;  %s3188_s21 = smov [#allocation2]  }
  0x2a   :  { %s91_s20 = sshll.u32 %s3187_s1, 4  ;;  %s37_s22 = sshll.u32 %s3188_s21, 4  ;;  %s92_s20 = int_to_ptr.vmem [resolvable:$true] %s91_s20  ;;  %s38_s22 = int_to_ptr.vmem [resolvable:$true] %s37_s22 }
  0x2b   :  { %s3019_s26 = scalar_lea.hbm %s4091_s7, 32 }
  0x2c   :  { %p3020_p2 = scmp.ne.s32.totalorder %s4091_s7, %s3019_s26  ;;  %p3023_p3 = scmp.lt.u32.totalorder %s3019_s26, %s4091_s7 }
  0x2e   :  { %p3025_p4 = pnand %p3023_p3, %p3020_p2 }
  0x30   :  { %3028 = shalt.err (!%p3025_p4)
}
  0x31   :  { %s3029_s5 = scalar_lea.vmem %s92_s20, 32  ;;  %p3034_p6 = scmp.lt.s32.totalorder %s92_s20, %s92_s20 }
  0x32   :  { %p3030_p5 = scmp.ne.s32.totalorder %s92_s20, %s3029_s5  ;;  %p3035_p7 = scmp.lt.s32.totalorder %s3029_s5, %s3029_s5 }
  0x34   :  { %p3036_p8 = por %p3035_p7, %p3034_p6 }
  0x36   :  { %p3037_p9 = pnand %p3036_p8, %p3030_p5 }
  0x38   :  { %3040 = shalt.err (!%p3037_p9)
}
  0x39   :  { %94 = dma.hbm_to_vmem [thread:$0]  %s4091_s7, 32, %s92_s20, [#allocation12]  }
  0x3a   :  { %s4105_s25 = sld [smem:[#allocation24_spill]] }
  0x40   :  { %s3041_s1 = scalar_lea.hbm %s4105_s25, 32 }
  0x41   :  { %p3042_p10 = scmp.ne.s32.totalorder %s4105_s25, %s3041_s1  ;;  %p3045_p11 = scmp.lt.u32.totalorder %s3041_s1, %s4105_s25 }
  0x43   :  { %p3047_p12 = pnand %p3045_p11, %p3042_p10 }
  0x45   :  { %3050 = shalt.err (!%p3047_p12)
}
  0x46   :  { %s3051_s28 = scalar_lea.vmem %s38_s22, 32  ;;  %p3056_p0 = scmp.lt.s32.totalorder %s38_s22, %s38_s22 }
  0x47   :  { %p3052_p13 = scmp.ne.s32.totalorder %s38_s22, %s3051_s28  ;;  %p3057_p1 = scmp.lt.s32.totalorder %s3051_s28, %s3051_s28 }
  0x49   :  { %p3058_p2 = por %p3057_p1, %p3056_p0 }
  0x4b   :  { %p3059_p3 = pnand %p3058_p2, %p3052_p13 }
  0x4d   :  { %3062 = shalt.err (!%p3059_p3)
}
  0x4e   :  { %40 = dma.hbm_to_vmem [thread:$0]  %s4105_s25, 32, %s38_s22, [#allocation3]  }
  0x4f   :  { %s3189_s29 = smov [#allocation7]   ;;  %s3190_s30 = smov [#allocation10]  }
  0x50   :  { %s57_s0 = sshll.u32 %s3189_s29, 4  ;;  %s78_s5 = sshll.u32 %s3190_s30, 4  ;;  %s58_s0 = int_to_ptr.vmem [resolvable:$true] %s57_s0  ;;  %s3344_s5 = int_to_ptr.vmem [resolvable:$true] %s78_s5 }
  0x51   :  { %s3063_s19 = scalar_lea.hbm %s4087_s3, 16 }
  0x52   :  { %p3064_p4 = scmp.ne.s32.totalorder %s4087_s3, %s3063_s19  ;;  %p3067_p5 = scmp.lt.u32.totalorder %s3063_s19, %s4087_s3 }
  0x54   :  { %p3069_p6 = pnand %p3067_p5, %p3064_p4 }
  0x56   :  { %3072 = shalt.err (!%p3069_p6)
}
  0x57   :  { %s3073_s22 = scalar_lea.vmem %s58_s0, 16  ;;  %s3077_s25 = scalar_lea.vmem %s58_s0, 32 }
  0x58   :  { %p3074_p7 = scmp.ne.s32.totalorder %s58_s0, %s3073_s22  ;;  %p3078_p8 = scmp.lt.s32.totalorder %s58_s0, %s58_s0 }
  0x59   :  { %p3079_p9 = scmp.lt.s32.totalorder %s3077_s25, %s3073_s22 }
  0x5b   :  { %p3080_p10 = por %p3079_p9, %p3078_p8 }
  0x5d   :  { %p3081_p11 = pnand %p3080_p10, %p3074_p7 }
  0x5f   :  { %3084 = shalt.err (!%p3081_p11)
}
  0x60   :  { %60 = dma.hbm_to_vmem [thread:$0]  %s4087_s3, 16, %s58_s0, [#allocation6]  }
  0x61   :  { %s3085_s20 = scalar_lea.hbm %s4090_s6, 512 }
  0x62   :  { %p3086_p12 = scmp.ne.s32.totalorder %s4090_s6, %s3085_s20  ;;  %p3089_p13 = scmp.lt.u32.totalorder %s3085_s20, %s4090_s6 }
  0x64   :  { %p3091_p0 = pnand %p3089_p13, %p3086_p12 }
  0x66   :  { %3094 = shalt.err (!%p3091_p0)
}
  0x67   :  { %s3095_s19 = scalar_lea.vmem %s3344_s5, 512  ;;  %p3100_p2 = scmp.lt.s32.totalorder %s3344_s5, %s3344_s5 }
  0x68   :  { %p3096_p1 = scmp.ne.s32.totalorder %s3344_s5, %s3095_s19  ;;  %p3101_p3 = scmp.lt.s32.totalorder %s3095_s19, %s3095_s19 }
  0x6a   :  { %p3102_p4 = por %p3101_p3, %p3100_p2 }
  0x6c   :  { %p3103_p5 = pnand %p3102_p4, %p3096_p1 }
  0x6e   :  { %3106 = shalt.err (!%p3103_p5)
}
  0x6f   :  { %s3191_s3 = smov 128   ;;  %s3192_s0 = smov 8  }
  0x70   :  { %84 = dma.hbm_to_vmem [thread:$0]  %s4090_s6, 512, %s3344_s5, [#allocation9], %s3191_s3, %s3191_s3, %s3192_s0  }
  0x71   :  { %s3193_s21 = smov [#allocation13]   ;;  %s3107_s24 = scalar_lea.hbm %s4093_s9, 32 }
  0x72   :  { %s102_s23 = sshll.u32 %s3193_s21, 4  ;;  %p3108_p6 = scmp.ne.s32.totalorder %s4093_s9, %s3107_s24  ;;  %s103_s23 = int_to_ptr.vmem [resolvable:$true] %s102_s23 }
  0x73   :  { %p3111_p7 = scmp.lt.u32.totalorder %s3107_s24, %s4093_s9 }
  0x75   :  { %p3113_p8 = pnand %p3111_p7, %p3108_p6 }
  0x77   :  { %3116 = shalt.err (!%p3113_p8)
}
  0x78   :  { %s3117_s29 = scalar_lea.vmem %s103_s23, 32  ;;  %p3122_p10 = scmp.lt.s32.totalorder %s103_s23, %s103_s23 }
  0x79   :  { %p3118_p9 = scmp.ne.s32.totalorder %s103_s23, %s3117_s29  ;;  %p3123_p11 = scmp.lt.s32.totalorder %s3117_s29, %s3117_s29 }
  0x7b   :  { %p3124_p12 = por %p3123_p11, %p3122_p10 }
  0x7d   :  { %p3125_p13 = pnand %p3124_p12, %p3118_p9 }
  0x7f   :  { %3128 = shalt.err (!%p3125_p13)
}
  0x80   :  { %s3194_s6 = smov 16   ;;  %s3195_s5 = smov 1  }
  0x81   :  { %108 = dma.hbm_to_vmem [thread:$0]  %s4093_s9, 32, %s103_s23, [#allocation12], %s3194_s6, %s3194_s6, %s3195_s5  }
  0x82   :  { %s3196_s18 = smov [#allocation14]   ;;  %s3129_s2 = scalar_lea.hbm %s4096_s12, 512 }
  0x83   :  { %s118_s19 = sshll.u32 %s3196_s18, 4  ;;  %p3130_p0 = scmp.ne.s32.totalorder %s4096_s12, %s3129_s2  ;;  %s119_s19 = int_to_ptr.vmem [resolvable:$true] %s118_s19 }
  0x84   :  { %p3133_p1 = scmp.lt.u32.totalorder %s3129_s2, %s4096_s12 }
  0x86   :  { %p3135_p2 = pnand %p3133_p1, %p3130_p0 }
  0x88   :  { %3138 = shalt.err (!%p3135_p2)
}
  0x89   :  { %s3139_s24 = scalar_lea.vmem %s119_s19, 512  ;;  %p3144_p4 = scmp.lt.s32.totalorder %s119_s19, %s119_s19 }
  0x8a   :  { %p3140_p3 = scmp.ne.s32.totalorder %s119_s19, %s3139_s24  ;;  %p3145_p5 = scmp.lt.s32.totalorder %s3139_s24, %s3139_s24 }
  0x8c   :  { %p3146_p6 = por %p3145_p5, %p3144_p4 }
  0x8e   :  { %p3147_p7 = pnand %p3146_p6, %p3140_p3 }
  0x90   :  { %3150 = shalt.err (!%p3147_p7)
}
  0x91   :  { %s3197_s9 = smov 64   ;;  %s3198_s23 = smov 4  }
  0x92   :  { %124 = dma.hbm_to_vmem [thread:$0]  %s4096_s12, 512, %s119_s19, [#allocation15], %s3197_s9, %s3197_s9, %s3198_s23  }
  0x93   :  { %3173 = dma.done.wait [#allocation3], 32  }
  0x94   :  { %3174 = vsyncadd [#allocation3], 4294967264 }
  0x95   :  { %3175 = dma.done.wait [#allocation6], 80  }
  0x96   :  { %3176 = vsyncadd [#allocation6], 4294967216 }
  0x97   :  { %3177 = dma.done.wait [#allocation9], 528  }
  0x98   :  { %3178 = vsyncadd [#allocation9], 4294966768 }
  0x99   :  { %3179 = dma.done.wait [#allocation12], 64  }
  0x9a   :  { %3180 = vsyncadd [#allocation12], 4294967232 }
  0x9b   :  { %3181 = dma.done.wait [#allocation15], 512  }
  0x9c   :  { %3182 = vsyncadd [#allocation15], 4294966784  ;;  %v3199_v0 = vmov 0.0   ;;  %vm3200_vm0 = vmmov 0   ;;  %vm170_vm1 = vcmask 1043456   ;;  %s4106_s20 = sld [smem:[#allocation23_spill]]  ;;  %v335_v42 = vlaneseq }
  0x9d   :  { %2594 = vmatprep.subr.bf16.mxu0 %v3199_v0  ;;  %2596 = vmatprep.mubr.msk.bf16.mxu0 %vm3200_vm0, %v3199_v0  ;;  %v157_v1 = vld [vmem:[#allocation5] sm:$0xf]  ;;  %vm166_vm2 = vcmask 64512   ;;  %v2790_v6 = vld [vmem:[%s4088_s4 + $0x8] sm:$0xff]   ;;  %v2791_v7 = vld [vmem:[%s4088_s4 + $0x10] sm:$0xff]   ;;  %v3201_v13 = vmov 0  }
  0x9e   :  { %2600 = vmatprep.subr.bf16.mxu1 %v3199_v0  ;;  %2616 = vmatprep.mubr.msk.bf16.mxu1 %vm3200_vm0, %v3199_v0  ;;  %v172_v3 = vsel %vm170_vm1, %v157_v1, 0  ;;  %v2789_v5 = vld [vmem:[%s4088_s4] sm:$0xff]   ;;  %v2792_v8 = vld [vmem:[%s4088_s4 + $0x18] sm:$0xff]   ;;  %v2794_v10 = vld [vmem:[%s4088_s4 + $0x28] sm:$0xff]   ;;  %vm365_vm3 = vcmask 261120   ;;  %v3490_v43 = vshrl.u32 %v335_v42, 7 }
  0x9f   :  { %2595 = vmatpush3.bf16.msra.mxu0 %v172_v3  ;;  %2601 = vmatpush3.bf16.msra.mxu1 %v2789_v5  ;;  %v2793_v9 = vld [vmem:[%s4088_s4 + $0x20] sm:$0xff]   ;;  %v2795_v11 = vld [vmem:[%s4088_s4 + $0x30] sm:$0xff]   ;;  %v2796_v12 = vld [vmem:[%s4088_s4 + $0x38] sm:$0xff]   ;;  %s3203_s29 = smov 32   ;;  %vm1271_vm4 = vcmask 523264   ;;  %vm2161_vm5 = vcmask 785408  }
  0xa0   :  { %2602 = vmatprep.subr.bf16.mxu1 %v3199_v0  ;;  %v3444_v14 = vld [vmem:[#allocation10 + $0x4] ss:$8 sps:$4 sm:$0xff]   ;;  %v3446_v15 = vld [vmem:[#allocation10] ss:$8 sps:$4 sm:$0xff]   ;;  %v2411_v16 = vld [vmem:[#allocation7] ss:$0 sm:$0xff] }
  0xa1   :  { %369 = vmatprep.subr.bf16.mxu0 %v3444_v14  ;;  %v3453_v23 = vld [vmem:[%s4092_s8] sm:$0xff]   ;;  %v3459_v25 = vld [vmem:[%s4092_s8 + $0x8] sm:$0xff]   ;;  %v337_v44 = vsub.s32 0, %v3490_v43  ;;  %vm2379_vm6 = vcmask 25600  }
  0xa2   :  { %v156_v2 = vld [vmem:[%s4106_s20] sm:$0x3]  ;;  %v3475_v27 = vld [vmem:[#allocation10 + $0x10] ss:$8 sps:$4 sm:$0xff]   ;;  %v2413_v28 = vld [vmem:[#allocation8] ss:$0 sm:$0xff] }
  0xa3   :  { %v158_v4 = vpack.c.bf16 %v156_v2, %v156_v2  ;;  %2603 = vmatpush3.bf16.msra.mxu1 %v2790_v6  ;;  %v3473_v26 = vld [vmem:[#allocation10 + $0x14] ss:$8 sps:$4 sm:$0xff]   ;;  %v3480_v36 = vld [vmem:[#allocation13] ss:$0 sm:$0xff]  ;;  %v3493_v45 = vld [vmem:[#allocation11] sm:$0x3] }
  0xa4   :  { %2604 = vmatprep.subr.bf16.mxu1 %v3199_v0  ;;  %v3498_v46 = vrot.slane %v3493_v45, %v337_v44  ;;  %s3202_s20 = smov 96  }
  0xa5   :  { %2597 = vmatmul.mubr.msk.bf16.vlgmr.msra.gmra.mrb[0].mxu0 %vm166_vm2, %v158_v4 }
  0xa6   :  { %401 = vmatprep.mubr.bf16.mxu0 %v3201_v13  ;;  %370 = vmatpush1.bf16.msra.mxu0 %v3446_v15 }
  0xa7   :  { %2605 = vmatpush3.bf16.msra.mxu1 %v2791_v7  ;;  %371 = vmatprep.subr.bf16.mxu0 %v3473_v26 }
  0xa8   :  { %2606 = vmatprep.subr.bf16.mxu1 %v3199_v0 }
  0xaa   :  { %372 = vmatpush1.bf16.msra.mxu0 %v3475_v27 }
  0xab   :  { %2607 = vmatpush3.bf16.msra.mxu1 %v2792_v8  ;;  %416 = vmatprep.subr.bf16.mxu0 %v3444_v14 }
  0xac   :  { %2608 = vmatprep.subr.bf16.mxu1 %v3199_v0 }
  0xaf   :  { %2609 = vmatpush3.bf16.msra.mxu1 %v2793_v9 }
  0xb0   :  { %2610 = vmatprep.subr.bf16.mxu1 %v3199_v0 }
  0xb3   :  { %2611 = vmatpush3.bf16.msra.mxu1 %v2794_v10 }
  0xb4   :  { %2612 = vmatprep.subr.bf16.mxu1 %v3199_v0 }
  0xb7   :  { %2613 = vmatpush3.bf16.msra.mxu1 %v2795_v11 }
  0xb8   :  { %2614 = vmatprep.subr.bf16.mxu1 %v3199_v0 }
  0xbb   :  { %2615 = vmatpush3.bf16.msra.mxu1 %v2796_v12 }
  0xbc   :  { %2620 = vmatprep.subr.bf16.mxu1 %v3199_v0 }
 0x178   :  { %v208_v17 = vpop.f32.mrb[0].mxu0 }
 0x179   :  { %v209_v18 = vadd.f32 %v2411_v16, %v208_v17  ;;  %v2598_v19 = vpop.f32.mrb[1].mxu0 }
 0x17a   :  { %v211_v20 = vpop.f32.mrb[2].mxu0 }
 0x17b   :  { %v214_v21 = vmax.f32 %v209_v18, 0.0  ;;  %v2599_v22 = vpop.f32.mrb[3].mxu0 }
 0x17d   :  { %v231_v24 = vpack.c.bf16 %v214_v21, %v214_v21 }
 0x17f   :  { %2617 = vmatmul.mubr.bf16.vlgmr.msra.gmra.mrb[0].mxu1 %v231_v24 }
 0x180   :  { %2621 = vmatpush3.bf16.msra.mxu1 %v3453_v23  ;;  %2624 = vmatprep.mubr.msk.bf16.mxu1 %vm3200_vm0, %v3199_v0 }
 0x181   :  { %2622 = vmatprep.subr.bf16.mxu1 %v3199_v0 }
 0x184   :  { %2623 = vmatpush3.bf16.msra.mxu1 %v3459_v25 }
 0x185   :  { %2636 = vmatprep.subr.bf16.mxu1 %v3199_v0 }
 0x187   :  { %2625 = vmatmul.mubr.bf16.vlgmr.msra.gmra.mrb[4].mxu1 %v3201_v13 }
 0x188   :  { %2637 = vmatpush3.bf16.msra.mxu1 %v3453_v23  ;;  %2640 = vmatprep.mubr.msk.bf16.mxu1 %vm3200_vm0, %v3199_v0 }
 0x189   :  { %2638 = vmatprep.subr.bf16.mxu1 %v3199_v0 }
 0x18c   :  { %2639 = vmatpush3.bf16.msra.mxu1 %v3459_v25 }
 0x18d   :  { %2652 = vmatprep.subr.bf16.mxu1 %v3199_v0 }
 0x252   :  { %v321_v29 = vpop.f32.mrb[0].mxu1 }
 0x253   :  { %v322_v30 = vadd.f32 %v2413_v28, %v321_v29  ;;  %v2618_v31 = vpop.f32.mrb[1].mxu1 }
 0x254   :  { %v324_v32 = vpop.f32.mrb[2].mxu1 }
 0x255   :  { %v327_v33 = vmax.f32 %v322_v30, 0.0  ;;  %v2619_v34 = vpop.f32.mrb[3].mxu1 }
 0x257   :  { %v333_v35 = vpack.c.bf16 %v327_v33, %v327_v33 }
 0x259   :  { %2426 = vmatmul.mubr.msk.bf16.vlgmr.msra.gmra.mrb[4].mxu0 %vm365_vm3, %v333_v35 }
 0x25a   :  { %v609_v37 = vpop.f32.mrb[4].mxu1  ;;  %417 = vmatpush1.bf16.msra.mxu0 %v3446_v15  ;;  %448 = vmatprep.mubr.bf16.mxu0 %v3201_v13 }
 0x25b   :  { %v610_v38 = vadd.f32 %v3480_v36, %v609_v37  ;;  %v2626_v39 = vpop.f32.mrb[5].mxu1  ;;  %418 = vmatprep.subr.bf16.mxu0 %v3473_v26 }
 0x25c   :  { %v612_v40 = vpop.f32.mrb[6].mxu1 }
 0x25d   :  { %v2627_v41 = vpop.f32.mrb[7].mxu1  ;;  %623 = vrot.lane.b32.xlu0 %v610_v38, %s3197_s9 }
 0x25e   :  { %419 = vmatpush1.bf16.msra.mxu0 %v3475_v27 }
 0x25f   :  { %462 = vmatprep.subr.bf16.mxu0 %v3444_v14 }
 0x2cf   :  { %v624_v56 = vpop.permute.xlu0 %623 }
 0x32c   :  { %v403_v47 = vpop.f32.mrb[4].mxu0 }
 0x32d   :  { %v3501_v48 = vadd.f32 %v403_v47, %v3498_v46  ;;  %v3503_v49 = vpop.f32.mrb[5].mxu0 }
 0x32e   :  { %v407_v50 = vpop.f32.mrb[6].mxu0 }
 0x32f   :  { %v615_v51 = vadd.f32 %v610_v38, %v3501_v48  ;;  %v408_v52 = vpop.f32.mrb[7].mxu0 }
 0x331   :  { %v2433_v53 = vmul.f32 -1.442695, %v615_v51  ;;  %v3571_v51 = vld [vmem:[%s4092_s8 + $0x10] sm:$0xff]  }
 0x333   :  { %2839 = vpow2.f32 %v2433_v53  ;;  %v3578_v53 = vld [vmem:[%s4092_s8 + $0x18] sm:$0xff]  }
 0x33d   :  { %v2840_v54 = vpop.eup %2839 }
 0x33e   :  { %v619_v55 = vadd.f32 1.0, %v2840_v54 }
 0x340   :  { %2841 = vrcp.f32 %v619_v55 }
 0x34a   :  { %v2842_v57 = vpop.eup %2841 }
 0x34b   :  { %v626_v58 = vmul.f32 %v2842_v57, %v624_v56  ;;  %v633_v62 = vsub.f32 1.0, %v2842_v57  ;;  %v639_v1 = vmul.f32 0.0, %v2842_v57 }
 0x34d   :  { %628 = vrot.lane.b32.xlu0 %v626_v58, %s3197_s9 }
 0x351   :  { %457 = vrot.lane.b32.xlu0 %v333_v35, %s3197_s9 }
 0x3bf   :  { %v629_v59 = vpop.permute.xlu0 %628 }
 0x3c0   :  { %v631_v60 = vadd.f32 %v629_v59, %v3501_v48  ;;  %v3593_v59 = vld [vmem:[#allocation13 + $0x1] ss:$0 sm:$0xff] }
 0x3c2   :  { %2843 = vtanh.f32 %v631_v60 }
 0x3c3   :  { %v458_v6 = vpop.permute.xlu0 %457 }
 0x3cc   :  { %v2844_v61 = vpop.eup %2843 }
 0x3cd   :  { %635 = vrot.lane.b32.xlu1 %v2844_v61, %s3202_s20 }
 0x3d1   :  { %411 = vrot.lane.b32.xlu1 %v333_v35, %s3202_s20 }
 0x3d5   :  { %503 = vrot.lane.b32.xlu1 %v333_v35, %s3203_s29 }
 0x43f   :  { %v636_v63 = vpop.permute.xlu1 %635 }
 0x440   :  { %v638_v2 = vmul.f32 %v636_v63, %v633_v62 }
 0x442   :  { %v3512_v3 = vadd.f32 %v639_v1, %v638_v2 }
 0x443   :  { %v412_v4 = vpop.permute.xlu1 %411 }
 0x444   :  { %2427 = vmatmul.mubr.msk.bf16.vlgmr.msra.gmra.mrb[8].mxu0 %vm365_vm3, %v412_v4  ;;  %v641_v5 = vpack.c.bf16 %v3512_v3, %v3512_v3 }
 0x445   :  { %463 = vmatpush1.bf16.msra.mxu0 %v3446_v15  ;;  %494 = vmatprep.mubr.bf16.mxu0 %v3201_v13 }
 0x446   :  { %643 = vrot.lane.b32.xlu0 %v641_v5, %s3202_s20  ;;  %464 = vmatprep.subr.bf16.mxu0 %v3473_v26 }
 0x447   :  { %v504_v7 = vpop.permute.xlu1 %503 }
 0x449   :  { %465 = vmatpush1.bf16.msra.mxu0 %v3475_v27 }
 0x44a   :  { %508 = vmatprep.subr.bf16.mxu0 %v3444_v14 }
 0x44c   :  { %2428 = vmatmul.mubr.msk.bf16.vlgmr.msra.gmra.mrb[12].mxu0 %vm365_vm3, %v458_v6 }
 0x44d   :  { %509 = vmatpush1.bf16.msra.mxu0 %v3446_v15  ;;  %540 = vmatprep.mubr.bf16.mxu0 %v3201_v13 }
 0x44e   :  { %510 = vmatprep.subr.bf16.mxu0 %v3473_v26 }
 0x451   :  { %511 = vmatpush1.bf16.msra.mxu0 %v3475_v27 }
 0x452   :  { %2628 = vmatprep.subr.bf16.mxu0 %v3199_v0 }
 0x454   :  { %2429 = vmatmul.mubr.msk.bf16.vlgmr.msra.gmra.mrb[16].mxu0 %vm365_vm3, %v504_v7 }
 0x455   :  { %2629 = vmatpush3.bf16.msra.mxu0 %v3453_v23  ;;  %2632 = vmatprep.mubr.msk.bf16.mxu0 %vm3200_vm0, %v3199_v0 }
 0x456   :  { %2630 = vmatprep.subr.bf16.mxu0 %v3199_v0 }
 0x459   :  { %2631 = vmatpush3.bf16.msra.mxu0 %v3459_v25 }
 0x45a   :  { %2644 = vmatprep.subr.bf16.mxu0 %v3199_v0 }
 0x4b8   :  { %v644_v8 = vpop.permute.xlu0 %643 }
 0x4b9   :  { %2633 = vmatmul.mubr.msk.bf16.vlgmr.msra.gmra.mrb[20].mxu0 %vm365_vm3, %v644_v8 }
 0x4ba   :  { %2645 = vmatpush3.bf16.msra.mxu0 %v3453_v23  ;;  %2648 = vmatprep.mubr.msk.bf16.mxu0 %vm3200_vm0, %v3199_v0 }
 0x4bb   :  { %2646 = vmatprep.subr.bf16.mxu0 %v3199_v0 }
 0x4be   :  { %2647 = vmatpush3.bf16.msra.mxu0 %v3459_v25 }
 0x4bf   :  { %2660 = vmatprep.subr.bf16.mxu0 %v3199_v0 }
 0x517   :  { %v450_v9 = vpop.f32.mrb[8].mxu0 }
 0x518   :  { %v3543_v10 = vpop.f32.mrb[9].mxu0  ;;  %v3556_v27 = vadd.f32 %v450_v9, %v3498_v46 }
 0x519   :  { %v454_v11 = vpop.f32.mrb[10].mxu0 }
 0x51a   :  { %v455_v12 = vpop.f32.mrb[11].mxu0 }
 0x51f   :  { %v3545_v14 = vpop.f32.mrb[12].mxu0 }
 0x520   :  { %v3547_v15 = vpop.f32.mrb[13].mxu0  ;;  %v3600_v2 = vadd.f32 %v3545_v14, %v3498_v46 }
 0x521   :  { %v500_v16 = vpop.f32.mrb[14].mxu0 }
 0x522   :  { %v501_v17 = vpop.f32.mrb[15].mxu0 }
 0x527   :  { %v3549_v18 = vpop.f32.mrb[16].mxu0 }
 0x528   :  { %v3551_v19 = vpop.f32.mrb[17].mxu0  ;;  %v3606_v12 = vadd.f32 %v3549_v18, %v3498_v46  ;;  %v341_v46 = vsub.s32 1, %v3490_v43 }
 0x529   :  { %v546_v20 = vpop.f32.mrb[18].mxu0 }
 0x52a   :  { %v547_v21 = vpop.f32.mrb[19].mxu0  ;;  %v3616_v18 = vrot.slane %v3493_v45, %v341_v46 }
 0x58c   :  { %v682_v22 = vpop.f32.mrb[20].mxu0 }
 0x58d   :  { %v683_v23 = vadd.f32 %v3480_v36, %v682_v22  ;;  %v2634_v24 = vpop.f32.mrb[21].mxu0 }
 0x58e   :  { %v685_v25 = vpop.f32.mrb[22].mxu0 }
 0x58f   :  { %696 = vrot.lane.b32.xlu1 %v683_v23, %s3197_s9  ;;  %v2635_v26 = vpop.f32.mrb[23].mxu0  ;;  %v688_v28 = vadd.f32 %v683_v23, %v3556_v27 }
 0x591   :  { %v2435_v29 = vmul.f32 -1.442695, %v688_v28 }
 0x593   :  { %2845 = vpow2.f32 %v2435_v29  ;;  %v545_v29 = vadd.f32 %v3551_v19, %v3616_v18 }
 0x59d   :  { %v2846_v30 = vpop.eup %2845 }
 0x59e   :  { %v692_v31 = vadd.f32 1.0, %v2846_v30 }
 0x5a0   :  { %2847 = vrcp.f32 %v692_v31 }
 0x5aa   :  { %v2848_v32 = vpop.eup %2847 }
 0x5ab   :  { %v706_v39 = vsub.f32 1.0, %v2848_v32  ;;  %v712_v41 = vmul.f32 %v2848_v32, %v3512_v3 }
 0x601   :  { %v697_v33 = vpop.permute.xlu1 %696 }
 0x602   :  { %v699_v34 = vmul.f32 %v2848_v32, %v697_v33 }
 0x604   :  { %701 = vrot.lane.b32.xlu0 %v699_v34, %s3197_s9 }
 0x676   :  { %v702_v35 = vpop.permute.xlu0 %701 }
 0x677   :  { %v704_v37 = vadd.f32 %v702_v35, %v3556_v27 }
 0x679   :  { %2849 = vtanh.f32 %v704_v37 }
 0x683   :  { %v2850_v38 = vpop.eup %2849 }
 0x684   :  { %708 = vrot.lane.b32.xlu1 %v2850_v38, %s3202_s20 }
 0x6f6   :  { %v709_v40 = vpop.permute.xlu1 %708 }
 0x6f7   :  { %v711_v42 = vmul.f32 %v709_v40, %v706_v39 }
 0x6f9   :  { %v3563_v47 = vadd.f32 %v712_v41, %v711_v42 }
 0x6fb   :  { %v714_v50 = vpack.c.bf16 %v3563_v47, %v3563_v47 }
 0x6fd   :  { %716 = vrot.lane.b32.xlu0 %v714_v50, %s3202_s20 }
 0x76f   :  { %v717_v52 = vpop.permute.xlu0 %716 }
 0x770   :  { %2641 = vmatmul.mubr.msk.bf16.vlgmr.msra.gmra.mrb[8].mxu1 %vm365_vm3, %v717_v52 }
 0x771   :  { %2653 = vmatpush3.bf16.msra.mxu1 %v3571_v51  ;;  %2656 = vmatprep.mubr.msk.bf16.mxu1 %vm3200_vm0, %v3199_v0 }
 0x772   :  { %2654 = vmatprep.subr.bf16.mxu1 %v3199_v0 }
 0x775   :  { %2655 = vmatpush3.bf16.msra.mxu1 %v3578_v53 }
 0x776   :  { %2668 = vmatprep.subr.bf16.mxu1 %v3199_v0 }
 0x778   :  { %2657 = vmatmul.mubr.bf16.vlgmr.msra.gmra.mrb[12].mxu1 %v3201_v13 }
 0x779   :  { %2669 = vmatpush3.bf16.msra.mxu1 %v3571_v51  ;;  %2672 = vmatprep.mubr.msk.bf16.mxu1 %vm3200_vm0, %v3199_v0 }
 0x77a   :  { %2670 = vmatprep.subr.bf16.mxu1 %v3199_v0 }
 0x77d   :  { %2671 = vmatpush3.bf16.msra.mxu1 %v3578_v53 }
 0x843   :  { %v755_v54 = vpop.f32.mrb[8].mxu1 }
 0x844   :  { %v756_v55 = vadd.f32 %v3480_v36, %v755_v54  ;;  %v2642_v56 = vpop.f32.mrb[9].mxu1 }
 0x845   :  { %v758_v57 = vpop.f32.mrb[10].mxu1 }
 0x846   :  { %769 = vrot.lane.b32.xlu1 %v756_v55, %s3197_s9  ;;  %v2643_v58 = vpop.f32.mrb[11].mxu1  ;;  %v761_v4 = vadd.f32 %v756_v55, %v3600_v2 }
 0x848   :  { %v2437_v5 = vmul.f32 -1.442695, %v761_v4 }
 0x84a   :  { %2851 = vpow2.f32 %v2437_v5 }
 0x84b   :  { %v919_v60 = vpop.f32.mrb[12].mxu1 }
 0x84c   :  { %v920_v61 = vadd.f32 %v3593_v59, %v919_v60  ;;  %v2658_v62 = vpop.f32.mrb[13].mxu1 }
 0x84d   :  { %v922_v63 = vpop.f32.mrb[14].mxu1 }
 0x84e   :  { %926 = vrot.lane.b32.xlu0 %v920_v61, %s3202_s20  ;;  %v2659_v1 = vpop.f32.mrb[15].mxu1 }
 0x852   :  { %943 = vrot.lane.b32.xlu0 %v920_v61, %s3203_s29 }
 0x854   :  { %v2852_v6 = vpop.eup %2851 }
 0x855   :  { %v765_v7 = vadd.f32 1.0, %v2852_v6 }
 0x857   :  { %2853 = vrcp.f32 %v765_v7 }
 0x861   :  { %v2854_v8 = vpop.eup %2853 }
 0x862   :  { %v779_v33 = vsub.f32 1.0, %v2854_v8  ;;  %v785_v35 = vmul.f32 %v2854_v8, %v3563_v47 }
 0x8b8   :  { %v770_v9 = vpop.permute.xlu1 %769 }
 0x8b9   :  { %v772_v11 = vmul.f32 %v2854_v8, %v770_v9 }
 0x8bb   :  { %774 = vrot.lane.b32.xlu1 %v772_v11, %s3197_s9 }
 0x8c0   :  { %v927_v16 = vpop.permute.xlu0 %926 }
 0x8c1   :  { %v929_v14 = vadd.f32 %v927_v16, %v3606_v12  ;;  %v936_v39 = vadd.f32 %v927_v16, %v545_v29 }
 0x8c3   :  { %v2447_v17 = vmul.f32 -1.442695, %v929_v14  ;;  %v2448_v19 = vmul.f32 -1.442695, %v936_v39 }
 0x8c4   :  { %v944_v22 = vpop.permute.xlu0 %943 }
 0x8c5   :  { %2855 = vpow2.f32 %v2447_v17 }
 0x8cf   :  { %v2856_v20 = vpop.eup %2855 }
 0x8d0   :  { %v933_v21 = vadd.f32 1.0, %v2856_v20  ;;  %v499_v20 = vadd.f32 %v3547_v15, %v3616_v18 }
 0x8d2   :  { %2857 = vrcp.f32 %v933_v21 }
 0x8dc   :  { %v2858_v23 = vpop.eup %2857 }
 0x8dd   :  { %v946_v24 = vmul.f32 %v2858_v23, %v944_v22 }
 0x8df   :  { %948 = vrot.lane.b32.xlu1 %v946_v24, %s3197_s9 }
 0x92d   :  { %v775_v25 = vpop.permute.xlu1 %774 }
 0x92e   :  { %v777_v26 = vadd.f32 %v775_v25, %v3600_v2 }
 0x930   :  { %2859 = vtanh.f32 %v777_v26 }
 0x93a   :  { %v2860_v28 = vpop.eup %2859 }
 0x93b   :  { %781 = vrot.lane.b32.xlu0 %v2860_v28, %s3202_s20 }
 0x951   :  { %v949_v30 = vpop.permute.xlu1 %948 }
 0x952   :  { %v951_v31 = vadd.f32 %v949_v30, %v545_v29 }
 0x954   :  { %2861 = vtanh.f32 %v951_v31 }
 0x955   :  { %2863 = vpow2.f32 %v2448_v19 }
 0x95e   :  { %v2862_v32 = vpop.eup %2861 }
 0x95f   :  { %955 = vrot.lane.b32.xlu0 %v2862_v32, %s3202_s20  ;;  %v2864_v40 = vpop.eup %2863 }
 0x960   :  { %v940_v41 = vadd.f32 1.0, %v2864_v40 }
 0x962   :  { %2865 = vrcp.f32 %v940_v41 }
 0x96c   :  { %v2866_v42 = vpop.eup %2865 }
 0x96d   :  { %v953_v52 = vsub.f32 1.0, %v2866_v42  ;;  %v959_v56 = vmul.f32 0.0, %v2866_v42 }
 0x9ad   :  { %v782_v34 = vpop.permute.xlu0 %781 }
 0x9ae   :  { %v784_v37 = vmul.f32 %v782_v34, %v779_v33 }
 0x9b0   :  { %v3622_v38 = vadd.f32 %v785_v35, %v784_v37 }
 0x9b2   :  { %v787_v45 = vpack.c.bf16 %v3622_v38, %v3622_v38 }
 0x9b4   :  { %789 = vrot.lane.b32.xlu1 %v787_v45, %s3202_s20 }
 0x9d1   :  { %v956_v50 = vpop.permute.xlu0 %955 }
 0x9d2   :  { %v958_v54 = vmul.f32 %v956_v50, %v953_v52 }
 0x9d4   :  { %v3631_v57 = vadd.f32 %v959_v56, %v958_v54  ;;  %v453_v56 = vadd.f32 %v3543_v10, %v3616_v18 }
 0x9d6   :  { %v961_v58 = vpack.c.bf16 %v3631_v57, %v3631_v57 }
 0xa26   :  { %v790_v55 = vpop.permute.xlu1 %789 }
 0xa27   :  { %2649 = vmatmul.mubr.msk.bf16.vlgmr.msra.gmra.mrb[24].mxu0 %vm365_vm3, %v790_v55 }
 0xa28   :  { %2661 = vmatpush3.bf16.msra.mxu0 %v3571_v51  ;;  %2664 = vmatprep.mubr.msk.bf16.mxu0 %vm3200_vm0, %v3199_v0 }
 0xa29   :  { %2662 = vmatprep.subr.bf16.mxu0 %v3199_v0 }
 0xa2c   :  { %2663 = vmatpush3.bf16.msra.mxu0 %v3578_v53 }
 0xa2d   :  { %2676 = vmatprep.subr.bf16.mxu0 %v3199_v0 }
 0xa2f   :  { %2665 = vmatmul.mubr.msk.bf16.vlgmr.msra.gmra.mrb[28].mxu0 %vm365_vm3, %v961_v58 }
 0xa30   :  { %2677 = vmatpush3.bf16.msra.mxu0 %v3571_v51  ;;  %2680 = vmatprep.mubr.msk.bf16.mxu0 %vm3200_vm0, %v3199_v0 }
 0xa31   :  { %2678 = vmatprep.subr.bf16.mxu0 %v3199_v0 }
 0xa34   :  { %2679 = vmatpush3.bf16.msra.mxu0 %v3578_v53 }
 0xafa   :  { %v3644_v60 = vpop.f32.mrb[24].mxu0 }
 0xafb   :  { %v2650_v61 = vpop.f32.mrb[25].mxu0 }
 0xafc   :  { %v831_v62 = vpop.f32.mrb[26].mxu0 }
 0xafd   :  { %v2651_v63 = vpop.f32.mrb[27].mxu0 }
 0xb02   :  { %v999_v1 = vpop.f32.mrb[28].mxu0 }
 0xb03   :  { %v1000_v4 = vadd.f32 %v3593_v59, %v999_v1  ;;  %v2666_v5 = vpop.f32.mrb[29].mxu0 }
 0xb04   :  { %v1002_v6 = vpop.f32.mrb[30].mxu0 }
 0xb05   :  { %1023 = vrot.lane.b32.xlu0 %v1000_v4, %s3203_s29  ;;  %1006 = vrot.lane.b32.xlu1 %v1000_v4, %s3202_s20  ;;  %v2667_v51 = vpop.f32.mrb[31].mxu0 }
 0xb77   :  { %v1007_v7 = vpop.permute.xlu1 %1006  ;;  %v1024_v14 = vpop.permute.xlu0 %1023 }
 0xb78   :  { %v1009_v8 = vadd.f32 %v1007_v7, %v3600_v2  ;;  %v1016_v2 = vadd.f32 %v1007_v7, %v499_v20 }
 0xb7a   :  { %v2450_v9 = vmul.f32 -1.442695, %v1009_v8  ;;  %v2451_v24 = vmul.f32 -1.442695, %v1016_v2 }
 0xb7c   :  { %2867 = vpow2.f32 %v2450_v9 }
 0xb86   :  { %v2868_v53 = vpop.eup %2867 }
 0xb87   :  { %v1013_v11 = vadd.f32 1.0, %v2868_v53 }
 0xb89   :  { %2869 = vrcp.f32 %v1013_v11 }
 0xb93   :  { %v2870_v16 = vpop.eup %2869 }
 0xb94   :  { %v1026_v17 = vmul.f32 %v2870_v16, %v1024_v14 }
 0xb96   :  { %1028 = vrot.lane.b32.xlu1 %v1026_v17, %s3197_s9 }
 0xc08   :  { %v1029_v21 = vpop.permute.xlu1 %1028 }
 0xc09   :  { %v1031_v22 = vadd.f32 %v1029_v21, %v499_v20 }
 0xc0b   :  { %2871 = vtanh.f32 %v1031_v22 }
 0xc0c   :  { %2873 = vpow2.f32 %v2451_v24 }
 0xc15   :  { %v2872_v23 = vpop.eup %2871 }
 0xc16   :  { %1035 = vrot.lane.b32.xlu0 %v2872_v23, %s3202_s20  ;;  %v2874_v25 = vpop.eup %2873 }
 0xc17   :  { %v1020_v26 = vadd.f32 1.0, %v2874_v25 }
 0xc19   :  { %2875 = vrcp.f32 %v1020_v26 }
 0xc23   :  { %v2876_v28 = vpop.eup %2875 }
 0xc24   :  { %v1033_v29 = vsub.f32 1.0, %v2876_v28  ;;  %v1039_v31 = vmul.f32 %v2876_v28, %v3631_v57  ;;  %v3696_v28 = vld [vmem:[%s4094_s10 + $0x14] ss:$8 sps:$4 sm:$0xff]  }
 0xc88   :  { %v1036_v30 = vpop.permute.xlu0 %1035 }
 0xc89   :  { %v1038_v32 = vmul.f32 %v1036_v30, %v1033_v29  ;;  %v3704_v29 = vld [vmem:[%s4094_s10 + $0x10] ss:$8 sps:$4 sm:$0xff]   ;;  %v3713_v30 = vld [vmem:[%s4094_s10 + $0x24] ss:$8 sps:$4 sm:$0xff]  }
 0xc8b   :  { %v3655_v33 = vadd.f32 %v1039_v31, %v1038_v32  ;;  %v829_v31 = vadd.f32 %v3480_v36, %v3644_v60  ;;  %v3729_v60 = vld [vmem:[%s4094_s10 + $0x20] ss:$8 sps:$4 sm:$0xff]  }
 0xc8d   :  { %v1041_v15 = vpack.c.bf16 %v3655_v33, %v3655_v33 }
 0xc8f   :  { %2673 = vmatmul.mubr.msk.bf16.vlgmr.msra.gmra.mrb[16].mxu1 %vm365_vm3, %v1041_v15 }
 0xc90   :  { %1415 = vmatprep.mubr.bf16.mxu1 %v3201_v13 }
 0xd62   :  { %v1079_v34 = vpop.f32.mrb[16].mxu1 }
 0xd63   :  { %v1080_v35 = vadd.f32 %v3593_v59, %v1079_v34  ;;  %v2674_v37 = vpop.f32.mrb[17].mxu1 }
 0xd64   :  { %v1082_v45 = vpop.f32.mrb[18].mxu1 }
 0xd65   :  { %1103 = vrot.lane.b32.xlu0 %v1080_v35, %s3203_s29  ;;  %1086 = vrot.lane.b32.xlu1 %v1080_v35, %s3202_s20  ;;  %v2675_v39 = vpop.f32.mrb[19].mxu1  ;;  %v406_v35 = vadd.f32 %v3503_v49, %v3616_v18  ;;  %v3736_v45 = vld [vmem:[%s4094_s10 + $0x34] ss:$8 sps:$4 sm:$0xff]   ;;  %v3741_v49 = vld [vmem:[%s4094_s10 + $0x30] ss:$8 sps:$4 sm:$0xff]  }
 0xdd7   :  { %v1087_v19 = vpop.permute.xlu1 %1086  ;;  %v1104_v54 = vpop.permute.xlu0 %1103 }
 0xdd8   :  { %v1089_v40 = vadd.f32 %v1087_v19, %v3556_v27  ;;  %v1096_v27 = vadd.f32 %v1087_v19, %v453_v56 }
 0xdda   :  { %v2453_v41 = vmul.f32 -1.442695, %v1089_v40  ;;  %v2454_v63 = vmul.f32 -1.442695, %v1096_v27 }
 0xddc   :  { %2877 = vpow2.f32 %v2453_v41 }
 0xde6   :  { %v2878_v42 = vpop.eup %2877 }
 0xde7   :  { %v1093_v50 = vadd.f32 1.0, %v2878_v42 }
 0xde9   :  { %2879 = vrcp.f32 %v1093_v50 }
 0xdf3   :  { %v2880_v52 = vpop.eup %2879 }
 0xdf4   :  { %v1106_v55 = vmul.f32 %v2880_v52, %v1104_v54 }
 0xdf6   :  { %1108 = vrot.lane.b32.xlu1 %v1106_v55, %s3197_s9 }
 0xe68   :  { %v1109_v58 = vpop.permute.xlu1 %1108 }
 0xe69   :  { %v1111_v61 = vadd.f32 %v1109_v58, %v453_v56 }
 0xe6b   :  { %2881 = vtanh.f32 %v1111_v61 }
 0xe6c   :  { %2883 = vpow2.f32 %v2454_v63 }
 0xe75   :  { %v2882_v62 = vpop.eup %2881 }
 0xe76   :  { %1115 = vrot.lane.b32.xlu0 %v2882_v62, %s3202_s20  ;;  %v2884_v1 = vpop.eup %2883 }
 0xe77   :  { %v1100_v4 = vadd.f32 1.0, %v2884_v1 }
 0xe79   :  { %2885 = vrcp.f32 %v1100_v4 }
 0xe83   :  { %v2886_v5 = vpop.eup %2885 }
 0xe84   :  { %v1113_v6 = vsub.f32 1.0, %v2886_v5  ;;  %v1119_v7 = vmul.f32 %v2886_v5, %v3655_v33 }
 0xee8   :  { %v1116_v51 = vpop.permute.xlu0 %1115 }
 0xee9   :  { %v1118_v8 = vmul.f32 %v1116_v51, %v1113_v6  ;;  %v3757_v6 = vld [vmem:[#allocation14] sm:$0xff]  }
 0xeeb   :  { %v3670_v9 = vadd.f32 %v1119_v7, %v1118_v8  ;;  %v3761_v7 = vld [vmem:[#allocation14 + $0x8] sm:$0xff]  }
 0xeed   :  { %v1121_v10 = vpack.c.bf16 %v3670_v9, %v3670_v9 }
 0xeef   :  { %2681 = vmatmul.mubr.msk.bf16.vlgmr.msra.gmra.mrb[32].mxu0 %vm365_vm3, %v1121_v10 }
 0xef0   :  { %1307 = vmatprep.mubr.bf16.mxu0 %v3201_v13 }
 0xfc2   :  { %v1159_v53 = vpop.f32.mrb[32].mxu0 }
 0xfc3   :  { %v1160_v11 = vadd.f32 %v3593_v59, %v1159_v53  ;;  %v2682_v16 = vpop.f32.mrb[33].mxu0  ;;  %v3686_v59 = vld [vmem:[%s4094_s10 + $0x4] ss:$8 sps:$4 sm:$0xff]  }
 0xfc4   :  { %v1162_v14 = vpop.f32.mrb[34].mxu0  ;;  %1383 = vmatprep.subr.bf16.mxu1 %v3686_v59  ;;  %1275 = vmatprep.subr.bf16.mxu0 %v3686_v59 }
 0xfc5   :  { %1183 = vrot.lane.b32.xlu0 %v1160_v11, %s3203_s29  ;;  %1166 = vrot.lane.b32.xlu1 %v1160_v11, %s3202_s20  ;;  %v2683_v17 = vpop.f32.mrb[35].mxu0 }
0x1037   :  { %v1167_v20 = vpop.permute.xlu1 %1166  ;;  %v1184_v25 = vpop.permute.xlu0 %1183 }
0x1038   :  { %v1169_v21 = vadd.f32 %v1167_v20, %v3501_v48  ;;  %v3691_v48 = vld [vmem:[%s4094_s10] ss:$8 sps:$4 sm:$0xff]   ;;  %v1176_v50 = vadd.f32 %v1167_v20, %v406_v35 }
0x1039   :  { %1384 = vmatpush1.bf16.msra.mxu1 %v3691_v48  ;;  %1276 = vmatpush1.bf16.msra.mxu0 %v3691_v48 }
0x103a   :  { %v2456_v22 = vmul.f32 -1.442695, %v1169_v21  ;;  %1385 = vmatprep.subr.bf16.mxu1 %v3696_v28  ;;  %1277 = vmatprep.subr.bf16.mxu0 %v3696_v28  ;;  %v2457_v52 = vmul.f32 -1.442695, %v1176_v50 }
0x103c   :  { %2887 = vpow2.f32 %v2456_v22 }
0x103d   :  { %1386 = vmatpush1.bf16.msra.mxu1 %v3704_v29  ;;  %1278 = vmatpush1.bf16.msra.mxu0 %v3704_v29 }
0x103e   :  { %1387 = vmatprep.subr.bf16.mxu1 %v3713_v30  ;;  %1279 = vmatprep.subr.bf16.mxu0 %v3713_v30 }
0x1041   :  { %1388 = vmatpush1.bf16.msra.mxu1 %v3729_v60  ;;  %1280 = vmatpush1.bf16.msra.mxu0 %v3729_v60 }
0x1042   :  { %1389 = vmatprep.subr.bf16.mxu1 %v3736_v45  ;;  %1281 = vmatprep.subr.bf16.mxu0 %v3736_v45 }
0x1045   :  { %1390 = vmatpush1.bf16.msra.mxu1 %v3741_v49  ;;  %1282 = vmatpush1.bf16.msra.mxu0 %v3741_v49 }
0x1046   :  { %v2888_v23 = vpop.eup %2887  ;;  %2684 = vmatprep.subr.bf16.mxu1 %v3199_v0  ;;  %1329 = vmatprep.subr.bf16.mxu0 %v3686_v59 }
0x1047   :  { %v1173_v2 = vadd.f32 1.0, %v2888_v23 }
0x1049   :  { %2889 = vrcp.f32 %v1173_v2 }
0x1053   :  { %v2890_v24 = vpop.eup %2889 }
0x1054   :  { %v1186_v26 = vmul.f32 %v2890_v24, %v1184_v25 }
0x1056   :  { %1188 = vrot.lane.b32.xlu1 %v1186_v26, %s3197_s9 }
0x105a   :  { %1371 = vrot.lane.b32.xlu1 %v3622_v38, %s3202_s20 }
0x105e   :  { %1211 = vrot.lane.b32.xlu1 %v3512_v3, %s3202_s20  ;;  %v834_v3 = vadd.f32 %v829_v31, %v3606_v12 }
0x1060   :  { %v2439_v32 = vmul.f32 -1.442695, %v834_v3 }
0x1062   :  { %842 = vrot.lane.b32.xlu1 %v829_v31, %s3197_s9  ;;  %2891 = vpow2.f32 %v2439_v32 }
0x106c   :  { %v2892_v15 = vpop.eup %2891 }
0x106d   :  { %v838_v34 = vadd.f32 1.0, %v2892_v15 }
0x106f   :  { %2893 = vrcp.f32 %v838_v34 }
0x1079   :  { %v2894_v19 = vpop.eup %2893 }
0x107a   :  { %v852_v11 = vsub.f32 1.0, %v2894_v19  ;;  %v858_v16 = vmul.f32 %v2894_v19, %v3622_v38  ;;  %v3798_v38 = vld [vmem:[%s4097_s13] ss:$0 sm:$0xff] }
0x10c8   :  { %v1189_v36 = vpop.permute.xlu1 %1188 }
0x10c9   :  { %v1191_v37 = vadd.f32 %v1189_v36, %v406_v35 }
0x10cb   :  { %2895 = vtanh.f32 %v1191_v37 }
0x10cc   :  { %v1372_v39 = vpop.permute.xlu1 %1371  ;;  %2897 = vpow2.f32 %v2457_v52 }
0x10d0   :  { %v1212_v18 = vpop.permute.xlu1 %1211 }
0x10d4   :  { %v843_v40 = vpop.permute.xlu1 %842 }
0x10d5   :  { %v2896_v41 = vpop.eup %2895  ;;  %v845_v42 = vmul.f32 %v2894_v19, %v843_v40 }
0x10d6   :  { %1195 = vrot.lane.b32.xlu0 %v2896_v41, %s3202_s20  ;;  %v2898_v54 = vpop.eup %2897 }
0x10d7   :  { %847 = vrot.lane.b32.xlu1 %v845_v42, %s3197_s9  ;;  %v1180_v55 = vadd.f32 1.0, %v2898_v54 }
0x10d9   :  { %2899 = vrcp.f32 %v1180_v55 }
0x10da   :  { %1375 = vrot.lane.b32.xlu0 %v3655_v33, %s3203_s29 }
0x10e3   :  { %v2900_v56 = vpop.eup %2899 }
0x10e4   :  { %v1193_v58 = vsub.f32 1.0, %v2900_v56  ;;  %v1199_v62 = vmul.f32 %v2900_v56, %v3670_v9 }
0x1148   :  { %v1196_v61 = vpop.permute.xlu0 %1195 }
0x1149   :  { %v1198_v27 = vmul.f32 %v1196_v61, %v1193_v58  ;;  %v848_v63 = vpop.permute.xlu1 %847 }
0x114a   :  { %v850_v1 = vadd.f32 %v848_v63, %v3606_v12 }
0x114b   :  { %v1200_v4 = vadd.f32 %v1199_v62, %v1198_v27 }
0x114c   :  { %2901 = vtanh.f32 %v850_v1  ;;  %v1376_v5 = vpop.permute.xlu0 %1375 }
0x114d   :  { %v1378_v33 = vsel %vm365_vm3, %v1372_v39, %v1376_v5  ;;  %1215 = vrot.lane.b32.xlu0 %v1200_v4, %s3203_s29 }
0x114e   :  { %v1379_v51 = vpack.c.bf16 %v1378_v33, %v1378_v33 }
0x1150   :  { %2468 = vmatmul.mubr.msk.bf16.vlgmr.msra.gmra.mrb[20].mxu1 %vm1271_vm4, %v1379_v51 }
0x1151   :  { %2685 = vmatpush3.bf16.msra.mxu1 %v3757_v6  ;;  %2688 = vmatprep.mubr.msk.bf16.mxu1 %vm3200_vm0, %v3199_v0 }
0x1152   :  { %2686 = vmatprep.subr.bf16.mxu1 %v3199_v0 }
0x1155   :  { %2687 = vmatpush3.bf16.msra.mxu1 %v3761_v7 }
0x1156   :  { %v2902_v12 = vpop.eup %2901  ;;  %2700 = vmatprep.subr.bf16.mxu1 %v3199_v0 }
0x1157   :  { %854 = vrot.lane.b32.xlu1 %v2902_v12, %s3202_s20 }
0x1158   :  { %2689 = vmatmul.mubr.bf16.vlgmr.msra.gmra.mrb[24].mxu1 %v3201_v13 }
0x1159   :  { %2701 = vmatpush3.bf16.msra.mxu1 %v3757_v6  ;;  %2704 = vmatprep.mubr.msk.bf16.mxu1 %vm3200_vm0, %v3199_v0 }
0x115a   :  { %2702 = vmatprep.subr.bf16.mxu1 %v3199_v0 }
0x115b   :  { %1317 = vrot.lane.b32.xlu1 %v3563_v47, %s3202_s20 }
0x115d   :  { %2703 = vmatpush3.bf16.msra.mxu1 %v3761_v7 }
0x115e   :  { %2716 = vmatprep.subr.bf16.mxu1 %v3199_v0 }
0x11bf   :  { %v1216_v8 = vpop.permute.xlu0 %1215 }
0x11c0   :  { %v1218_v10 = vsel %vm365_vm3, %v1212_v18, %v1216_v8 }
0x11c1   :  { %v1219_v53 = vpack.c.bf16 %v1218_v10, %v1218_v10 }
0x11c3   :  { %2466 = vmatmul.mubr.msk.bf16.vlgmr.msra.gmra.mrb[36].mxu0 %vm1271_vm4, %v1219_v53 }
0x11c4   :  { %1330 = vmatpush1.bf16.msra.mxu0 %v3691_v48  ;;  %1361 = vmatprep.mubr.bf16.mxu0 %v3201_v13 }
0x11c5   :  { %1331 = vmatprep.subr.bf16.mxu0 %v3696_v28 }
0x11c8   :  { %1332 = vmatpush1.bf16.msra.mxu0 %v3704_v29 }
0x11c9   :  { %v855_v47 = vpop.permute.xlu1 %854  ;;  %1333 = vmatprep.subr.bf16.mxu0 %v3713_v30 }
0x11ca   :  { %v857_v14 = vmul.f32 %v855_v47, %v852_v11 }
0x11cc   :  { %v859_v17 = vadd.f32 %v858_v16, %v857_v14  ;;  %1334 = vmatpush1.bf16.msra.mxu0 %v3729_v60 }
0x11cd   :  { %1335 = vmatprep.subr.bf16.mxu0 %v3736_v45  ;;  %v1318_v62 = vpop.permute.xlu1 %1317 }
0x11ce   :  { %1425 = vrot.lane.b32.xlu1 %v859_v17, %s3202_s20 }
0x11d0   :  { %1336 = vmatpush1.bf16.msra.mxu0 %v3741_v49 }
0x11d1   :  { %1437 = vmatprep.subr.bf16.mxu0 %v3686_v59  ;;  %v3805_v59 = vld [vmem:[%s4095_s11] sm:$0x3] }
0x11d2   :  { %v3810_v3 = vrot.slane %v3805_v59, %v337_v44 }
0x1223   :  { %v3791_v20 = vpop.f32.mrb[20].mxu1 }
0x1224   :  { %v3793_v21 = vpop.f32.mrb[21].mxu1 }
0x1225   :  { %v1421_v22 = vpop.f32.mrb[22].mxu1 }
0x1226   :  { %v1422_v23 = vpop.f32.mrb[23].mxu1 }
0x122b   :  { %v1535_v2 = vpop.f32.mrb[24].mxu1 }
0x122c   :  { %v1536_v24 = vadd.f32 %v3798_v38, %v1535_v2  ;;  %v2690_v25 = vpop.f32.mrb[25].mxu1 }
0x122d   :  { %v1538_v26 = vpop.f32.mrb[26].mxu1 }
0x122e   :  { %v2691_v31 = vpop.f32.mrb[27].mxu1  ;;  %1549 = vrot.lane.b32.xlu0 %v1536_v24, %s3197_s9 }
0x1296   :  { %v1309_v32 = vpop.f32.mrb[36].mxu0 }
0x1297   :  { %v3813_v15 = vadd.f32 %v1309_v32, %v3810_v3  ;;  %v3815_v34 = vpop.f32.mrb[37].mxu0 }
0x1298   :  { %v1313_v35 = vpop.f32.mrb[38].mxu0 }
0x1299   :  { %v1541_v36 = vadd.f32 %v1536_v24, %v3813_v15  ;;  %v1314_v37 = vpop.f32.mrb[39].mxu0 }
0x129b   :  { %v2473_v39 = vmul.f32 -1.442695, %v1541_v36 }
0x129d   :  { %2903 = vpow2.f32 %v2473_v39 }
0x12a0   :  { %v1550_v40 = vpop.permute.xlu0 %1549 }
0x12a7   :  { %v2904_v18 = vpop.eup %2903 }
0x12a8   :  { %v1545_v19 = vadd.f32 1.0, %v2904_v18  ;;  %v3877_v18 = vld [vmem:[#allocation14 + $0x10] sm:$0xff]  }
0x12aa   :  { %2905 = vrcp.f32 %v1545_v19 }
0x12b4   :  { %v2906_v41 = vpop.eup %2905 }
0x12b5   :  { %v1552_v42 = vmul.f32 %v2906_v41, %v1550_v40  ;;  %v1559_v54 = vsub.f32 1.0, %v2906_v41  ;;  %v1565_v56 = vmul.f32 0.0, %v2906_v41  ;;  %v3881_v40 = vld [vmem:[#allocation14 + $0x18] sm:$0xff]  }
0x12b7   :  { %1554 = vrot.lane.b32.xlu0 %v1552_v42, %s3197_s9 }
0x1329   :  { %v1555_v44 = vpop.permute.xlu0 %1554 }
0x132a   :  { %v1557_v50 = vadd.f32 %v1555_v44, %v3813_v15 }
0x132c   :  { %2907 = vtanh.f32 %v1557_v50 }
0x1336   :  { %v2908_v52 = vpop.eup %2907 }
0x1337   :  { %1561 = vrot.lane.b32.xlu0 %v2908_v52, %s3202_s20 }
0x133b   :  { %1321 = vrot.lane.b32.xlu0 %v3670_v9, %s3203_s29  ;;  %v1426_v9 = vpop.permute.xlu1 %1425 }
0x133f   :  { %1429 = vrot.lane.b32.xlu0 %v3631_v57, %s3203_s29 }
0x13a9   :  { %v1562_v55 = vpop.permute.xlu0 %1561 }
0x13aa   :  { %v1564_v58 = vmul.f32 %v1562_v55, %v1559_v54 }
0x13ac   :  { %v3825_v61 = vadd.f32 %v1565_v56, %v1564_v58 }
0x13ad   :  { %v1322_v27 = vpop.permute.xlu0 %1321 }
0x13ae   :  { %v1324_v63 = vsel %vm365_vm3, %v1318_v62, %v1322_v27  ;;  %v1567_v1 = vpack.c.bf16 %v3825_v61, %v3825_v61  ;;  %v3906_v27 = vadd.f32 %v3791_v20, %v3810_v3 }
0x13af   :  { %v1325_v4 = vpack.c.bf16 %v1324_v63, %v1324_v63 }
0x13b0   :  { %1569 = vrot.lane.b32.xlu1 %v1567_v1, %s3202_s20 }
0x13b1   :  { %2467 = vmatmul.mubr.msk.bf16.vlgmr.msra.gmra.mrb[40].mxu0 %vm1271_vm4, %v1325_v4  ;;  %v1430_v57 = vpop.permute.xlu0 %1429 }
0x13b2   :  { %1438 = vmatpush1.bf16.msra.mxu0 %v3691_v48  ;;  %1469 = vmatprep.mubr.bf16.mxu0 %v3201_v13  ;;  %v1432_v5 = vsel %vm365_vm3, %v1426_v9, %v1430_v57 }
0x13b3   :  { %1439 = vmatprep.subr.bf16.mxu0 %v3696_v28  ;;  %v1433_v33 = vpack.c.bf16 %v1432_v5, %v1432_v5 }
0x13b6   :  { %1440 = vmatpush1.bf16.msra.mxu0 %v3704_v29 }
0x13b7   :  { %1441 = vmatprep.subr.bf16.mxu0 %v3713_v30 }
0x13ba   :  { %1442 = vmatpush1.bf16.msra.mxu0 %v3729_v60 }
0x13bb   :  { %1443 = vmatprep.subr.bf16.mxu0 %v3736_v45 }
0x13be   :  { %1444 = vmatpush1.bf16.msra.mxu0 %v3741_v49 }
0x13bf   :  { %2692 = vmatprep.subr.bf16.mxu0 %v3199_v0 }
0x13c1   :  { %2469 = vmatmul.mubr.msk.bf16.vlgmr.msra.gmra.mrb[44].mxu0 %vm1271_vm4, %v1433_v33 }
0x13c2   :  { %2693 = vmatpush3.bf16.msra.mxu0 %v3757_v6  ;;  %2696 = vmatprep.mubr.msk.bf16.mxu0 %vm3200_vm0, %v3199_v0 }
0x13c3   :  { %2694 = vmatprep.subr.bf16.mxu0 %v3199_v0 }
0x13c6   :  { %2695 = vmatpush3.bf16.msra.mxu0 %v3761_v7 }
0x13c7   :  { %2708 = vmatprep.subr.bf16.mxu0 %v3199_v0 }
0x1422   :  { %v1570_v48 = vpop.permute.xlu1 %1569 }
0x1423   :  { %2697 = vmatmul.mubr.msk.bf16.vlgmr.msra.gmra.mrb[48].mxu0 %vm365_vm3, %v1570_v48 }
0x1424   :  { %2709 = vmatpush3.bf16.msra.mxu0 %v3757_v6  ;;  %2712 = vmatprep.mubr.msk.bf16.mxu0 %vm3200_vm0, %v3199_v0 }
0x1425   :  { %2710 = vmatprep.subr.bf16.mxu0 %v3199_v0 }
0x1428   :  { %2711 = vmatpush3.bf16.msra.mxu0 %v3761_v7 }
0x1429   :  { %2724 = vmatprep.subr.bf16.mxu0 %v3199_v0 }
0x1484   :  { %v1363_v28 = vpop.f32.mrb[40].mxu0 }
0x1485   :  { %v3856_v29 = vpop.f32.mrb[41].mxu0  ;;  %v3865_v11 = vadd.f32 %v1363_v28, %v3810_v3 }
0x1486   :  { %v1367_v30 = vpop.f32.mrb[42].mxu0 }
0x1487   :  { %v1368_v60 = vpop.f32.mrb[43].mxu0 }
0x1494   :  { %v3858_v45 = vpop.f32.mrb[44].mxu0 }
0x1495   :  { %v3860_v49 = vpop.f32.mrb[45].mxu0  ;;  %v3912_v48 = vadd.f32 %v3858_v45, %v3810_v3  ;;  %v3921_v3 = vrot.slane %v3805_v59, %v341_v46 }
0x1496   :  { %v1475_v51 = vpop.f32.mrb[46].mxu0 }
0x1497   :  { %v1476_v6 = vpop.f32.mrb[47].mxu0  ;;  %v1474_v45 = vadd.f32 %v3860_v49, %v3921_v3 }
0x14f6   :  { %v1608_v12 = vpop.f32.mrb[48].mxu0 }
0x14f7   :  { %v1609_v8 = vadd.f32 %v3798_v38, %v1608_v12  ;;  %v2698_v10 = vpop.f32.mrb[49].mxu0 }
0x14f8   :  { %v1611_v53 = vpop.f32.mrb[50].mxu0 }
0x14f9   :  { %1622 = vrot.lane.b32.xlu0 %v1609_v8, %s3197_s9  ;;  %v2699_v7 = vpop.f32.mrb[51].mxu0  ;;  %v1614_v47 = vadd.f32 %v1609_v8, %v3865_v11 }
0x14fb   :  { %v2475_v16 = vmul.f32 -1.442695, %v1614_v47 }
0x14fd   :  { %2909 = vpow2.f32 %v2475_v16 }
0x1507   :  { %v2910_v14 = vpop.eup %2909 }
0x1508   :  { %v1618_v17 = vadd.f32 1.0, %v2910_v14 }
0x150a   :  { %2911 = vrcp.f32 %v1618_v17 }
0x1514   :  { %v2912_v22 = vpop.eup %2911 }
0x1515   :  { %v1632_v31 = vsub.f32 1.0, %v2912_v22  ;;  %v1638_v35 = vmul.f32 %v2912_v22, %v3825_v61 }
0x156b   :  { %v1623_v23 = vpop.permute.xlu0 %1622 }
0x156c   :  { %v1625_v2 = vmul.f32 %v2912_v22, %v1623_v23 }
0x156e   :  { %1627 = vrot.lane.b32.xlu1 %v1625_v2, %s3197_s9 }
0x15e0   :  { %v1628_v24 = vpop.permute.xlu1 %1627 }
0x15e1   :  { %v1630_v25 = vadd.f32 %v1628_v24, %v3865_v11 }
0x15e3   :  { %2913 = vtanh.f32 %v1630_v25 }
0x15ed   :  { %v2914_v26 = vpop.eup %2913 }
0x15ee   :  { %1634 = vrot.lane.b32.xlu0 %v2914_v26, %s3202_s20 }
0x1660   :  { %v1635_v32 = vpop.permute.xlu0 %1634 }
0x1661   :  { %v1637_v36 = vmul.f32 %v1635_v32, %v1632_v31 }
0x1663   :  { %v3872_v37 = vadd.f32 %v1638_v35, %v1637_v36 }
0x1665   :  { %v1640_v39 = vpack.c.bf16 %v3872_v37, %v3872_v37 }
0x1667   :  { %1642 = vrot.lane.b32.xlu1 %v1640_v39, %s3202_s20 }
0x16d9   :  { %v1643_v19 = vpop.permute.xlu1 %1642 }
0x16da   :  { %2705 = vmatmul.mubr.msk.bf16.vlgmr.msra.gmra.mrb[28].mxu1 %vm365_vm3, %v1643_v19 }
0x16db   :  { %2717 = vmatpush3.bf16.msra.mxu1 %v3877_v18  ;;  %2720 = vmatprep.mubr.msk.bf16.mxu1 %vm3200_vm0, %v3199_v0 }
0x16dc   :  { %2718 = vmatprep.subr.bf16.mxu1 %v3199_v0 }
0x16df   :  { %2719 = vmatpush3.bf16.msra.mxu1 %v3881_v40 }
0x16e0   :  { %2732 = vmatprep.subr.bf16.mxu1 %v3199_v0 }
0x16e2   :  { %2721 = vmatmul.mubr.bf16.vlgmr.msra.gmra.mrb[32].mxu1 %v3201_v13  ;;  %v3899_v13 = vld [vmem:[%s4097_s13 + $0x1] ss:$0 sm:$0xff] }
0x16e3   :  { %2733 = vmatpush3.bf16.msra.mxu1 %v3877_v18  ;;  %2736 = vmatprep.mubr.msk.bf16.mxu1 %vm3200_vm0, %v3199_v0 }
0x16e4   :  { %2734 = vmatprep.subr.bf16.mxu1 %v3199_v0 }
0x16e7   :  { %2735 = vmatpush3.bf16.msra.mxu1 %v3881_v40 }
0x17ad   :  { %v1681_v41 = vpop.f32.mrb[28].mxu1 }
0x17ae   :  { %v1682_v42 = vadd.f32 %v3798_v38, %v1681_v41  ;;  %v2706_v44 = vpop.f32.mrb[29].mxu1 }
0x17af   :  { %v1684_v50 = vpop.f32.mrb[30].mxu1 }
0x17b0   :  { %1695 = vrot.lane.b32.xlu0 %v1682_v42, %s3197_s9  ;;  %v2707_v52 = vpop.f32.mrb[31].mxu1  ;;  %v1687_v63 = vadd.f32 %v1682_v42, %v3906_v27 }
0x17b2   :  { %v2477_v1 = vmul.f32 -1.442695, %v1687_v63 }
0x17b4   :  { %2915 = vpow2.f32 %v2477_v1 }
0x17b5   :  { %v1845_v54 = vpop.f32.mrb[32].mxu1 }
0x17b6   :  { %v1846_v55 = vadd.f32 %v3899_v13, %v1845_v54  ;;  %v2722_v56 = vpop.f32.mrb[33].mxu1 }
0x17b7   :  { %v1848_v58 = vpop.f32.mrb[34].mxu1 }
0x17b8   :  { %1852 = vrot.lane.b32.xlu1 %v1846_v55, %s3202_s20  ;;  %v2723_v62 = vpop.f32.mrb[35].mxu1 }
0x17bc   :  { %1869 = vrot.lane.b32.xlu1 %v1846_v55, %s3203_s29 }
0x17be   :  { %v2916_v4 = vpop.eup %2915 }
0x17bf   :  { %v1691_v57 = vadd.f32 1.0, %v2916_v4 }
0x17c1   :  { %2917 = vrcp.f32 %v1691_v57 }
0x17cb   :  { %v2918_v9 = vpop.eup %2917 }
0x17cc   :  { %v1705_v17 = vsub.f32 1.0, %v2918_v9  ;;  %v1711_v23 = vmul.f32 %v2918_v9, %v3872_v37 }
0x1822   :  { %v1696_v5 = vpop.permute.xlu0 %1695 }
0x1823   :  { %v1698_v33 = vmul.f32 %v2918_v9, %v1696_v5  ;;  %v1420_v5 = vadd.f32 %v3793_v21, %v3921_v3 }
0x1825   :  { %1700 = vrot.lane.b32.xlu0 %v1698_v33, %s3197_s9 }
0x182a   :  { %v1853_v28 = vpop.permute.xlu1 %1852 }
0x182b   :  { %v1855_v20 = vadd.f32 %v1853_v28, %v3912_v48  ;;  %v1862_v46 = vadd.f32 %v1853_v28, %v1474_v45 }
0x182d   :  { %v2484_v30 = vmul.f32 -1.442695, %v1855_v20  ;;  %v2485_v59 = vmul.f32 -1.442695, %v1862_v46 }
0x182e   :  { %v1870_v6 = vpop.permute.xlu1 %1869 }
0x182f   :  { %2919 = vpow2.f32 %v2484_v30 }
0x1839   :  { %v2920_v60 = vpop.eup %2919 }
0x183a   :  { %v1859_v51 = vadd.f32 1.0, %v2920_v60 }
0x183c   :  { %2921 = vrcp.f32 %v1859_v51 }
0x1846   :  { %v2922_v12 = vpop.eup %2921 }
0x1847   :  { %v1872_v8 = vmul.f32 %v2922_v12, %v1870_v6 }
0x1849   :  { %1874 = vrot.lane.b32.xlu0 %v1872_v8, %s3197_s9 }
0x1897   :  { %v1701_v10 = vpop.permute.xlu0 %1700 }
0x1898   :  { %v1703_v53 = vadd.f32 %v1701_v10, %v3906_v27 }
0x189a   :  { %2923 = vtanh.f32 %v1703_v53 }
0x18a4   :  { %v2924_v7 = vpop.eup %2923 }
0x18a5   :  { %1707 = vrot.lane.b32.xlu1 %v2924_v7, %s3202_s20 }
0x18bb   :  { %v1875_v47 = vpop.permute.xlu0 %1874 }
0x18bc   :  { %v1877_v16 = vadd.f32 %v1875_v47, %v1474_v45 }
0x18be   :  { %2925 = vtanh.f32 %v1877_v16 }
0x18bf   :  { %2927 = vpow2.f32 %v2485_v59 }
0x18c8   :  { %v2926_v14 = vpop.eup %2925 }
0x18c9   :  { %1881 = vrot.lane.b32.xlu1 %v2926_v14, %s3202_s20  ;;  %v2928_v49 = vpop.eup %2927 }
0x18ca   :  { %v1866_v25 = vadd.f32 1.0, %v2928_v49 }
0x18cc   :  { %2929 = vrcp.f32 %v1866_v25 }
0x18d6   :  { %v2930_v26 = vpop.eup %2929 }
0x18d7   :  { %v1879_v32 = vsub.f32 1.0, %v2930_v26  ;;  %v1885_v39 = vmul.f32 0.0, %v2930_v26  ;;  %v1366_v26 = vadd.f32 %v3856_v29, %v3921_v3 }
0x1917   :  { %v1708_v22 = vpop.permute.xlu1 %1707 }
0x1918   :  { %v1710_v2 = vmul.f32 %v1708_v22, %v1705_v17 }
0x191a   :  { %v3927_v24 = vadd.f32 %v1711_v23, %v1710_v2 }
0x191c   :  { %v1713_v43 = vpack.c.bf16 %v3927_v24, %v3927_v24 }
0x191e   :  { %1715 = vrot.lane.b32.xlu0 %v1713_v43, %s3202_s20 }
0x193b   :  { %v1882_v31 = vpop.permute.xlu1 %1881 }
0x193c   :  { %v1884_v35 = vmul.f32 %v1882_v31, %v1879_v32 }
0x193e   :  { %v3936_v19 = vadd.f32 %v1885_v39, %v1884_v35 }
0x1940   :  { %v1887_v41 = vpack.c.bf16 %v3936_v19, %v3936_v19 }
0x1990   :  { %v1716_v36 = vpop.permute.xlu0 %1715 }
0x1991   :  { %2713 = vmatmul.mubr.msk.bf16.vlgmr.msra.gmra.mrb[52].mxu0 %vm365_vm3, %v1716_v36 }
0x1992   :  { %2725 = vmatpush3.bf16.msra.mxu0 %v3877_v18  ;;  %2728 = vmatprep.mubr.msk.bf16.mxu0 %vm3200_vm0, %v3199_v0 }
0x1993   :  { %2726 = vmatprep.subr.bf16.mxu0 %v3199_v0 }
0x1996   :  { %2727 = vmatpush3.bf16.msra.mxu0 %v3881_v40 }
0x1997   :  { %2740 = vmatprep.subr.bf16.mxu0 %v3199_v0 }
0x1999   :  { %2729 = vmatmul.mubr.msk.bf16.vlgmr.msra.gmra.mrb[56].mxu0 %vm365_vm3, %v1887_v41 }
0x199a   :  { %2741 = vmatpush3.bf16.msra.mxu0 %v3877_v18  ;;  %2744 = vmatprep.mubr.msk.bf16.mxu0 %vm3200_vm0, %v3199_v0 }
0x199b   :  { %2742 = vmatprep.subr.bf16.mxu0 %v3199_v0 }
0x199e   :  { %2743 = vmatpush3.bf16.msra.mxu0 %v3881_v40 }
0x1a64   :  { %v3949_v42 = vpop.f32.mrb[52].mxu0 }
0x1a65   :  { %v2714_v44 = vpop.f32.mrb[53].mxu0 }
0x1a66   :  { %v1757_v50 = vpop.f32.mrb[54].mxu0 }
0x1a67   :  { %v2715_v52 = vpop.f32.mrb[55].mxu0 }
0x1a6c   :  { %v1925_v54 = vpop.f32.mrb[56].mxu0 }
0x1a6d   :  { %v1926_v55 = vadd.f32 %v3899_v13, %v1925_v54  ;;  %v2730_v56 = vpop.f32.mrb[57].mxu0 }
0x1a6e   :  { %v1928_v58 = vpop.f32.mrb[58].mxu0 }
0x1a6f   :  { %1949 = vrot.lane.b32.xlu1 %v1926_v55, %s3203_s29  ;;  %1932 = vrot.lane.b32.xlu0 %v1926_v55, %s3202_s20  ;;  %v2731_v18 = vpop.f32.mrb[59].mxu0 }
0x1ae1   :  { %v1933_v62 = vpop.permute.xlu0 %1932  ;;  %v1950_v57 = vpop.permute.xlu1 %1949 }
0x1ae2   :  { %v1935_v0 = vadd.f32 %v1933_v62, %v3906_v27  ;;  %v1942_v27 = vadd.f32 %v1933_v62, %v1420_v5 }
0x1ae4   :  { %v2487_v63 = vmul.f32 -1.442695, %v1935_v0  ;;  %v2488_v30 = vmul.f32 -1.442695, %v1942_v27 }
0x1ae6   :  { %2931 = vpow2.f32 %v2487_v63 }
0x1af0   :  { %v2932_v40 = vpop.eup %2931 }
0x1af1   :  { %v1939_v1 = vadd.f32 1.0, %v2932_v40 }
0x1af3   :  { %2933 = vrcp.f32 %v1939_v1 }
0x1afd   :  { %v2934_v4 = vpop.eup %2933 }
0x1afe   :  { %v1952_v9 = vmul.f32 %v2934_v4, %v1950_v57 }
0x1b00   :  { %1954 = vrot.lane.b32.xlu0 %v1952_v9, %s3197_s9  ;;  %v2769_v9 = vpack.i.bf16 %v3825_v61, %v3927_v24 }
0x1b72   :  { %v1955_v33 = vpop.permute.xlu0 %1954 }
0x1b73   :  { %v1957_v28 = vadd.f32 %v1955_v33, %v1420_v5 }
0x1b75   :  { %2935 = vtanh.f32 %v1957_v28 }
0x1b76   :  { %2937 = vpow2.f32 %v2488_v30 }
0x1b7f   :  { %v2936_v20 = vpop.eup %2935 }
0x1b80   :  { %1961 = vrot.lane.b32.xlu1 %v2936_v20, %s3202_s20  ;;  %v2938_v60 = vpop.eup %2937 }
0x1b81   :  { %v1946_v51 = vadd.f32 1.0, %v2938_v60 }
0x1b83   :  { %2939 = vrcp.f32 %v1946_v51 }
0x1b8d   :  { %v2940_v6 = vpop.eup %2939 }
0x1b8e   :  { %v1959_v12 = vsub.f32 1.0, %v2940_v6  ;;  %v1965_v10 = vmul.f32 %v2940_v6, %v3936_v19 }
0x1bf2   :  { %v1962_v8 = vpop.permute.xlu1 %1961 }
0x1bf3   :  { %v1964_v53 = vmul.f32 %v1962_v8, %v1959_v12 }
0x1bf5   :  { %v3960_v7 = vadd.f32 %v1965_v10, %v1964_v53 }
0x1bf7   :  { %v1967_v21 = vpack.c.bf16 %v3960_v7, %v3960_v7 }
0x1bf9   :  { %2737 = vmatmul.mubr.msk.bf16.vlgmr.msra.gmra.mrb[36].mxu1 %vm365_vm3, %v1967_v21 }
0x1ccc   :  { %v2005_v45 = vpop.f32.mrb[36].mxu1 }
0x1ccd   :  { %v2006_v47 = vadd.f32 %v3899_v13, %v2005_v45  ;;  %v2738_v16 = vpop.f32.mrb[37].mxu1 }
0x1cce   :  { %v2008_v14 = vpop.f32.mrb[38].mxu1 }
0x1ccf   :  { %2029 = vrot.lane.b32.xlu1 %v2006_v47, %s3203_s29  ;;  %2012 = vrot.lane.b32.xlu0 %v2006_v47, %s3202_s20  ;;  %v2739_v17 = vpop.f32.mrb[39].mxu1  ;;  %v2824_v14 = vld [vmem:[%s4098_s14] sm:$0xff]  }
0x1cd0   :  { %v2825_v17 = vld [vmem:[%s4098_s14 + $0x48] sm:$0xff]  }
0x1d41   :  { %v2013_v22 = vpop.permute.xlu0 %2012  ;;  %v2030_v49 = vpop.permute.xlu1 %2029 }
0x1d42   :  { %v2015_v23 = vadd.f32 %v2013_v22, %v3865_v11  ;;  %v1755_v11 = vadd.f32 %v3798_v38, %v3949_v42  ;;  %v2022_v36 = vadd.f32 %v2013_v22, %v1366_v26 }
0x1d44   :  { %v2490_v2 = vmul.f32 -1.442695, %v2015_v23  ;;  %v2491_v39 = vmul.f32 -1.442695, %v2022_v36  ;;  %v1760_v41 = vadd.f32 %v1755_v11, %v3912_v48  ;;  %v2828_v23 = vld [vmem:[%s4098_s14 + $0x10] sm:$0xff]  }
0x1d46   :  { %2941 = vpow2.f32 %v2490_v2  ;;  %v2479_v44 = vmul.f32 -1.442695, %v1760_v41  ;;  %v2829_v2 = vld [vmem:[%s4098_s14 + $0x58] sm:$0xff]  }
0x1d50   :  { %v2942_v43 = vpop.eup %2941 }
0x1d51   :  { %v2019_v46 = vadd.f32 1.0, %v2942_v43  ;;  %v2830_v43 = vld [vmem:[%s4098_s14 + $0x18] sm:$0xff]  }
0x1d53   :  { %2943 = vrcp.f32 %v2019_v46  ;;  %v2831_v46 = vld [vmem:[%s4098_s14 + $0x60] sm:$0xff]  }
0x1d5d   :  { %v2944_v59 = vpop.eup %2943 }
0x1d5e   :  { %v2032_v25 = vmul.f32 %v2944_v59, %v2030_v49  ;;  %v2832_v59 = vld [vmem:[%s4098_s14 + $0x20] sm:$0xff]   ;;  %v2833_v49 = vld [vmem:[%s4098_s14 + $0x68] sm:$0xff]  }
0x1d60   :  { %2034 = vrot.lane.b32.xlu0 %v2032_v25, %s3197_s9  ;;  %v2834_v25 = vld [vmem:[%s4098_s14 + $0x28] sm:$0xff]  }
0x1dd2   :  { %v2035_v31 = vpop.permute.xlu0 %2034 }
0x1dd3   :  { %v2037_v32 = vadd.f32 %v2035_v31, %v1366_v26 }
0x1dd5   :  { %2945 = vtanh.f32 %v2037_v32 }
0x1dd6   :  { %2947 = vpow2.f32 %v2491_v39  ;;  %v2836_v39 = vld [vmem:[%s4098_s14 + $0x30] sm:$0xff]  }
0x1dd7   :  { %2949 = vpow2.f32 %v2479_v44  ;;  %v2837_v44 = vld [vmem:[%s4098_s14 + $0x78] sm:$0xff]  }
0x1ddf   :  { %v2946_v35 = vpop.eup %2945 }
0x1de0   :  { %2041 = vrot.lane.b32.xlu1 %v2946_v35, %s3202_s20  ;;  %v2948_v50 = vpop.eup %2947 }
0x1de1   :  { %v2026_v29 = vadd.f32 1.0, %v2948_v50  ;;  %v2950_v52 = vpop.eup %2949 }
0x1de2   :  { %v1764_v54 = vadd.f32 1.0, %v2950_v52 }
0x1de3   :  { %2951 = vrcp.f32 %v2026_v29  ;;  %v2838_v29 = vld [vmem:[%s4098_s14 + $0x38] sm:$0xff]  }
0x1de4   :  { %1768 = vrot.lane.b32.xlu1 %v1755_v11, %s3197_s9  ;;  %2953 = vrcp.f32 %v1764_v54  ;;  %v2835_v11 = vld [vmem:[%s4098_s14 + $0x70] sm:$0xff]  }
0x1ded   :  { %v2952_v55 = vpop.eup %2951 }
0x1dee   :  { %v2039_v56 = vsub.f32 1.0, %v2952_v55  ;;  %v2045_v38 = vmul.f32 %v2952_v55, %v3960_v7  ;;  %v2954_v62 = vpop.eup %2953 }
0x1def   :  { %v1784_v60 = vmul.f32 %v2954_v62, %v3927_v24  ;;  %v1312_v24 = vadd.f32 %v3815_v34, %v3921_v3  ;;  %v2826_v34 = vld [vmem:[%s4098_s14 + $0x8] sm:$0xff]   ;;  %v2827_v3 = vld [vmem:[%s4098_s14 + $0x50] sm:$0xff]  }
0x1e52   :  { %v2042_v58 = vpop.permute.xlu1 %2041 }
0x1e53   :  { %v2044_v42 = vmul.f32 %v2042_v58, %v2039_v56  ;;  %v4049_v56 = vld [vmem:[#allocation2] sm:$0x3] }
0x1e55   :  { %v3978_v18 = vadd.f32 %v2045_v38, %v2044_v42 }
0x1e56   :  { %v1769_v0 = vpop.permute.xlu1 %1768 }
0x1e57   :  { %v2047_v63 = vpack.c.bf16 %v3978_v18, %v3978_v18  ;;  %v1771_v40 = vmul.f32 %v2954_v62, %v1769_v0  ;;  %v2784_v38 = vpack.i.bf16 %v3978_v18, %v3936_v19 }
0x1e59   :  { %2745 = vmatmul.mubr.msk.bf16.vlgmr.msra.gmra.mrb[60].mxu0 %vm365_vm3, %v2047_v63  ;;  %1773 = vrot.lane.b32.xlu1 %v1771_v40, %s3197_s9 }
0x1ecb   :  { %v1774_v1 = vpop.permute.xlu1 %1773 }
0x1ecc   :  { %v1776_v4 = vadd.f32 %v1774_v1, %v3912_v48  ;;  %v1778_v48 = vsub.f32 1.0, %v2954_v62 }
0x1ece   :  { %2955 = vtanh.f32 %v1776_v4 }
0x1ed8   :  { %v2956_v57 = vpop.eup %2955 }
0x1ed9   :  { %1780 = vrot.lane.b32.xlu1 %v2956_v57, %s3202_s20 }
0x1edd   :  { %2770 = vrot.lane.b32.xlu1 %v2769_v9, %s3202_s20 }
0x1f2c   :  { %v2085_v5 = vpop.f32.mrb[60].mxu0 }
0x1f2d   :  { %v2086_v33 = vadd.f32 %v3899_v13, %v2085_v5  ;;  %v2746_v28 = vpop.f32.mrb[61].mxu0 }
0x1f2e   :  { %v2088_v20 = vpop.f32.mrb[62].mxu0 }
0x1f2f   :  { %2092 = vrot.lane.b32.xlu0 %v2086_v33, %s3202_s20  ;;  %v2747_v27 = vpop.f32.mrb[63].mxu0 }
0x1f33   :  { %2109 = vrot.lane.b32.xlu0 %v2086_v33, %s3203_s29 }
0x1f4b   :  { %v1781_v30 = vpop.permute.xlu1 %1780 }
0x1f4c   :  { %v1783_v51 = vmul.f32 %v1781_v30, %v1778_v48 }
0x1f4e   :  { %v1785_v6 = vadd.f32 %v1784_v60, %v1783_v51 }
0x1f4f   :  { %v2771_v42 = vpop.permute.xlu1 %2770 }
0x1f50   :  { %v2774_v61 = vpack.i.bf16 %v3872_v37, %v1785_v6  ;;  %v2773_v0 = vunpack.i.h.bf16 %v2771_v42  ;;  %v2772_v63 = vunpack.i.l.bf16 %v2771_v42  ;;  %v2495_v6 = vld [vmem:[%s4099_s15] ss:$0 sm:$0xff]  ;;  %s3205_s15 = smov [#allocation16]  }
0x1f52   :  { %2775 = vrot.lane.b32.xlu1 %v2774_v61, %s3203_s29 }
0x1f56   :  { %2349 = vrot.lane.b32.xlu1 %v4049_v56, %s3198_s23 }
0x1fa1   :  { %v2093_v12 = vpop.permute.xlu0 %2092 }
0x1fa2   :  { %v2095_v13 = vadd.f32 %v2093_v12, %v3813_v15  ;;  %v2823_v15 = vld [vmem:[%s4098_s14 + $0x40] sm:$0xff]   ;;  %v2102_v26 = vadd.f32 %v2093_v12, %v1312_v24 }
0x1fa3   :  { %2572 = vmatprep.subr.bf16.mxu1 %v2823_v15 }
0x1fa4   :  { %v2493_v8 = vmul.f32 -1.442695, %v2095_v13  ;;  %2573 = vmatpush3.bf16.msra.mxu1 %v2824_v14  ;;  %v2494_v31 = vmul.f32 -1.442695, %v2102_v26 }
0x1fa5   :  { %v2110_v45 = vpop.permute.xlu0 %2109  ;;  %2574 = vmatprep.subr.bf16.mxu1 %v2825_v17 }
0x1fa6   :  { %2957 = vpow2.f32 %v2493_v8 }
0x1fa8   :  { %2575 = vmatpush3.bf16.msra.mxu1 %v2826_v34 }
0x1fa9   :  { %2576 = vmatprep.subr.bf16.mxu1 %v2827_v3 }
0x1fac   :  { %2577 = vmatpush3.bf16.msra.mxu1 %v2828_v23 }
0x1fad   :  { %2578 = vmatprep.subr.bf16.mxu1 %v2829_v2 }
0x1fb0   :  { %v2958_v10 = vpop.eup %2957  ;;  %2579 = vmatpush3.bf16.msra.mxu1 %v2830_v43  ;;  %v2368_v43 = vmul.f32 -0.5, %v4049_v56 }
0x1fb1   :  { %v2099_v53 = vadd.f32 1.0, %v2958_v10  ;;  %2580 = vmatprep.subr.bf16.mxu1 %v2831_v46 }
0x1fb3   :  { %2959 = vrcp.f32 %v2099_v53 }
0x1fb4   :  { %2581 = vmatpush3.bf16.msra.mxu1 %v2832_v59 }
0x1fb5   :  { %2582 = vmatprep.subr.bf16.mxu1 %v2833_v49 }
0x1fb8   :  { %2583 = vmatpush3.bf16.msra.mxu1 %v2834_v25  ;;  %v2369_v25 = vmul.f32 %v2368_v43, %v4049_v56 }
0x1fb9   :  { %2584 = vmatprep.subr.bf16.mxu1 %v2835_v11 }
0x1fbc   :  { %2585 = vmatpush3.bf16.msra.mxu1 %v2836_v39 }
0x1fbd   :  { %v2960_v21 = vpop.eup %2959  ;;  %2586 = vmatprep.subr.bf16.mxu1 %v2837_v44 }
0x1fbe   :  { %v2112_v47 = vmul.f32 %v2960_v21, %v2110_v45 }
0x1fc0   :  { %2114 = vrot.lane.b32.xlu0 %v2112_v47, %s3197_s9  ;;  %2587 = vmatpush3.bf16.msra.mxu1 %v2838_v29 }
0x1fc4   :  { %v2776_v40 = vpop.permute.xlu1 %2775 }
0x1fc5   :  { %v2778_v9 = vunpack.i.h.bf16 %v2776_v40  ;;  %v2777_v5 = vunpack.i.l.bf16 %v2776_v40 }
0x1fc8   :  { %v2350_v47 = vpop.permute.xlu1 %2349 }
0x2032   :  { %v2115_v16 = vpop.permute.xlu0 %2114 }
0x2033   :  { %v2117_v37 = vadd.f32 %v2115_v16, %v1312_v24 }
0x2035   :  { %2961 = vtanh.f32 %v2117_v37 }
0x2036   :  { %2963 = vpow2.f32 %v2494_v31 }
0x203f   :  { %v2962_v22 = vpop.eup %2961 }
0x2040   :  { %2121 = vrot.lane.b32.xlu0 %v2962_v22, %s3202_s20  ;;  %v2964_v32 = vpop.eup %2963 }
0x2041   :  { %v2106_v35 = vadd.f32 1.0, %v2964_v32 }
0x2043   :  { %2965 = vrcp.f32 %v2106_v35 }
0x204d   :  { %v2966_v36 = vpop.eup %2965 }
0x204e   :  { %v2119_v41 = vsub.f32 1.0, %v2966_v36  ;;  %v2125_v52 = vmul.f32 %v2966_v36, %v3978_v18 }
0x20b2   :  { %v2122_v50 = vpop.permute.xlu0 %2121 }
0x20b3   :  { %v2124_v54 = vmul.f32 %v2122_v50, %v2119_v41 }
0x20b5   :  { %v2126_v55 = vadd.f32 %v2125_v52, %v2124_v54 }
0x20b7   :  { %v2779_v58 = vpack.i.bf16 %v2126_v55, %v3960_v7 }
0x20b9   :  { %2780 = vrot.lane.b32.xlu0 %v2779_v58, %s3203_s29  ;;  %s2394_s29 = sshll.u32 %s3205_s15, 4  ;;  %s2395_s29 = int_to_ptr.vmem [resolvable:$true] %s2394_s29 }
0x20ba   :  { %s3151_s1 = scalar_lea.vmem %s2395_s29, 32  ;;  %p3156_p9 = scmp.lt.s32.totalorder %s2395_s29, %s2395_s29 }
0x20bb   :  { %p3152_p8 = scmp.ne.s32.totalorder %s2395_s29, %s3151_s1  ;;  %p3157_p10 = scmp.lt.s32.totalorder %s3151_s1, %s3151_s1 }
0x20bd   :  { %2785 = vrot.lane.b32.xlu0 %v2784_v38, %s3202_s20  ;;  %s3204_s20 = smov 124   ;;  %p3158_p11 = por %p3157_p10, %p3156_p9 }
0x20bf   :  { %p3159_p12 = pnand %p3158_p11, %p3152_p8 }
0x212b   :  { %v2781_v62 = vpop.permute.xlu0 %2780 }
0x212c   :  { %v2783_v1 = vunpack.i.h.bf16 %v2781_v62  ;;  %v2782_v4 = vunpack.i.l.bf16 %v2781_v62 }
0x212e   :  { %v2159_v57 = vsel %vm365_vm3, %v2773_v0, %v2783_v1  ;;  %v2163_v7 = vsel %vm365_vm3, %v2772_v63, %v2782_v4 }
0x212f   :  { %v2786_v33 = vpop.permute.xlu0 %2785  ;;  %v2160_v19 = vsel %vm1271_vm4, %v2159_v57, %v2778_v9  ;;  %v2164_v18 = vsel %vm1271_vm4, %v2163_v7, %v2777_v5 }
0x2130   :  { %v2788_v28 = vunpack.i.h.bf16 %v2786_v33  ;;  %v2787_v20 = vunpack.i.l.bf16 %v2786_v33 }
0x2132   :  { %v2162_v27 = vsel %vm2161_vm5, %v2160_v19, %v2788_v28  ;;  %v2165_v48 = vsel %vm2161_vm5, %v2164_v18, %v2787_v20 }
0x2133   :  { %v2198_v30 = vpack.c.bf16 %v2162_v27, %v2162_v27  ;;  %v2199_v60 = vpack.c.bf16 %v2165_v48, %v2165_v48 }
0x2135   :  { %2335 = vmatprep.mubr.bf16.mxu1 %v2199_v60 }
0x2136   :  { %2336 = vmatmul.mubr.bf16.vlgmr.msra.gmra.mrb[40].mxu1 %v2198_v30 }
0x2209   :  { %v2588_v51 = vpop.f32.mrb[40].mxu1 }
0x220a   :  { %v2589_v61 = vpop.f32.mrb[41].mxu1 }
0x220b   :  { %v2590_v12 = vadd.f32 %v2589_v61, %v2588_v51  ;;  %v2591_v13 = vpop.f32.mrb[42].mxu1 }
0x220c   :  { %v2592_v8 = vpop.f32.mrb[43].mxu1 }
0x220d   :  { %v2338_v10 = vadd.f32 %v2590_v12, %v2495_v6 }
0x220f   :  { %v2343_v53 = vmax.f32 %v2338_v10, -20.0 }
0x2211   :  { %v2344_v21 = vmin.f32 %v2343_v53, 2.0 }
0x2213   :  { %2371 = vrot.lane.b32.xlu1 %v2344_v21, %s3204_s20  ;;  %v2345_v45 = vmul.f32 1.442695, %v2344_v21 }
0x2215   :  { %2967 = vpow2.f32 %v2345_v45 }
0x221f   :  { %v2968_v24 = vpop.eup %2967 }
0x2220   :  { %v2352_v16 = vmul.f32 %v2968_v24, %v2350_v47 }
0x2222   :  { %2354 = vrot.lane.b32.xlu0 %v2352_v16, %s3204_s20 }
0x2285   :  { %v2372_v32 = vpop.permute.xlu1 %2371 }
0x2286   :  { %v2374_v11 = vsub.f32 %v2369_v25, %v2372_v32 }
0x2294   :  { %v2355_v37 = vpop.permute.xlu0 %2354 }
0x2295   :  { %v2357_v15 = vadd.f32 %v2355_v37, %v2338_v10 }
0x2297   :  { %v2358_v14 = vmul.f32 -2.0, %v2357_v15  ;;  %2969 = vtanh.f32 %v2357_v15  ;;  %v2375_v26 = vsub.f32 0.6931472, %v2357_v15 }
0x2299   :  { %v2360_v17 = vand.u32 2147483647, %v2358_v14  ;;  %v2359_v59 = vmax.f32 %v2358_v14, 0.0 }
0x229b   :  { %v2361_v22 = vsub.f32 0.0, %v2360_v17 }
0x229d   :  { %v2362_v34 = vmul.f32 1.442695, %v2361_v22 }
0x229f   :  { %2971 = vpow2.f32 %v2362_v34 }
0x22a1   :  { %v2970_v3 = vpop.eup %2969 }
0x22a2   :  { %2385 = vst.msk [vmem:[#allocation16] sm:$0x3] %vm2379_vm6, %v2970_v3 }
0x22a9   :  { %v2972_v23 = vpop.eup %2971 }
0x22aa   :  { %v2364_v2 = vadd.f32 1.0, %v2972_v23 }
0x22ac   :  { %2973 = vlog2.f32 %v2364_v2 }
0x22b6   :  { %v2974_v46 = vpop.eup %2973 }
0x22b7   :  { %v2366_v49 = vmul.f32 0.6931472, %v2974_v46 }
0x22b9   :  { %v2367_v31 = vadd.f32 %v2366_v49, %v2359_v59 }
0x22bb   :  { %v2376_v35 = vsub.f32 %v2375_v26, %v2367_v31 }
0x22bd   :  { %v2377_v36 = vmul.f32 2.0, %v2376_v35 }
0x22bf   :  { %v2378_v39 = vsub.f32 %v2374_v11, %v2377_v36 }
0x22c1   :  { %v2380_v41 = vsel %vm2379_vm6, %v2378_v39, 0.0 }
0x22c2   :  { %2381 = vadd.xlane.f32.xlu0 %v2380_v41 }
0x22c3   :  { %3162 = shalt.err (!%p3159_p12)
}
0x22c4   :  { %s3163_s25 = scalar_lea.hbm %s4100_s16, 32 }
0x22c5   :  { %p3164_p13 = scmp.ne.s32.totalorder %s4100_s16, %s3163_s25  ;;  %p3167_p0 = scmp.lt.u32.totalorder %s3163_s25, %s4100_s16 }
0x22c7   :  { %p3169_p1 = pnand %p3167_p0, %p3164_p13 }
0x22c9   :  { %3172 = shalt.err (!%p3169_p1)
}
0x22ca   :  { %2397 = dma.vmem_to_hbm [thread:$0]  %s2395_s29, 32, %s4100_s16, [#allocation4]   ;;  %vm2386_vm7 = vcmask 1024  }
0x234f   :  { %v2382_v44 = vpop.xlane.xlu0 %2381 }
0x2350   :  { %v2512_v50 = vadd.f32 -3.675754, %v2382_v44 }
0x2352   :  { %2387 = vst.msk [vmem:[%s4101_s17] sm:$0x3] %vm2386_vm7, %v2512_v50 }
0x2353   :  { %3183 = dma.done.wait [#allocation4], 32  }
0x2354   :  { %3184 = vsyncadd [#allocation4], 4294967264 }
0x2355   :  { %2405 = vsyncpa [#allocation3], 1 }
0x2356   :  { %2406 = vsyncpa [#allocation6], 1 }
0x2357   :  { %2407 = vsyncpa [#allocation9], 1 }
0x2358   :  { %2408 = vsyncpa [#allocation12], 1 }
0x2359   :  { %2409 = vsyncpa [#allocation15], 1 }
0x235a   :  { %2410 = vsyncpa [#allocation4], 1 }

</bundles_post_ra>
